<compile_context>
chip_gen: v6e
topology: v6e:2x2x1
jax: 0.10.0
libtpu: 0.0.40
codegen_flags: <defaults>
</compile_context>

<pallas_src>
import math
import numpy as np
import jax
import jax.numpy as jnp
from jax.experimental import pallas as pl
from jax.experimental.pallas import tpu as pltpu

# ----------------------------- config (small shapes) -------------------------
TEXT_EMB_VECTORS = 50     # embedding table rows
VOCAB_SIZE = 16           # PositionalEncoder "position" (>= decoder seq len)
NUM_LAYERS = 2
D_FF = 64
D_MODEL = 32
NUM_HEADS = 4
DEPTH = D_MODEL // NUM_HEADS
SQRT_D = math.sqrt(D_MODEL)
INV_SQRT_DEPTH = 1.0 / math.sqrt(DEPTH)
EPS = 1e-5                # nn.LayerNorm default
NEG_INF = -1000000000.0   # same constant as the reference


# ----------------------------- in-kernel helpers -----------------------------
def _layernorm(x, g, b):
    mu = jnp.mean(x, axis=-1, keepdims=True)
    var = jnp.mean((x - mu) ** 2, axis=-1, keepdims=True)
    return (x - mu) * jax.lax.rsqrt(var + EPS) * g + b


def _attention(q, k, v_masked, bias, wo, bo):
    """q: (T, D) already scaled by 1/sqrt(depth); k: (Sk, D);
    v_masked[h]: (Sk, D) with only head h's lane slice nonzero;
    bias: (T, Sk) additive mask (already * -1e9, block-diagonal across batch)."""
    T = q.shape[0]
    concat = jnp.zeros((T, D_MODEL), jnp.float32)
    for h in range(NUM_HEADS):
        lo, hi = h * DEPTH, (h + 1) * DEPTH
        logits = jax.lax.dot_general(
            q[:, lo:hi], k[:, lo:hi], (((1,), (1,)), ((), ())),
            preferred_element_type=jnp.float32) + bias
        m = jnp.max(logits, axis=-1, keepdims=True)
        e = jnp.exp(logits - m)
        p = e * pl.reciprocal(jnp.sum(e, axis=-1, keepdims=True), approx=True)
        # attn @ (v with non-head lanes zeroed) lands this head's output in its
        # own lane slice -> the sum over heads IS the concat-of-heads matrix,
        # built without a lane-concatenate op.
        concat = concat + jnp.dot(p, v_masked[h], preferred_element_type=jnp.float32)
    # single output projection against the full Wo
    return jnp.dot(concat, wo, preferred_element_type=jnp.float32) + bo


# ----------------------------- fused Pallas kernel ----------------------------
def decoder_kernel(emb_ref, pe_ref, enc_ref, sbias_ref, cbias_ref,
                   wq1, bq1, wk1, bk1, wv1, bv1, wo1, bo1,
                   wq2, bq2, wk2, bk2, wv2, bv2, wo2, bo2,
                   g1, be1, g2, be2, g3, be3,
                   wf1, bf1, wf2, bf2,
                   out_ref):
    # emb *= sqrt(d_model); then PE: sqrt(d_model)*emb + pe  (two scalings, as in source)
    x = SQRT_D * (SQRT_D * emb_ref[...]) + pe_ref[...]
    enc = enc_ref[...]
    sb = sbias_ref[...]          # (B*S, B*S) self-attention additive bias
    cb = cbias_ref[...]          # (B*S, B*Se) cross-attention additive bias

    Wq1, Bq1 = wq1[...], bq1[...]
    Wk1, Bk1 = wk1[...], bk1[...]
    Wv1, Bv1 = wv1[...], bv1[...]
    Wo1, Bo1 = wo1[...], bo1[...]
    Wq2, Bq2 = wq2[...], bq2[...]
    Wk2, Bk2 = wk2[...], bk2[...]
    Wv2, Bv2 = wv2[...], bv2[...]
    Wo2, Bo2 = wo2[...], bo2[...]
    G1, B1 = g1[...], be1[...]
    G2, B2 = g2[...], be2[...]
    G3, B3 = g3[...], be3[...]
    Wf1, Bf1 = wf1[...], bf1[...]
    Wf2, Bf2 = wf2[...], bf2[...]

    # per-head lane masks, hoisted (JAX does not CSE broadcasts)
    lane = jax.lax.broadcasted_iota(jnp.int32, (1, D_MODEL), 1)
    head_masks = [(lane >= h * DEPTH) & (lane < (h + 1) * DEPTH)
                  for h in range(NUM_HEADS)]

    # cross-attention K/V depend only on enc_output and the shared weights
    # -> identical in every layer, compute once.
    k2 = jnp.dot(enc, Wk2, preferred_element_type=jnp.float32) + Bk2
    v2 = jnp.dot(enc, Wv2, preferred_element_type=jnp.float32) + Bv2
    v2_masked = [jnp.where(m, v2, 0.0) for m in head_masks]

    for _ in range(NUM_LAYERS):   # same block (shared weights) applied num_layers times
        # --- masked self attention + residual + LN
        q1 = (jnp.dot(x, Wq1, preferred_element_type=jnp.float32) + Bq1) * INV_SQRT_DEPTH
        k1 = jnp.dot(x, Wk1, preferred_element_type=jnp.float32) + Bk1
        v1 = jnp.dot(x, Wv1, preferred_element_type=jnp.float32) + Bv1
        v1_masked = [jnp.where(m, v1, 0.0) for m in head_masks]
        attn1 = _attention(q1, k1, v1_masked, sb, Wo1, Bo1)
        a1 = _layernorm(x + attn1, G1, B1)

        # --- cross attention + residual + LN (dropout_1/2 identity in eval)
        q2 = (jnp.dot(a1, Wq2, preferred_element_type=jnp.float32) + Bq2) * INV_SQRT_DEPTH
        attn2 = _attention(q2, k2, v2_masked, cb, Wo2, Bo2)
        a2 = _layernorm(a1 + attn2, G2, B2)

        # --- feed-forward + residual + LN (dropout_3 identity)
        h = jnp.maximum(jnp.dot(a2, Wf1, preferred_element_type=jnp.float32) + Bf1, 0.0)
        ff = jnp.dot(h, Wf2, preferred_element_type=jnp.float32) + Bf2
        x = _layernorm(a2 + ff, G3, B3)

    out_ref[...] = x


# ----------------------------- wrapper ----------------------------------------
def decoder_forward(params, enc_output, dec_input, padding_mask, look_ahead_mask):
    """enc_output: (B, Se, D) f32; dec_input: (B, S) int32;
    padding_mask: (B, 1, 1, Se); look_ahead_mask: (B, 1, S, S)."""
    B, S = dec_input.shape
    Se = enc_output.shape[1]

    # TODO(synk): the data-dependent embedding gather stays in the JAX wrapper.
    emb = jnp.take(params['emb_table'], dec_input, axis=0).reshape(B * S, D_MODEL)
    pe = jnp.tile(params['pe'][0, :S, :], (B, 1))                    # (B*S, D)
    enc = enc_output.reshape(B * Se, D_MODEL).astype(jnp.float32)    # (B*Se, D)

    # Fold batch into the sublane axis. Attention over the folded rows is kept
    # batch-local with a block-diagonal additive bias: -1e9 off the diagonal
    # blocks, mask * -1e9 inside them (same trick the reference uses; exp(-1e9)
    # underflows to exactly 0 in f32, so row normalization is unchanged).
    la = jnp.broadcast_to(look_ahead_mask[:, 0], (B, S, S)).astype(jnp.float32)
    pm = jnp.broadcast_to(padding_mask[:, 0, 0][:, None, :], (B, S, Se)).astype(jnp.float32)
    sbias = jnp.full((B, S, B, S), NEG_INF, jnp.float32)
    cbias = jnp.full((B, S, B, Se), NEG_INF, jnp.float32)
    for b in range(B):
        sbias = sbias.at[b, :, b, :].set(la[b] * NEG_INF)
        cbias = cbias.at[b, :, b, :].set(pm[b] * NEG_INF)
    sbias = sbias.reshape(B * S, B * S)
    cbias = cbias.reshape(B * S, B * Se)

    weights = [params[k] for k in (
        'wq1', 'bq1', 'wk1', 'bk1', 'wv1', 'bv1', 'wo1', 'bo1',
        'wq2', 'bq2', 'wk2', 'bk2', 'wv2', 'bv2', 'wo2', 'bo2',
        'g1', 'be1', 'g2', 'be2', 'g3', 'be3',
        'wf1', 'bf1', 'wf2', 'bf2')]

    args = (emb, pe, enc, sbias, cbias, *weights)
    vmem_spec = pl.BlockSpec(memory_space=pltpu.MemorySpace.VMEM)   # whole array in VMEM

    out = pl.pallas_call(
        decoder_kernel,
        out_shape=jax.ShapeDtypeStruct((B * S, D_MODEL), jnp.float32),
        in_specs=[vmem_spec] * len(args),
        out_specs=vmem_spec,
    )(*args)
    return out.reshape(B, S, D_MODEL)


# ----------------------------- deterministic params ---------------------------
def make_pe(position, d_model):
    pe = np.zeros((position, d_model), np.float32)
    for pos in range(position):
        for i in range(0, d_model, 2):
            pe[pos, i] = math.sin(pos / 10000 ** (2 * i / d_model))
            pe[pos, i + 1] = math.cos(pos / 10000 ** (2 * i / d_model))
    return jnp.asarray(pe)[None]  # (1, position, d_model)


def init_params(key):
    keys = jax.random.split(key, 16)

    def lin(k, din, dout):
        kw, kb = jax.random.split(k)
        w = jax.random.normal(kw, (din, dout), jnp.float32) * 0.05
        b = jax.random.normal(kb, (1, dout), jnp.float32) * 0.05
        return w, b

    p = {}
    p['emb_table'] = jax.random.normal(keys[0], (TEXT_EMB_VECTORS, D_MODEL), jnp.float32)
    p['wq1'], p['bq1'] = lin(keys[1], D_MODEL, D_MODEL)
    p['wk1'], p['bk1'] = lin(keys[2], D_MODEL, D_MODEL)
    p['wv1'], p['bv1'] = lin(keys[3], D_MODEL, D_MODEL)
    p['wo1'], p['bo1'] = lin(keys[4], D_MODEL, D_MODEL)
    p['wq2'], p['bq2'] = lin(keys[5], D_MODEL, D_MODEL)
    p['wk2'], p['bk2'] = lin(keys[6], D_MODEL, D_MODEL)
    p['wv2'], p['bv2'] = lin(keys[7], D_MODEL, D_MODEL)
    p['wo2'], p['bo2'] = lin(keys[8], D_MODEL, D_MODEL)
    p['g1'] = jnp.ones((1, D_MODEL), jnp.float32); p['be1'] = jnp.zeros((1, D_MODEL), jnp.float32)
    p['g2'] = jnp.ones((1, D_MODEL), jnp.float32); p['be2'] = jnp.zeros((1, D_MODEL), jnp.float32)
    p['g3'] = jnp.ones((1, D_MODEL), jnp.float32); p['be3'] = jnp.zeros((1, D_MODEL), jnp.float32)
    p['wf1'], p['bf1'] = lin(keys[9], D_MODEL, D_FF)
    p['wf2'], p['bf2'] = lin(keys[10], D_FF, D_MODEL)
    p['pe'] = make_pe(VOCAB_SIZE, D_MODEL)
    return p


# ----------------------------- main -------------------------------------------
if __name__ == "__main__":
    key = jax.random.PRNGKey(0)
    kp, ki, ke = jax.random.split(key, 3)
    params = init_params(kp)

    B, S, Se = 2, 8, 8
    dec_input = jax.random.randint(ki, (B, S), 0, TEXT_EMB_VECTORS)            # (B, S) int32
    enc_output = jax.random.normal(ke, (B, Se, D_MODEL), jnp.float32)          # (B, Se, D)
    # look-ahead mask (B, 1, S, S): 1.0 marks masked (future) positions
    la = jnp.broadcast_to(jnp.triu(jnp.ones((S, S), jnp.float32), k=1)[None, None],
                          (B, 1, S, S))
    # padding mask (B, 1, 1, Se): mask last two encoder positions of batch element 1
    pad = jnp.zeros((B, 1, 1, Se), jnp.float32).at[1, 0, 0, -2:].set(1.0)

    out = decoder_forward(params, enc_output, dec_input, pad, la)
    out = jax.block_until_ready(out)
    assert out.shape == (B, S, D_MODEL) and out.dtype == jnp.float32
    assert bool(jnp.all(jnp.isfinite(out)))
    print("KERNEL_OK")
</pallas_src>

<mosaic_0001>
module attributes {stable_mosaic.version = 11 : i64} {
  func.func @decoder_kernel(%arg0: memref<16x32xf32, #tpu.memory_space<vmem>>, %arg1: memref<16x32xf32, #tpu.memory_space<vmem>>, %arg2: memref<16x32xf32, #tpu.memory_space<vmem>>, %arg3: memref<16x16xf32, #tpu.memory_space<vmem>>, %arg4: memref<16x16xf32, #tpu.memory_space<vmem>>, %arg5: memref<32x32xf32, #tpu.memory_space<vmem>>, %arg6: memref<1x32xf32, #tpu.memory_space<vmem>>, %arg7: memref<32x32xf32, #tpu.memory_space<vmem>>, %arg8: memref<1x32xf32, #tpu.memory_space<vmem>>, %arg9: memref<32x32xf32, #tpu.memory_space<vmem>>, %arg10: memref<1x32xf32, #tpu.memory_space<vmem>>, %arg11: memref<32x32xf32, #tpu.memory_space<vmem>>, %arg12: memref<1x32xf32, #tpu.memory_space<vmem>>, %arg13: memref<32x32xf32, #tpu.memory_space<vmem>>, %arg14: memref<1x32xf32, #tpu.memory_space<vmem>>, %arg15: memref<32x32xf32, #tpu.memory_space<vmem>>, %arg16: memref<1x32xf32, #tpu.memory_space<vmem>>, %arg17: memref<32x32xf32, #tpu.memory_space<vmem>>, %arg18: memref<1x32xf32, #tpu.memory_space<vmem>>, %arg19: memref<32x32xf32, #tpu.memory_space<vmem>>, %arg20: memref<1x32xf32, #tpu.memory_space<vmem>>, %arg21: memref<1x32xf32, #tpu.memory_space<vmem>>, %arg22: memref<1x32xf32, #tpu.memory_space<vmem>>, %arg23: memref<1x32xf32, #tpu.memory_space<vmem>>, %arg24: memref<1x32xf32, #tpu.memory_space<vmem>>, %arg25: memref<1x32xf32, #tpu.memory_space<vmem>>, %arg26: memref<1x32xf32, #tpu.memory_space<vmem>>, %arg27: memref<32x64xf32, #tpu.memory_space<vmem>>, %arg28: memref<1x64xf32, #tpu.memory_space<vmem>>, %arg29: memref<64x32xf32, #tpu.memory_space<vmem>>, %arg30: memref<1x32xf32, #tpu.memory_space<vmem>>, %arg31: memref<16x32xf32, #tpu.memory_space<vmem>>) attributes {dimension_semantics = [], scalar_prefetch = 0 : i64, scratch_operands = 0 : i64, tpu.core_type = #tpu.core_type<tc>} {
    %c0 = arith.constant 0 : index
    %c0_0 = arith.constant 0 : index
    %0 = vector.load %arg0[%c0, %c0_0] : memref<16x32xf32, #tpu.memory_space<vmem>>, vector<16x32xf32>
    %cst = arith.constant 5.65685415 : f32
    %1 = vector.broadcast %cst : f32 to vector<16x32xf32>
    %2 = arith.mulf %1, %0 : vector<16x32xf32>
    %cst_1 = arith.constant 5.65685415 : f32
    %3 = vector.broadcast %cst_1 : f32 to vector<16x32xf32>
    %4 = arith.mulf %3, %2 : vector<16x32xf32>
    %c0_2 = arith.constant 0 : index
    %c0_3 = arith.constant 0 : index
    %5 = vector.load %arg1[%c0_2, %c0_3] : memref<16x32xf32, #tpu.memory_space<vmem>>, vector<16x32xf32>
    %6 = arith.addf %4, %5 : vector<16x32xf32>
    %c0_4 = arith.constant 0 : index
    %c0_5 = arith.constant 0 : index
    %7 = vector.load %arg2[%c0_4, %c0_5] : memref<16x32xf32, #tpu.memory_space<vmem>>, vector<16x32xf32>
    %c0_6 = arith.constant 0 : index
    %c0_7 = arith.constant 0 : index
    %8 = vector.load %arg3[%c0_6, %c0_7] : memref<16x16xf32, #tpu.memory_space<vmem>>, vector<16x16xf32>
    %c0_8 = arith.constant 0 : index
    %c0_9 = arith.constant 0 : index
    %9 = vector.load %arg4[%c0_8, %c0_9] : memref<16x16xf32, #tpu.memory_space<vmem>>, vector<16x16xf32>
    %c0_10 = arith.constant 0 : index
    %c0_11 = arith.constant 0 : index
    %10 = vector.load %arg5[%c0_10, %c0_11] : memref<32x32xf32, #tpu.memory_space<vmem>>, vector<32x32xf32>
    %c0_12 = arith.constant 0 : index
    %c0_13 = arith.constant 0 : index
    %11 = vector.load %arg6[%c0_12, %c0_13] : memref<1x32xf32, #tpu.memory_space<vmem>>, vector<1x32xf32>
    %c0_14 = arith.constant 0 : index
    %c0_15 = arith.constant 0 : index
    %12 = vector.load %arg7[%c0_14, %c0_15] : memref<32x32xf32, #tpu.memory_space<vmem>>, vector<32x32xf32>
    %c0_16 = arith.constant 0 : index
    %c0_17 = arith.constant 0 : index
    %13 = vector.load %arg8[%c0_16, %c0_17] : memref<1x32xf32, #tpu.memory_space<vmem>>, vector<1x32xf32>
    %c0_18 = arith.constant 0 : index
    %c0_19 = arith.constant 0 : index
    %14 = vector.load %arg9[%c0_18, %c0_19] : memref<32x32xf32, #tpu.memory_space<vmem>>, vector<32x32xf32>
    %c0_20 = arith.constant 0 : index
    %c0_21 = arith.constant 0 : index
    %15 = vector.load %arg10[%c0_20, %c0_21] : memref<1x32xf32, #tpu.memory_space<vmem>>, vector<1x32xf32>
    %c0_22 = arith.constant 0 : index
    %c0_23 = arith.constant 0 : index
    %16 = vector.load %arg11[%c0_22, %c0_23] : memref<32x32xf32, #tpu.memory_space<vmem>>, vector<32x32xf32>
    %c0_24 = arith.constant 0 : index
    %c0_25 = arith.constant 0 : index
    %17 = vector.load %arg12[%c0_24, %c0_25] : memref<1x32xf32, #tpu.memory_space<vmem>>, vector<1x32xf32>
    %c0_26 = arith.constant 0 : index
    %c0_27 = arith.constant 0 : index
    %18 = vector.load %arg13[%c0_26, %c0_27] : memref<32x32xf32, #tpu.memory_space<vmem>>, vector<32x32xf32>
    %c0_28 = arith.constant 0 : index
    %c0_29 = arith.constant 0 : index
    %19 = vector.load %arg14[%c0_28, %c0_29] : memref<1x32xf32, #tpu.memory_space<vmem>>, vector<1x32xf32>
    %c0_30 = arith.constant 0 : index
    %c0_31 = arith.constant 0 : index
    %20 = vector.load %arg15[%c0_30, %c0_31] : memref<32x32xf32, #tpu.memory_space<vmem>>, vector<32x32xf32>
    %c0_32 = arith.constant 0 : index
    %c0_33 = arith.constant 0 : index
    %21 = vector.load %arg16[%c0_32, %c0_33] : memref<1x32xf32, #tpu.memory_space<vmem>>, vector<1x32xf32>
    %c0_34 = arith.constant 0 : index
    %c0_35 = arith.constant 0 : index
    %22 = vector.load %arg17[%c0_34, %c0_35] : memref<32x32xf32, #tpu.memory_space<vmem>>, vector<32x32xf32>
    %c0_36 = arith.constant 0 : index
    %c0_37 = arith.constant 0 : index
    %23 = vector.load %arg18[%c0_36, %c0_37] : memref<1x32xf32, #tpu.memory_space<vmem>>, vector<1x32xf32>
    %c0_38 = arith.constant 0 : index
    %c0_39 = arith.constant 0 : index
    %24 = vector.load %arg19[%c0_38, %c0_39] : memref<32x32xf32, #tpu.memory_space<vmem>>, vector<32x32xf32>
    %c0_40 = arith.constant 0 : index
    %c0_41 = arith.constant 0 : index
    %25 = vector.load %arg20[%c0_40, %c0_41] : memref<1x32xf32, #tpu.memory_space<vmem>>, vector<1x32xf32>
    %c0_42 = arith.constant 0 : index
    %c0_43 = arith.constant 0 : index
    %26 = vector.load %arg21[%c0_42, %c0_43] : memref<1x32xf32, #tpu.memory_space<vmem>>, vector<1x32xf32>
    %c0_44 = arith.constant 0 : index
    %c0_45 = arith.constant 0 : index
    %27 = vector.load %arg22[%c0_44, %c0_45] : memref<1x32xf32, #tpu.memory_space<vmem>>, vector<1x32xf32>
    %c0_46 = arith.constant 0 : index
    %c0_47 = arith.constant 0 : index
    %28 = vector.load %arg23[%c0_46, %c0_47] : memref<1x32xf32, #tpu.memory_space<vmem>>, vector<1x32xf32>
    %c0_48 = arith.constant 0 : index
    %c0_49 = arith.constant 0 : index
    %29 = vector.load %arg24[%c0_48, %c0_49] : memref<1x32xf32, #tpu.memory_space<vmem>>, vector<1x32xf32>
    %c0_50 = arith.constant 0 : index
    %c0_51 = arith.constant 0 : index
    %30 = vector.load %arg25[%c0_50, %c0_51] : memref<1x32xf32, #tpu.memory_space<vmem>>, vector<1x32xf32>
    %c0_52 = arith.constant 0 : index
    %c0_53 = arith.constant 0 : index
    %31 = vector.load %arg26[%c0_52, %c0_53] : memref<1x32xf32, #tpu.memory_space<vmem>>, vector<1x32xf32>
    %c0_54 = arith.constant 0 : index
    %c0_55 = arith.constant 0 : index
    %32 = vector.load %arg27[%c0_54, %c0_55] : memref<32x64xf32, #tpu.memory_space<vmem>>, vector<32x64xf32>
    %c0_56 = arith.constant 0 : index
    %c0_57 = arith.constant 0 : index
    %33 = vector.load %arg28[%c0_56, %c0_57] : memref<1x64xf32, #tpu.memory_space<vmem>>, vector<1x64xf32>
    %c0_58 = arith.constant 0 : index
    %c0_59 = arith.constant 0 : index
    %34 = vector.load %arg29[%c0_58, %c0_59] : memref<64x32xf32, #tpu.memory_space<vmem>>, vector<64x32xf32>
    %c0_60 = arith.constant 0 : index
    %c0_61 = arith.constant 0 : index
    %35 = vector.load %arg30[%c0_60, %c0_61] : memref<1x32xf32, #tpu.memory_space<vmem>>, vector<1x32xf32>
    %36 = tpu.iota {dimensions = array<i32: 1>} : vector<1x32xi32>
    %c0_i32 = arith.constant 0 : i32
    %37 = vector.broadcast %c0_i32 : i32 to vector<1x32xi32>
    %38 = arith.cmpi sge, %36, %37 : vector<1x32xi32>
    %c8_i32 = arith.constant 8 : i32
    %39 = vector.broadcast %c8_i32 : i32 to vector<1x32xi32>
    %40 = arith.cmpi slt, %36, %39 : vector<1x32xi32>
    %41 = arith.andi %38, %40 : vector<1x32xi1>
    %c8_i32_62 = arith.constant 8 : i32
    %42 = vector.broadcast %c8_i32_62 : i32 to vector<1x32xi32>
    %43 = arith.cmpi sge, %36, %42 : vector<1x32xi32>
    %c16_i32 = arith.constant 16 : i32
    %44 = vector.broadcast %c16_i32 : i32 to vector<1x32xi32>
    %45 = arith.cmpi slt, %36, %44 : vector<1x32xi32>
    %46 = arith.andi %43, %45 : vector<1x32xi1>
    %c16_i32_63 = arith.constant 16 : i32
    %47 = vector.broadcast %c16_i32_63 : i32 to vector<1x32xi32>
    %48 = arith.cmpi sge, %36, %47 : vector<1x32xi32>
    %c24_i32 = arith.constant 24 : i32
    %49 = vector.broadcast %c24_i32 : i32 to vector<1x32xi32>
    %50 = arith.cmpi slt, %36, %49 : vector<1x32xi32>
    %51 = arith.andi %48, %50 : vector<1x32xi1>
    %c24_i32_64 = arith.constant 24 : i32
    %52 = vector.broadcast %c24_i32_64 : i32 to vector<1x32xi32>
    %53 = arith.cmpi sge, %36, %52 : vector<1x32xi32>
    %c32_i32 = arith.constant 32 : i32
    %54 = vector.broadcast %c32_i32 : i32 to vector<1x32xi32>
    %55 = arith.cmpi slt, %36, %54 : vector<1x32xi32>
    %56 = arith.andi %53, %55 : vector<1x32xi1>
    %cst_65 = arith.constant dense<0.000000e+00> : vector<16x32xf32>
    %57 = tpu.matmul %7, %20, %cst_65 {dimension_numbers = #tpu.dot_dimension_numbers<[1], [0], [0], [1], [0, 0, 1, 1], [], []>} : vector<16x32xf32>, vector<32x32xf32>, vector<16x32xf32> -> vector<16x32xf32>
    %58 = vector.broadcast %21 : vector<1x32xf32> to vector<16x32xf32>
    %59 = arith.addf %57, %58 : vector<16x32xf32>
    %cst_66 = arith.constant dense<0.000000e+00> : vector<16x32xf32>
    %60 = tpu.matmul %7, %22, %cst_66 {dimension_numbers = #tpu.dot_dimension_numbers<[1], [0], [0], [1], [0, 0, 1, 1], [], []>} : vector<16x32xf32>, vector<32x32xf32>, vector<16x32xf32> -> vector<16x32xf32>
    %61 = vector.broadcast %23 : vector<1x32xf32> to vector<16x32xf32>
    %62 = arith.addf %60, %61 : vector<16x32xf32>
    %cst_67 = arith.constant 0.000000e+00 : f32
    %63 = vector.shape_cast %41 : vector<1x32xi1> to vector<1x32xi1>
    %64 = vector.broadcast %63 : vector<1x32xi1> to vector<16x32xi1>
    %65 = vector.broadcast %cst_67 : f32 to vector<16x32xf32>
    %66 = arith.select %64, %62, %65 : vector<16x32xi1>, vector<16x32xf32>
    %cst_68 = arith.constant 0.000000e+00 : f32
    %67 = vector.shape_cast %46 : vector<1x32xi1> to vector<1x32xi1>
    %68 = vector.broadcast %67 : vector<1x32xi1> to vector<16x32xi1>
    %69 = vector.broadcast %cst_68 : f32 to vector<16x32xf32>
    %70 = arith.select %68, %62, %69 : vector<16x32xi1>, vector<16x32xf32>
    %cst_69 = arith.constant 0.000000e+00 : f32
    %71 = vector.shape_cast %51 : vector<1x32xi1> to vector<1x32xi1>
    %72 = vector.broadcast %71 : vector<1x32xi1> to vector<16x32xi1>
    %73 = vector.broadcast %cst_69 : f32 to vector<16x32xf32>
    %74 = arith.select %72, %62, %73 : vector<16x32xi1>, vector<16x32xf32>
    %cst_70 = arith.constant 0.000000e+00 : f32
    %75 = vector.shape_cast %56 : vector<1x32xi1> to vector<1x32xi1>
    %76 = vector.broadcast %75 : vector<1x32xi1> to vector<16x32xi1>
    %77 = vector.broadcast %cst_70 : f32 to vector<16x32xf32>
    %78 = arith.select %76, %62, %77 : vector<16x32xi1>, vector<16x32xf32>
    %cst_71 = arith.constant dense<0.000000e+00> : vector<16x32xf32>
    %79 = tpu.matmul %6, %10, %cst_71 {dimension_numbers = #tpu.dot_dimension_numbers<[1], [0], [0], [1], [0, 0, 1, 1], [], []>} : vector<16x32xf32>, vector<32x32xf32>, vector<16x32xf32> -> vector<16x32xf32>
    %80 = vector.broadcast %11 : vector<1x32xf32> to vector<16x32xf32>
    %81 = arith.addf %79, %80 : vector<16x32xf32>
    %cst_72 = arith.constant 0.353553385 : f32
    %82 = vector.broadcast %cst_72 : f32 to vector<16x32xf32>
    %83 = arith.mulf %81, %82 : vector<16x32xf32>
    %cst_73 = arith.constant dense<0.000000e+00> : vector<16x32xf32>
    %84 = tpu.matmul %6, %12, %cst_73 {dimension_numbers = #tpu.dot_dimension_numbers<[1], [0], [0], [1], [0, 0, 1, 1], [], []>} : vector<16x32xf32>, vector<32x32xf32>, vector<16x32xf32> -> vector<16x32xf32>
    %85 = vector.broadcast %13 : vector<1x32xf32> to vector<16x32xf32>
    %86 = arith.addf %84, %85 : vector<16x32xf32>
    %cst_74 = arith.constant dense<0.000000e+00> : vector<16x32xf32>
    %87 = tpu.matmul %6, %14, %cst_74 {dimension_numbers = #tpu.dot_dimension_numbers<[1], [0], [0], [1], [0, 0, 1, 1], [], []>} : vector<16x32xf32>, vector<32x32xf32>, vector<16x32xf32> -> vector<16x32xf32>
    %88 = vector.broadcast %15 : vector<1x32xf32> to vector<16x32xf32>
    %89 = arith.addf %87, %88 : vector<16x32xf32>
    %cst_75 = arith.constant 0.000000e+00 : f32
    %90 = vector.shape_cast %41 : vector<1x32xi1> to vector<1x32xi1>
    %91 = vector.broadcast %90 : vector<1x32xi1> to vector<16x32xi1>
    %92 = vector.broadcast %cst_75 : f32 to vector<16x32xf32>
    %93 = arith.select %91, %89, %92 : vector<16x32xi1>, vector<16x32xf32>
    %cst_76 = arith.constant 0.000000e+00 : f32
    %94 = vector.shape_cast %46 : vector<1x32xi1> to vector<1x32xi1>
    %95 = vector.broadcast %94 : vector<1x32xi1> to vector<16x32xi1>
    %96 = vector.broadcast %cst_76 : f32 to vector<16x32xf32>
    %97 = arith.select %95, %89, %96 : vector<16x32xi1>, vector<16x32xf32>
    %cst_77 = arith.constant 0.000000e+00 : f32
    %98 = vector.shape_cast %51 : vector<1x32xi1> to vector<1x32xi1>
    %99 = vector.broadcast %98 : vector<1x32xi1> to vector<16x32xi1>
    %100 = vector.broadcast %cst_77 : f32 to vector<16x32xf32>
    %101 = arith.select %99, %89, %100 : vector<16x32xi1>, vector<16x32xf32>
    %cst_78 = arith.constant 0.000000e+00 : f32
    %102 = vector.shape_cast %56 : vector<1x32xi1> to vector<1x32xi1>
    %103 = vector.broadcast %102 : vector<1x32xi1> to vector<16x32xi1>
    %104 = vector.broadcast %cst_78 : f32 to vector<16x32xf32>
    %105 = arith.select %103, %89, %104 : vector<16x32xi1>, vector<16x32xf32>
    %cst_79 = arith.constant 0.000000e+00 : f32
    %106 = vector.broadcast %cst_79 : f32 to vector<16x32xf32>
    %107 = vector.extract_strided_slice %83 {offsets = [0, 0], sizes = [16, 8], strides = [1, 1]} : vector<16x32xf32> to vector<16x8xf32>
    %108 = vector.extract_strided_slice %86 {offsets = [0, 0], sizes = [16, 8], strides = [1, 1]} : vector<16x32xf32> to vector<16x8xf32>
    %cst_80 = arith.constant dense<0.000000e+00> : vector<16x16xf32>
    %109 = tpu.matmul %107, %108, %cst_80 {dimension_numbers = #tpu.dot_dimension_numbers<[1], [1], [0], [0], [0, 0, 1, 0], [], []>} : vector<16x8xf32>, vector<16x8xf32>, vector<16x16xf32> -> vector<16x16xf32>
    %110 = arith.addf %109, %8 : vector<16x16xf32>
    %cst_81 = arith.constant dense<0xFF800000> : vector<16xf32>
    %111 = vector.multi_reduction <maximumf>, %110, %cst_81 [1] : vector<16x16xf32> to vector<16xf32>
    %112 = vector.shape_cast %111 : vector<16xf32> to vector<16x1xf32>
    %113 = vector.broadcast %112 : vector<16x1xf32> to vector<16x16xf32>
    %114 = arith.subf %110, %113 : vector<16x16xf32>
    %115 = math.exp %114 : vector<16x16xf32>
    %cst_82 = arith.constant dense<0.000000e+00> : vector<16xf32>
    %116 = vector.multi_reduction <add>, %115, %cst_82 [1] : vector<16x16xf32> to vector<16xf32>
    %117 = vector.shape_cast %116 : vector<16xf32> to vector<16x1xf32>
    %118 = tpu.reciprocal %117 {approx = true} : vector<16x1xf32> -> vector<16x1xf32>
    %119 = vector.broadcast %118 : vector<16x1xf32> to vector<16x16xf32>
    %120 = arith.mulf %115, %119 : vector<16x16xf32>
    %cst_83 = arith.constant dense<0.000000e+00> : vector<16x32xf32>
    %121 = tpu.matmul %120, %93, %cst_83 {dimension_numbers = #tpu.dot_dimension_numbers<[1], [0], [0], [1], [0, 0, 1, 1], [], []>} : vector<16x16xf32>, vector<16x32xf32>, vector<16x32xf32> -> vector<16x32xf32>
    %122 = arith.addf %106, %121 : vector<16x32xf32>
    %123 = vector.extract_strided_slice %83 {offsets = [0, 8], sizes = [16, 8], strides = [1, 1]} : vector<16x32xf32> to vector<16x8xf32>
    %124 = vector.extract_strided_slice %86 {offsets = [0, 8], sizes = [16, 8], strides = [1, 1]} : vector<16x32xf32> to vector<16x8xf32>
    %cst_84 = arith.constant dense<0.000000e+00> : vector<16x16xf32>
    %125 = tpu.matmul %123, %124, %cst_84 {dimension_numbers = #tpu.dot_dimension_numbers<[1], [1], [0], [0], [0, 0, 1, 0], [], []>} : vector<16x8xf32>, vector<16x8xf32>, vector<16x16xf32> -> vector<16x16xf32>
    %126 = arith.addf %125, %8 : vector<16x16xf32>
    %cst_85 = arith.constant dense<0xFF800000> : vector<16xf32>
    %127 = vector.multi_reduction <maximumf>, %126, %cst_85 [1] : vector<16x16xf32> to vector<16xf32>
    %128 = vector.shape_cast %127 : vector<16xf32> to vector<16x1xf32>
    %129 = vector.broadcast %128 : vector<16x1xf32> to vector<16x16xf32>
    %130 = arith.subf %126, %129 : vector<16x16xf32>
    %131 = math.exp %130 : vector<16x16xf32>
    %cst_86 = arith.constant dense<0.000000e+00> : vector<16xf32>
    %132 = vector.multi_reduction <add>, %131, %cst_86 [1] : vector<16x16xf32> to vector<16xf32>
    %133 = vector.shape_cast %132 : vector<16xf32> to vector<16x1xf32>
    %134 = tpu.reciprocal %133 {approx = true} : vector<16x1xf32> -> vector<16x1xf32>
    %135 = vector.broadcast %134 : vector<16x1xf32> to vector<16x16xf32>
    %136 = arith.mulf %131, %135 : vector<16x16xf32>
    %cst_87 = arith.constant dense<0.000000e+00> : vector<16x32xf32>
    %137 = tpu.matmul %136, %97, %cst_87 {dimension_numbers = #tpu.dot_dimension_numbers<[1], [0], [0], [1], [0, 0, 1, 1], [], []>} : vector<16x16xf32>, vector<16x32xf32>, vector<16x32xf32> -> vector<16x32xf32>
    %138 = arith.addf %122, %137 : vector<16x32xf32>
    %139 = vector.extract_strided_slice %83 {offsets = [0, 16], sizes = [16, 8], strides = [1, 1]} : vector<16x32xf32> to vector<16x8xf32>
    %140 = vector.extract_strided_slice %86 {offsets = [0, 16], sizes = [16, 8], strides = [1, 1]} : vector<16x32xf32> to vector<16x8xf32>
    %cst_88 = arith.constant dense<0.000000e+00> : vector<16x16xf32>
    %141 = tpu.matmul %139, %140, %cst_88 {dimension_numbers = #tpu.dot_dimension_numbers<[1], [1], [0], [0], [0, 0, 1, 0], [], []>} : vector<16x8xf32>, vector<16x8xf32>, vector<16x16xf32> -> vector<16x16xf32>
    %142 = arith.addf %141, %8 : vector<16x16xf32>
    %cst_89 = arith.constant dense<0xFF800000> : vector<16xf32>
    %143 = vector.multi_reduction <maximumf>, %142, %cst_89 [1] : vector<16x16xf32> to vector<16xf32>
    %144 = vector.shape_cast %143 : vector<16xf32> to vector<16x1xf32>
    %145 = vector.broadcast %144 : vector<16x1xf32> to vector<16x16xf32>
    %146 = arith.subf %142, %145 : vector<16x16xf32>
    %147 = math.exp %146 : vector<16x16xf32>
    %cst_90 = arith.constant dense<0.000000e+00> : vector<16xf32>
    %148 = vector.multi_reduction <add>, %147, %cst_90 [1] : vector<16x16xf32> to vector<16xf32>
    %149 = vector.shape_cast %148 : vector<16xf32> to vector<16x1xf32>
    %150 = tpu.reciprocal %149 {approx = true} : vector<16x1xf32> -> vector<16x1xf32>
    %151 = vector.broadcast %150 : vector<16x1xf32> to vector<16x16xf32>
    %152 = arith.mulf %147, %151 : vector<16x16xf32>
    %cst_91 = arith.constant dense<0.000000e+00> : vector<16x32xf32>
    %153 = tpu.matmul %152, %101, %cst_91 {dimension_numbers = #tpu.dot_dimension_numbers<[1], [0], [0], [1], [0, 0, 1, 1], [], []>} : vector<16x16xf32>, vector<16x32xf32>, vector<16x32xf32> -> vector<16x32xf32>
    %154 = arith.addf %138, %153 : vector<16x32xf32>
    %155 = vector.extract_strided_slice %83 {offsets = [0, 24], sizes = [16, 8], strides = [1, 1]} : vector<16x32xf32> to vector<16x8xf32>
    %156 = vector.extract_strided_slice %86 {offsets = [0, 24], sizes = [16, 8], strides = [1, 1]} : vector<16x32xf32> to vector<16x8xf32>
    %cst_92 = arith.constant dense<0.000000e+00> : vector<16x16xf32>
    %157 = tpu.matmul %155, %156, %cst_92 {dimension_numbers = #tpu.dot_dimension_numbers<[1], [1], [0], [0], [0, 0, 1, 0], [], []>} : vector<16x8xf32>, vector<16x8xf32>, vector<16x16xf32> -> vector<16x16xf32>
    %158 = arith.addf %157, %8 : vector<16x16xf32>
    %cst_93 = arith.constant dense<0xFF800000> : vector<16xf32>
    %159 = vector.multi_reduction <maximumf>, %158, %cst_93 [1] : vector<16x16xf32> to vector<16xf32>
    %160 = vector.shape_cast %159 : vector<16xf32> to vector<16x1xf32>
    %161 = vector.broadcast %160 : vector<16x1xf32> to vector<16x16xf32>
    %162 = arith.subf %158, %161 : vector<16x16xf32>
    %163 = math.exp %162 : vector<16x16xf32>
    %cst_94 = arith.constant dense<0.000000e+00> : vector<16xf32>
    %164 = vector.multi_reduction <add>, %163, %cst_94 [1] : vector<16x16xf32> to vector<16xf32>
    %165 = vector.shape_cast %164 : vector<16xf32> to vector<16x1xf32>
    %166 = tpu.reciprocal %165 {approx = true} : vector<16x1xf32> -> vector<16x1xf32>
    %167 = vector.broadcast %166 : vector<16x1xf32> to vector<16x16xf32>
    %168 = arith.mulf %163, %167 : vector<16x16xf32>
    %cst_95 = arith.constant dense<0.000000e+00> : vector<16x32xf32>
    %169 = tpu.matmul %168, %105, %cst_95 {dimension_numbers = #tpu.dot_dimension_numbers<[1], [0], [0], [1], [0, 0, 1, 1], [], []>} : vector<16x16xf32>, vector<16x32xf32>, vector<16x32xf32> -> vector<16x32xf32>
    %170 = arith.addf %154, %169 : vector<16x32xf32>
    %cst_96 = arith.constant dense<0.000000e+00> : vector<16x32xf32>
    %171 = tpu.matmul %170, %16, %cst_96 {dimension_numbers = #tpu.dot_dimension_numbers<[1], [0], [0], [1], [0, 0, 1, 1], [], []>} : vector<16x32xf32>, vector<32x32xf32>, vector<16x32xf32> -> vector<16x32xf32>
    %172 = vector.broadcast %17 : vector<1x32xf32> to vector<16x32xf32>
    %173 = arith.addf %171, %172 : vector<16x32xf32>
    %174 = arith.addf %6, %173 : vector<16x32xf32>
    %cst_97 = arith.constant dense<0.000000e+00> : vector<16xf32>
    %175 = vector.multi_reduction <add>, %174, %cst_97 [1] : vector<16x32xf32> to vector<16xf32>
    %176 = vector.shape_cast %175 : vector<16xf32> to vector<16x1xf32>
    %cst_98 = arith.constant 3.200000e+01 : f32
    %177 = vector.broadcast %cst_98 : f32 to vector<16x1xf32>
    %178 = arith.divf %176, %177 : vector<16x1xf32>
    %179 = vector.broadcast %178 : vector<16x1xf32> to vector<16x32xf32>
    %180 = arith.subf %174, %179 : vector<16x32xf32>
    %181 = arith.mulf %180, %180 : vector<16x32xf32>
    %cst_99 = arith.constant dense<0.000000e+00> : vector<16xf32>
    %182 = vector.multi_reduction <add>, %181, %cst_99 [1] : vector<16x32xf32> to vector<16xf32>
    %183 = vector.shape_cast %182 : vector<16xf32> to vector<16x1xf32>
    %cst_100 = arith.constant 3.200000e+01 : f32
    %184 = vector.broadcast %cst_100 : f32 to vector<16x1xf32>
    %185 = arith.divf %183, %184 : vector<16x1xf32>
    %186 = vector.broadcast %178 : vector<16x1xf32> to vector<16x32xf32>
    %187 = arith.subf %174, %186 : vector<16x32xf32>
    %cst_101 = arith.constant 9.99999974E-6 : f32
    %188 = vector.broadcast %cst_101 : f32 to vector<16x1xf32>
    %189 = arith.addf %185, %188 : vector<16x1xf32>
    %190 = math.rsqrt %189 : vector<16x1xf32>
    %191 = vector.broadcast %190 : vector<16x1xf32> to vector<16x32xf32>
    %192 = arith.mulf %187, %191 : vector<16x32xf32>
    %193 = vector.broadcast %26 : vector<1x32xf32> to vector<16x32xf32>
    %194 = arith.mulf %192, %193 : vector<16x32xf32>
    %195 = vector.broadcast %27 : vector<1x32xf32> to vector<16x32xf32>
    %196 = arith.addf %194, %195 : vector<16x32xf32>
    %cst_102 = arith.constant dense<0.000000e+00> : vector<16x32xf32>
    %197 = tpu.matmul %196, %18, %cst_102 {dimension_numbers = #tpu.dot_dimension_numbers<[1], [0], [0], [1], [0, 0, 1, 1], [], []>} : vector<16x32xf32>, vector<32x32xf32>, vector<16x32xf32> -> vector<16x32xf32>
    %198 = vector.broadcast %19 : vector<1x32xf32> to vector<16x32xf32>
    %199 = arith.addf %197, %198 : vector<16x32xf32>
    %cst_103 = arith.constant 0.353553385 : f32
    %200 = vector.broadcast %cst_103 : f32 to vector<16x32xf32>
    %201 = arith.mulf %199, %200 : vector<16x32xf32>
    %cst_104 = arith.constant 0.000000e+00 : f32
    %202 = vector.broadcast %cst_104 : f32 to vector<16x32xf32>
    %203 = vector.extract_strided_slice %201 {offsets = [0, 0], sizes = [16, 8], strides = [1, 1]} : vector<16x32xf32> to vector<16x8xf32>
    %204 = vector.extract_strided_slice %59 {offsets = [0, 0], sizes = [16, 8], strides = [1, 1]} : vector<16x32xf32> to vector<16x8xf32>
    %cst_105 = arith.constant dense<0.000000e+00> : vector<16x16xf32>
    %205 = tpu.matmul %203, %204, %cst_105 {dimension_numbers = #tpu.dot_dimension_numbers<[1], [1], [0], [0], [0, 0, 1, 0], [], []>} : vector<16x8xf32>, vector<16x8xf32>, vector<16x16xf32> -> vector<16x16xf32>
    %206 = arith.addf %205, %9 : vector<16x16xf32>
    %cst_106 = arith.constant dense<0xFF800000> : vector<16xf32>
    %207 = vector.multi_reduction <maximumf>, %206, %cst_106 [1] : vector<16x16xf32> to vector<16xf32>
    %208 = vector.shape_cast %207 : vector<16xf32> to vector<16x1xf32>
    %209 = vector.broadcast %208 : vector<16x1xf32> to vector<16x16xf32>
    %210 = arith.subf %206, %209 : vector<16x16xf32>
    %211 = math.exp %210 : vector<16x16xf32>
    %cst_107 = arith.constant dense<0.000000e+00> : vector<16xf32>
    %212 = vector.multi_reduction <add>, %211, %cst_107 [1] : vector<16x16xf32> to vector<16xf32>
    %213 = vector.shape_cast %212 : vector<16xf32> to vector<16x1xf32>
    %214 = tpu.reciprocal %213 {approx = true} : vector<16x1xf32> -> vector<16x1xf32>
    %215 = vector.broadcast %214 : vector<16x1xf32> to vector<16x16xf32>
    %216 = arith.mulf %211, %215 : vector<16x16xf32>
    %cst_108 = arith.constant dense<0.000000e+00> : vector<16x32xf32>
    %217 = tpu.matmul %216, %66, %cst_108 {dimension_numbers = #tpu.dot_dimension_numbers<[1], [0], [0], [1], [0, 0, 1, 1], [], []>} : vector<16x16xf32>, vector<16x32xf32>, vector<16x32xf32> -> vector<16x32xf32>
    %218 = arith.addf %202, %217 : vector<16x32xf32>
    %219 = vector.extract_strided_slice %201 {offsets = [0, 8], sizes = [16, 8], strides = [1, 1]} : vector<16x32xf32> to vector<16x8xf32>
    %220 = vector.extract_strided_slice %59 {offsets = [0, 8], sizes = [16, 8], strides = [1, 1]} : vector<16x32xf32> to vector<16x8xf32>
    %cst_109 = arith.constant dense<0.000000e+00> : vector<16x16xf32>
    %221 = tpu.matmul %219, %220, %cst_109 {dimension_numbers = #tpu.dot_dimension_numbers<[1], [1], [0], [0], [0, 0, 1, 0], [], []>} : vector<16x8xf32>, vector<16x8xf32>, vector<16x16xf32> -> vector<16x16xf32>
    %222 = arith.addf %221, %9 : vector<16x16xf32>
    %cst_110 = arith.constant dense<0xFF800000> : vector<16xf32>
    %223 = vector.multi_reduction <maximumf>, %222, %cst_110 [1] : vector<16x16xf32> to vector<16xf32>
    %224 = vector.shape_cast %223 : vector<16xf32> to vector<16x1xf32>
    %225 = vector.broadcast %224 : vector<16x1xf32> to vector<16x16xf32>
    %226 = arith.subf %222, %225 : vector<16x16xf32>
    %227 = math.exp %226 : vector<16x16xf32>
    %cst_111 = arith.constant dense<0.000000e+00> : vector<16xf32>
    %228 = vector.multi_reduction <add>, %227, %cst_111 [1] : vector<16x16xf32> to vector<16xf32>
    %229 = vector.shape_cast %228 : vector<16xf32> to vector<16x1xf32>
    %230 = tpu.reciprocal %229 {approx = true} : vector<16x1xf32> -> vector<16x1xf32>
    %231 = vector.broadcast %230 : vector<16x1xf32> to vector<16x16xf32>
    %232 = arith.mulf %227, %231 : vector<16x16xf32>
    %cst_112 = arith.constant dense<0.000000e+00> : vector<16x32xf32>
    %233 = tpu.matmul %232, %70, %cst_112 {dimension_numbers = #tpu.dot_dimension_numbers<[1], [0], [0], [1], [0, 0, 1, 1], [], []>} : vector<16x16xf32>, vector<16x32xf32>, vector<16x32xf32> -> vector<16x32xf32>
    %234 = arith.addf %218, %233 : vector<16x32xf32>
    %235 = vector.extract_strided_slice %201 {offsets = [0, 16], sizes = [16, 8], strides = [1, 1]} : vector<16x32xf32> to vector<16x8xf32>
    %236 = vector.extract_strided_slice %59 {offsets = [0, 16], sizes = [16, 8], strides = [1, 1]} : vector<16x32xf32> to vector<16x8xf32>
    %cst_113 = arith.constant dense<0.000000e+00> : vector<16x16xf32>
    %237 = tpu.matmul %235, %236, %cst_113 {dimension_numbers = #tpu.dot_dimension_numbers<[1], [1], [0], [0], [0, 0, 1, 0], [], []>} : vector<16x8xf32>, vector<16x8xf32>, vector<16x16xf32> -> vector<16x16xf32>
    %238 = arith.addf %237, %9 : vector<16x16xf32>
    %cst_114 = arith.constant dense<0xFF800000> : vector<16xf32>
    %239 = vector.multi_reduction <maximumf>, %238, %cst_114 [1] : vector<16x16xf32> to vector<16xf32>
    %240 = vector.shape_cast %239 : vector<16xf32> to vector<16x1xf32>
    %241 = vector.broadcast %240 : vector<16x1xf32> to vector<16x16xf32>
    %242 = arith.subf %238, %241 : vector<16x16xf32>
    %243 = math.exp %242 : vector<16x16xf32>
    %cst_115 = arith.constant dense<0.000000e+00> : vector<16xf32>
    %244 = vector.multi_reduction <add>, %243, %cst_115 [1] : vector<16x16xf32> to vector<16xf32>
    %245 = vector.shape_cast %244 : vector<16xf32> to vector<16x1xf32>
    %246 = tpu.reciprocal %245 {approx = true} : vector<16x1xf32> -> vector<16x1xf32>
    %247 = vector.broadcast %246 : vector<16x1xf32> to vector<16x16xf32>
    %248 = arith.mulf %243, %247 : vector<16x16xf32>
    %cst_116 = arith.constant dense<0.000000e+00> : vector<16x32xf32>
    %249 = tpu.matmul %248, %74, %cst_116 {dimension_numbers = #tpu.dot_dimension_numbers<[1], [0], [0], [1], [0, 0, 1, 1], [], []>} : vector<16x16xf32>, vector<16x32xf32>, vector<16x32xf32> -> vector<16x32xf32>
    %250 = arith.addf %234, %249 : vector<16x32xf32>
    %251 = vector.extract_strided_slice %201 {offsets = [0, 24], sizes = [16, 8], strides = [1, 1]} : vector<16x32xf32> to vector<16x8xf32>
    %252 = vector.extract_strided_slice %59 {offsets = [0, 24], sizes = [16, 8], strides = [1, 1]} : vector<16x32xf32> to vector<16x8xf32>
    %cst_117 = arith.constant dense<0.000000e+00> : vector<16x16xf32>
    %253 = tpu.matmul %251, %252, %cst_117 {dimension_numbers = #tpu.dot_dimension_numbers<[1], [1], [0], [0], [0, 0, 1, 0], [], []>} : vector<16x8xf32>, vector<16x8xf32>, vector<16x16xf32> -> vector<16x16xf32>
    %254 = arith.addf %253, %9 : vector<16x16xf32>
    %cst_118 = arith.constant dense<0xFF800000> : vector<16xf32>
    %255 = vector.multi_reduction <maximumf>, %254, %cst_118 [1] : vector<16x16xf32> to vector<16xf32>
    %256 = vector.shape_cast %255 : vector<16xf32> to vector<16x1xf32>
    %257 = vector.broadcast %256 : vector<16x1xf32> to vector<16x16xf32>
    %258 = arith.subf %254, %257 : vector<16x16xf32>
    %259 = math.exp %258 : vector<16x16xf32>
    %cst_119 = arith.constant dense<0.000000e+00> : vector<16xf32>
    %260 = vector.multi_reduction <add>, %259, %cst_119 [1] : vector<16x16xf32> to vector<16xf32>
    %261 = vector.shape_cast %260 : vector<16xf32> to vector<16x1xf32>
    %262 = tpu.reciprocal %261 {approx = true} : vector<16x1xf32> -> vector<16x1xf32>
    %263 = vector.broadcast %262 : vector<16x1xf32> to vector<16x16xf32>
    %264 = arith.mulf %259, %263 : vector<16x16xf32>
    %cst_120 = arith.constant dense<0.000000e+00> : vector<16x32xf32>
    %265 = tpu.matmul %264, %78, %cst_120 {dimension_numbers = #tpu.dot_dimension_numbers<[1], [0], [0], [1], [0, 0, 1, 1], [], []>} : vector<16x16xf32>, vector<16x32xf32>, vector<16x32xf32> -> vector<16x32xf32>
    %266 = arith.addf %250, %265 : vector<16x32xf32>
    %cst_121 = arith.constant dense<0.000000e+00> : vector<16x32xf32>
    %267 = tpu.matmul %266, %24, %cst_121 {dimension_numbers = #tpu.dot_dimension_numbers<[1], [0], [0], [1], [0, 0, 1, 1], [], []>} : vector<16x32xf32>, vector<32x32xf32>, vector<16x32xf32> -> vector<16x32xf32>
    %268 = vector.broadcast %25 : vector<1x32xf32> to vector<16x32xf32>
    %269 = arith.addf %267, %268 : vector<16x32xf32>
    %270 = arith.addf %196, %269 : vector<16x32xf32>
    %cst_122 = arith.constant dense<0.000000e+00> : vector<16xf32>
    %271 = vector.multi_reduction <add>, %270, %cst_122 [1] : vector<16x32xf32> to vector<16xf32>
    %272 = vector.shape_cast %271 : vector<16xf32> to vector<16x1xf32>
    %cst_123 = arith.constant 3.200000e+01 : f32
    %273 = vector.broadcast %cst_123 : f32 to vector<16x1xf32>
    %274 = arith.divf %272, %273 : vector<16x1xf32>
    %275 = vector.broadcast %274 : vector<16x1xf32> to vector<16x32xf32>
    %276 = arith.subf %270, %275 : vector<16x32xf32>
    %277 = arith.mulf %276, %276 : vector<16x32xf32>
    %cst_124 = arith.constant dense<0.000000e+00> : vector<16xf32>
    %278 = vector.multi_reduction <add>, %277, %cst_124 [1] : vector<16x32xf32> to vector<16xf32>
    %279 = vector.shape_cast %278 : vector<16xf32> to vector<16x1xf32>
    %cst_125 = arith.constant 3.200000e+01 : f32
    %280 = vector.broadcast %cst_125 : f32 to vector<16x1xf32>
    %281 = arith.divf %279, %280 : vector<16x1xf32>
    %282 = vector.broadcast %274 : vector<16x1xf32> to vector<16x32xf32>
    %283 = arith.subf %270, %282 : vector<16x32xf32>
    %cst_126 = arith.constant 9.99999974E-6 : f32
    %284 = vector.broadcast %cst_126 : f32 to vector<16x1xf32>
    %285 = arith.addf %281, %284 : vector<16x1xf32>
    %286 = math.rsqrt %285 : vector<16x1xf32>
    %287 = vector.broadcast %286 : vector<16x1xf32> to vector<16x32xf32>
    %288 = arith.mulf %283, %287 : vector<16x32xf32>
    %289 = vector.broadcast %28 : vector<1x32xf32> to vector<16x32xf32>
    %290 = arith.mulf %288, %289 : vector<16x32xf32>
    %291 = vector.broadcast %29 : vector<1x32xf32> to vector<16x32xf32>
    %292 = arith.addf %290, %291 : vector<16x32xf32>
    %cst_127 = arith.constant dense<0.000000e+00> : vector<16x64xf32>
    %293 = tpu.matmul %292, %32, %cst_127 {dimension_numbers = #tpu.dot_dimension_numbers<[1], [0], [0], [1], [0, 0, 1, 1], [], []>} : vector<16x32xf32>, vector<32x64xf32>, vector<16x64xf32> -> vector<16x64xf32>
    %294 = vector.broadcast %33 : vector<1x64xf32> to vector<16x64xf32>
    %295 = arith.addf %293, %294 : vector<16x64xf32>
    %cst_128 = arith.constant 0.000000e+00 : f32
    %296 = vector.broadcast %cst_128 : f32 to vector<16x64xf32>
    %297 = arith.maximumf %295, %296 : vector<16x64xf32>
    %cst_129 = arith.constant dense<0.000000e+00> : vector<16x32xf32>
    %298 = tpu.matmul %297, %34, %cst_129 {dimension_numbers = #tpu.dot_dimension_numbers<[1], [0], [0], [1], [0, 0, 1, 1], [], []>} : vector<16x64xf32>, vector<64x32xf32>, vector<16x32xf32> -> vector<16x32xf32>
    %299 = vector.broadcast %35 : vector<1x32xf32> to vector<16x32xf32>
    %300 = arith.addf %298, %299 : vector<16x32xf32>
    %301 = arith.addf %292, %300 : vector<16x32xf32>
    %cst_130 = arith.constant dense<0.000000e+00> : vector<16xf32>
    %302 = vector.multi_reduction <add>, %301, %cst_130 [1] : vector<16x32xf32> to vector<16xf32>
    %303 = vector.shape_cast %302 : vector<16xf32> to vector<16x1xf32>
    %cst_131 = arith.constant 3.200000e+01 : f32
    %304 = vector.broadcast %cst_131 : f32 to vector<16x1xf32>
    %305 = arith.divf %303, %304 : vector<16x1xf32>
    %306 = vector.broadcast %305 : vector<16x1xf32> to vector<16x32xf32>
    %307 = arith.subf %301, %306 : vector<16x32xf32>
    %308 = arith.mulf %307, %307 : vector<16x32xf32>
    %cst_132 = arith.constant dense<0.000000e+00> : vector<16xf32>
    %309 = vector.multi_reduction <add>, %308, %cst_132 [1] : vector<16x32xf32> to vector<16xf32>
    %310 = vector.shape_cast %309 : vector<16xf32> to vector<16x1xf32>
    %cst_133 = arith.constant 3.200000e+01 : f32
    %311 = vector.broadcast %cst_133 : f32 to vector<16x1xf32>
    %312 = arith.divf %310, %311 : vector<16x1xf32>
    %313 = vector.broadcast %305 : vector<16x1xf32> to vector<16x32xf32>
    %314 = arith.subf %301, %313 : vector<16x32xf32>
    %cst_134 = arith.constant 9.99999974E-6 : f32
    %315 = vector.broadcast %cst_134 : f32 to vector<16x1xf32>
    %316 = arith.addf %312, %315 : vector<16x1xf32>
    %317 = math.rsqrt %316 : vector<16x1xf32>
    %318 = vector.broadcast %317 : vector<16x1xf32> to vector<16x32xf32>
    %319 = arith.mulf %314, %318 : vector<16x32xf32>
    %320 = vector.broadcast %30 : vector<1x32xf32> to vector<16x32xf32>
    %321 = arith.mulf %319, %320 : vector<16x32xf32>
    %322 = vector.broadcast %31 : vector<1x32xf32> to vector<16x32xf32>
    %323 = arith.addf %321, %322 : vector<16x32xf32>
    %cst_135 = arith.constant dense<0.000000e+00> : vector<16x32xf32>
    %324 = tpu.matmul %323, %10, %cst_135 {dimension_numbers = #tpu.dot_dimension_numbers<[1], [0], [0], [1], [0, 0, 1, 1], [], []>} : vector<16x32xf32>, vector<32x32xf32>, vector<16x32xf32> -> vector<16x32xf32>
    %325 = vector.broadcast %11 : vector<1x32xf32> to vector<16x32xf32>
    %326 = arith.addf %324, %325 : vector<16x32xf32>
    %cst_136 = arith.constant 0.353553385 : f32
    %327 = vector.broadcast %cst_136 : f32 to vector<16x32xf32>
    %328 = arith.mulf %326, %327 : vector<16x32xf32>
    %cst_137 = arith.constant dense<0.000000e+00> : vector<16x32xf32>
    %329 = tpu.matmul %323, %12, %cst_137 {dimension_numbers = #tpu.dot_dimension_numbers<[1], [0], [0], [1], [0, 0, 1, 1], [], []>} : vector<16x32xf32>, vector<32x32xf32>, vector<16x32xf32> -> vector<16x32xf32>
    %330 = vector.broadcast %13 : vector<1x32xf32> to vector<16x32xf32>
    %331 = arith.addf %329, %330 : vector<16x32xf32>
    %cst_138 = arith.constant dense<0.000000e+00> : vector<16x32xf32>
    %332 = tpu.matmul %323, %14, %cst_138 {dimension_numbers = #tpu.dot_dimension_numbers<[1], [0], [0], [1], [0, 0, 1, 1], [], []>} : vector<16x32xf32>, vector<32x32xf32>, vector<16x32xf32> -> vector<16x32xf32>
    %333 = vector.broadcast %15 : vector<1x32xf32> to vector<16x32xf32>
    %334 = arith.addf %332, %333 : vector<16x32xf32>
    %cst_139 = arith.constant 0.000000e+00 : f32
    %335 = vector.shape_cast %41 : vector<1x32xi1> to vector<1x32xi1>
    %336 = vector.broadcast %335 : vector<1x32xi1> to vector<16x32xi1>
    %337 = vector.broadcast %cst_139 : f32 to vector<16x32xf32>
    %338 = arith.select %336, %334, %337 : vector<16x32xi1>, vector<16x32xf32>
    %cst_140 = arith.constant 0.000000e+00 : f32
    %339 = vector.shape_cast %46 : vector<1x32xi1> to vector<1x32xi1>
    %340 = vector.broadcast %339 : vector<1x32xi1> to vector<16x32xi1>
    %341 = vector.broadcast %cst_140 : f32 to vector<16x32xf32>
    %342 = arith.select %340, %334, %341 : vector<16x32xi1>, vector<16x32xf32>
    %cst_141 = arith.constant 0.000000e+00 : f32
    %343 = vector.shape_cast %51 : vector<1x32xi1> to vector<1x32xi1>
    %344 = vector.broadcast %343 : vector<1x32xi1> to vector<16x32xi1>
    %345 = vector.broadcast %cst_141 : f32 to vector<16x32xf32>
    %346 = arith.select %344, %334, %345 : vector<16x32xi1>, vector<16x32xf32>
    %cst_142 = arith.constant 0.000000e+00 : f32
    %347 = vector.shape_cast %56 : vector<1x32xi1> to vector<1x32xi1>
    %348 = vector.broadcast %347 : vector<1x32xi1> to vector<16x32xi1>
    %349 = vector.broadcast %cst_142 : f32 to vector<16x32xf32>
    %350 = arith.select %348, %334, %349 : vector<16x32xi1>, vector<16x32xf32>
    %cst_143 = arith.constant 0.000000e+00 : f32
    %351 = vector.broadcast %cst_143 : f32 to vector<16x32xf32>
    %352 = vector.extract_strided_slice %328 {offsets = [0, 0], sizes = [16, 8], strides = [1, 1]} : vector<16x32xf32> to vector<16x8xf32>
    %353 = vector.extract_strided_slice %331 {offsets = [0, 0], sizes = [16, 8], strides = [1, 1]} : vector<16x32xf32> to vector<16x8xf32>
    %cst_144 = arith.constant dense<0.000000e+00> : vector<16x16xf32>
    %354 = tpu.matmul %352, %353, %cst_144 {dimension_numbers = #tpu.dot_dimension_numbers<[1], [1], [0], [0], [0, 0, 1, 0], [], []>} : vector<16x8xf32>, vector<16x8xf32>, vector<16x16xf32> -> vector<16x16xf32>
    %355 = arith.addf %354, %8 : vector<16x16xf32>
    %cst_145 = arith.constant dense<0xFF800000> : vector<16xf32>
    %356 = vector.multi_reduction <maximumf>, %355, %cst_145 [1] : vector<16x16xf32> to vector<16xf32>
    %357 = vector.shape_cast %356 : vector<16xf32> to vector<16x1xf32>
    %358 = vector.broadcast %357 : vector<16x1xf32> to vector<16x16xf32>
    %359 = arith.subf %355, %358 : vector<16x16xf32>
    %360 = math.exp %359 : vector<16x16xf32>
    %cst_146 = arith.constant dense<0.000000e+00> : vector<16xf32>
    %361 = vector.multi_reduction <add>, %360, %cst_146 [1] : vector<16x16xf32> to vector<16xf32>
    %362 = vector.shape_cast %361 : vector<16xf32> to vector<16x1xf32>
    %363 = tpu.reciprocal %362 {approx = true} : vector<16x1xf32> -> vector<16x1xf32>
    %364 = vector.broadcast %363 : vector<16x1xf32> to vector<16x16xf32>
    %365 = arith.mulf %360, %364 : vector<16x16xf32>
    %cst_147 = arith.constant dense<0.000000e+00> : vector<16x32xf32>
    %366 = tpu.matmul %365, %338, %cst_147 {dimension_numbers = #tpu.dot_dimension_numbers<[1], [0], [0], [1], [0, 0, 1, 1], [], []>} : vector<16x16xf32>, vector<16x32xf32>, vector<16x32xf32> -> vector<16x32xf32>
    %367 = arith.addf %351, %366 : vector<16x32xf32>
    %368 = vector.extract_strided_slice %328 {offsets = [0, 8], sizes = [16, 8], strides = [1, 1]} : vector<16x32xf32> to vector<16x8xf32>
    %369 = vector.extract_strided_slice %331 {offsets = [0, 8], sizes = [16, 8], strides = [1, 1]} : vector<16x32xf32> to vector<16x8xf32>
    %cst_148 = arith.constant dense<0.000000e+00> : vector<16x16xf32>
    %370 = tpu.matmul %368, %369, %cst_148 {dimension_numbers = #tpu.dot_dimension_numbers<[1], [1], [0], [0], [0, 0, 1, 0], [], []>} : vector<16x8xf32>, vector<16x8xf32>, vector<16x16xf32> -> vector<16x16xf32>
    %371 = arith.addf %370, %8 : vector<16x16xf32>
    %cst_149 = arith.constant dense<0xFF800000> : vector<16xf32>
    %372 = vector.multi_reduction <maximumf>, %371, %cst_149 [1] : vector<16x16xf32> to vector<16xf32>
    %373 = vector.shape_cast %372 : vector<16xf32> to vector<16x1xf32>
    %374 = vector.broadcast %373 : vector<16x1xf32> to vector<16x16xf32>
    %375 = arith.subf %371, %374 : vector<16x16xf32>
    %376 = math.exp %375 : vector<16x16xf32>
    %cst_150 = arith.constant dense<0.000000e+00> : vector<16xf32>
    %377 = vector.multi_reduction <add>, %376, %cst_150 [1] : vector<16x16xf32> to vector<16xf32>
    %378 = vector.shape_cast %377 : vector<16xf32> to vector<16x1xf32>
    %379 = tpu.reciprocal %378 {approx = true} : vector<16x1xf32> -> vector<16x1xf32>
    %380 = vector.broadcast %379 : vector<16x1xf32> to vector<16x16xf32>
    %381 = arith.mulf %376, %380 : vector<16x16xf32>
    %cst_151 = arith.constant dense<0.000000e+00> : vector<16x32xf32>
    %382 = tpu.matmul %381, %342, %cst_151 {dimension_numbers = #tpu.dot_dimension_numbers<[1], [0], [0], [1], [0, 0, 1, 1], [], []>} : vector<16x16xf32>, vector<16x32xf32>, vector<16x32xf32> -> vector<16x32xf32>
    %383 = arith.addf %367, %382 : vector<16x32xf32>
    %384 = vector.extract_strided_slice %328 {offsets = [0, 16], sizes = [16, 8], strides = [1, 1]} : vector<16x32xf32> to vector<16x8xf32>
    %385 = vector.extract_strided_slice %331 {offsets = [0, 16], sizes = [16, 8], strides = [1, 1]} : vector<16x32xf32> to vector<16x8xf32>
    %cst_152 = arith.constant dense<0.000000e+00> : vector<16x16xf32>
    %386 = tpu.matmul %384, %385, %cst_152 {dimension_numbers = #tpu.dot_dimension_numbers<[1], [1], [0], [0], [0, 0, 1, 0], [], []>} : vector<16x8xf32>, vector<16x8xf32>, vector<16x16xf32> -> vector<16x16xf32>
    %387 = arith.addf %386, %8 : vector<16x16xf32>
    %cst_153 = arith.constant dense<0xFF800000> : vector<16xf32>
    %388 = vector.multi_reduction <maximumf>, %387, %cst_153 [1] : vector<16x16xf32> to vector<16xf32>
    %389 = vector.shape_cast %388 : vector<16xf32> to vector<16x1xf32>
    %390 = vector.broadcast %389 : vector<16x1xf32> to vector<16x16xf32>
    %391 = arith.subf %387, %390 : vector<16x16xf32>
    %392 = math.exp %391 : vector<16x16xf32>
    %cst_154 = arith.constant dense<0.000000e+00> : vector<16xf32>
    %393 = vector.multi_reduction <add>, %392, %cst_154 [1] : vector<16x16xf32> to vector<16xf32>
    %394 = vector.shape_cast %393 : vector<16xf32> to vector<16x1xf32>
    %395 = tpu.reciprocal %394 {approx = true} : vector<16x1xf32> -> vector<16x1xf32>
    %396 = vector.broadcast %395 : vector<16x1xf32> to vector<16x16xf32>
    %397 = arith.mulf %392, %396 : vector<16x16xf32>
    %cst_155 = arith.constant dense<0.000000e+00> : vector<16x32xf32>
    %398 = tpu.matmul %397, %346, %cst_155 {dimension_numbers = #tpu.dot_dimension_numbers<[1], [0], [0], [1], [0, 0, 1, 1], [], []>} : vector<16x16xf32>, vector<16x32xf32>, vector<16x32xf32> -> vector<16x32xf32>
    %399 = arith.addf %383, %398 : vector<16x32xf32>
    %400 = vector.extract_strided_slice %328 {offsets = [0, 24], sizes = [16, 8], strides = [1, 1]} : vector<16x32xf32> to vector<16x8xf32>
    %401 = vector.extract_strided_slice %331 {offsets = [0, 24], sizes = [16, 8], strides = [1, 1]} : vector<16x32xf32> to vector<16x8xf32>
    %cst_156 = arith.constant dense<0.000000e+00> : vector<16x16xf32>
    %402 = tpu.matmul %400, %401, %cst_156 {dimension_numbers = #tpu.dot_dimension_numbers<[1], [1], [0], [0], [0, 0, 1, 0], [], []>} : vector<16x8xf32>, vector<16x8xf32>, vector<16x16xf32> -> vector<16x16xf32>
    %403 = arith.addf %402, %8 : vector<16x16xf32>
    %cst_157 = arith.constant dense<0xFF800000> : vector<16xf32>
    %404 = vector.multi_reduction <maximumf>, %403, %cst_157 [1] : vector<16x16xf32> to vector<16xf32>
    %405 = vector.shape_cast %404 : vector<16xf32> to vector<16x1xf32>
    %406 = vector.broadcast %405 : vector<16x1xf32> to vector<16x16xf32>
    %407 = arith.subf %403, %406 : vector<16x16xf32>
    %408 = math.exp %407 : vector<16x16xf32>
    %cst_158 = arith.constant dense<0.000000e+00> : vector<16xf32>
    %409 = vector.multi_reduction <add>, %408, %cst_158 [1] : vector<16x16xf32> to vector<16xf32>
    %410 = vector.shape_cast %409 : vector<16xf32> to vector<16x1xf32>
    %411 = tpu.reciprocal %410 {approx = true} : vector<16x1xf32> -> vector<16x1xf32>
    %412 = vector.broadcast %411 : vector<16x1xf32> to vector<16x16xf32>
    %413 = arith.mulf %408, %412 : vector<16x16xf32>
    %cst_159 = arith.constant dense<0.000000e+00> : vector<16x32xf32>
    %414 = tpu.matmul %413, %350, %cst_159 {dimension_numbers = #tpu.dot_dimension_numbers<[1], [0], [0], [1], [0, 0, 1, 1], [], []>} : vector<16x16xf32>, vector<16x32xf32>, vector<16x32xf32> -> vector<16x32xf32>
    %415 = arith.addf %399, %414 : vector<16x32xf32>
    %cst_160 = arith.constant dense<0.000000e+00> : vector<16x32xf32>
    %416 = tpu.matmul %415, %16, %cst_160 {dimension_numbers = #tpu.dot_dimension_numbers<[1], [0], [0], [1], [0, 0, 1, 1], [], []>} : vector<16x32xf32>, vector<32x32xf32>, vector<16x32xf32> -> vector<16x32xf32>
    %417 = vector.broadcast %17 : vector<1x32xf32> to vector<16x32xf32>
    %418 = arith.addf %416, %417 : vector<16x32xf32>
    %419 = arith.addf %323, %418 : vector<16x32xf32>
    %cst_161 = arith.constant dense<0.000000e+00> : vector<16xf32>
    %420 = vector.multi_reduction <add>, %419, %cst_161 [1] : vector<16x32xf32> to vector<16xf32>
    %421 = vector.shape_cast %420 : vector<16xf32> to vector<16x1xf32>
    %cst_162 = arith.constant 3.200000e+01 : f32
    %422 = vector.broadcast %cst_162 : f32 to vector<16x1xf32>
    %423 = arith.divf %421, %422 : vector<16x1xf32>
    %424 = vector.broadcast %423 : vector<16x1xf32> to vector<16x32xf32>
    %425 = arith.subf %419, %424 : vector<16x32xf32>
    %426 = arith.mulf %425, %425 : vector<16x32xf32>
    %cst_163 = arith.constant dense<0.000000e+00> : vector<16xf32>
    %427 = vector.multi_reduction <add>, %426, %cst_163 [1] : vector<16x32xf32> to vector<16xf32>
    %428 = vector.shape_cast %427 : vector<16xf32> to vector<16x1xf32>
    %cst_164 = arith.constant 3.200000e+01 : f32
    %429 = vector.broadcast %cst_164 : f32 to vector<16x1xf32>
    %430 = arith.divf %428, %429 : vector<16x1xf32>
    %431 = vector.broadcast %423 : vector<16x1xf32> to vector<16x32xf32>
    %432 = arith.subf %419, %431 : vector<16x32xf32>
    %cst_165 = arith.constant 9.99999974E-6 : f32
    %433 = vector.broadcast %cst_165 : f32 to vector<16x1xf32>
    %434 = arith.addf %430, %433 : vector<16x1xf32>
    %435 = math.rsqrt %434 : vector<16x1xf32>
    %436 = vector.broadcast %435 : vector<16x1xf32> to vector<16x32xf32>
    %437 = arith.mulf %432, %436 : vector<16x32xf32>
    %438 = vector.broadcast %26 : vector<1x32xf32> to vector<16x32xf32>
    %439 = arith.mulf %437, %438 : vector<16x32xf32>
    %440 = vector.broadcast %27 : vector<1x32xf32> to vector<16x32xf32>
    %441 = arith.addf %439, %440 : vector<16x32xf32>
    %cst_166 = arith.constant dense<0.000000e+00> : vector<16x32xf32>
    %442 = tpu.matmul %441, %18, %cst_166 {dimension_numbers = #tpu.dot_dimension_numbers<[1], [0], [0], [1], [0, 0, 1, 1], [], []>} : vector<16x32xf32>, vector<32x32xf32>, vector<16x32xf32> -> vector<16x32xf32>
    %443 = vector.broadcast %19 : vector<1x32xf32> to vector<16x32xf32>
    %444 = arith.addf %442, %443 : vector<16x32xf32>
    %cst_167 = arith.constant 0.353553385 : f32
    %445 = vector.broadcast %cst_167 : f32 to vector<16x32xf32>
    %446 = arith.mulf %444, %445 : vector<16x32xf32>
    %cst_168 = arith.constant 0.000000e+00 : f32
    %447 = vector.broadcast %cst_168 : f32 to vector<16x32xf32>
    %448 = vector.extract_strided_slice %446 {offsets = [0, 0], sizes = [16, 8], strides = [1, 1]} : vector<16x32xf32> to vector<16x8xf32>
    %449 = vector.extract_strided_slice %59 {offsets = [0, 0], sizes = [16, 8], strides = [1, 1]} : vector<16x32xf32> to vector<16x8xf32>
    %cst_169 = arith.constant dense<0.000000e+00> : vector<16x16xf32>
    %450 = tpu.matmul %448, %449, %cst_169 {dimension_numbers = #tpu.dot_dimension_numbers<[1], [1], [0], [0], [0, 0, 1, 0], [], []>} : vector<16x8xf32>, vector<16x8xf32>, vector<16x16xf32> -> vector<16x16xf32>
    %451 = arith.addf %450, %9 : vector<16x16xf32>
    %cst_170 = arith.constant dense<0xFF800000> : vector<16xf32>
    %452 = vector.multi_reduction <maximumf>, %451, %cst_170 [1] : vector<16x16xf32> to vector<16xf32>
    %453 = vector.shape_cast %452 : vector<16xf32> to vector<16x1xf32>
    %454 = vector.broadcast %453 : vector<16x1xf32> to vector<16x16xf32>
    %455 = arith.subf %451, %454 : vector<16x16xf32>
    %456 = math.exp %455 : vector<16x16xf32>
    %cst_171 = arith.constant dense<0.000000e+00> : vector<16xf32>
    %457 = vector.multi_reduction <add>, %456, %cst_171 [1] : vector<16x16xf32> to vector<16xf32>
    %458 = vector.shape_cast %457 : vector<16xf32> to vector<16x1xf32>
    %459 = tpu.reciprocal %458 {approx = true} : vector<16x1xf32> -> vector<16x1xf32>
    %460 = vector.broadcast %459 : vector<16x1xf32> to vector<16x16xf32>
    %461 = arith.mulf %456, %460 : vector<16x16xf32>
    %cst_172 = arith.constant dense<0.000000e+00> : vector<16x32xf32>
    %462 = tpu.matmul %461, %66, %cst_172 {dimension_numbers = #tpu.dot_dimension_numbers<[1], [0], [0], [1], [0, 0, 1, 1], [], []>} : vector<16x16xf32>, vector<16x32xf32>, vector<16x32xf32> -> vector<16x32xf32>
    %463 = arith.addf %447, %462 : vector<16x32xf32>
    %464 = vector.extract_strided_slice %446 {offsets = [0, 8], sizes = [16, 8], strides = [1, 1]} : vector<16x32xf32> to vector<16x8xf32>
    %465 = vector.extract_strided_slice %59 {offsets = [0, 8], sizes = [16, 8], strides = [1, 1]} : vector<16x32xf32> to vector<16x8xf32>
    %cst_173 = arith.constant dense<0.000000e+00> : vector<16x16xf32>
    %466 = tpu.matmul %464, %465, %cst_173 {dimension_numbers = #tpu.dot_dimension_numbers<[1], [1], [0], [0], [0, 0, 1, 0], [], []>} : vector<16x8xf32>, vector<16x8xf32>, vector<16x16xf32> -> vector<16x16xf32>
    %467 = arith.addf %466, %9 : vector<16x16xf32>
    %cst_174 = arith.constant dense<0xFF800000> : vector<16xf32>
    %468 = vector.multi_reduction <maximumf>, %467, %cst_174 [1] : vector<16x16xf32> to vector<16xf32>
    %469 = vector.shape_cast %468 : vector<16xf32> to vector<16x1xf32>
    %470 = vector.broadcast %469 : vector<16x1xf32> to vector<16x16xf32>
    %471 = arith.subf %467, %470 : vector<16x16xf32>
    %472 = math.exp %471 : vector<16x16xf32>
    %cst_175 = arith.constant dense<0.000000e+00> : vector<16xf32>
    %473 = vector.multi_reduction <add>, %472, %cst_175 [1] : vector<16x16xf32> to vector<16xf32>
    %474 = vector.shape_cast %473 : vector<16xf32> to vector<16x1xf32>
    %475 = tpu.reciprocal %474 {approx = true} : vector<16x1xf32> -> vector<16x1xf32>
    %476 = vector.broadcast %475 : vector<16x1xf32> to vector<16x16xf32>
    %477 = arith.mulf %472, %476 : vector<16x16xf32>
    %cst_176 = arith.constant dense<0.000000e+00> : vector<16x32xf32>
    %478 = tpu.matmul %477, %70, %cst_176 {dimension_numbers = #tpu.dot_dimension_numbers<[1], [0], [0], [1], [0, 0, 1, 1], [], []>} : vector<16x16xf32>, vector<16x32xf32>, vector<16x32xf32> -> vector<16x32xf32>
    %479 = arith.addf %463, %478 : vector<16x32xf32>
    %480 = vector.extract_strided_slice %446 {offsets = [0, 16], sizes = [16, 8], strides = [1, 1]} : vector<16x32xf32> to vector<16x8xf32>
    %481 = vector.extract_strided_slice %59 {offsets = [0, 16], sizes = [16, 8], strides = [1, 1]} : vector<16x32xf32> to vector<16x8xf32>
    %cst_177 = arith.constant dense<0.000000e+00> : vector<16x16xf32>
    %482 = tpu.matmul %480, %481, %cst_177 {dimension_numbers = #tpu.dot_dimension_numbers<[1], [1], [0], [0], [0, 0, 1, 0], [], []>} : vector<16x8xf32>, vector<16x8xf32>, vector<16x16xf32> -> vector<16x16xf32>
    %483 = arith.addf %482, %9 : vector<16x16xf32>
    %cst_178 = arith.constant dense<0xFF800000> : vector<16xf32>
    %484 = vector.multi_reduction <maximumf>, %483, %cst_178 [1] : vector<16x16xf32> to vector<16xf32>
    %485 = vector.shape_cast %484 : vector<16xf32> to vector<16x1xf32>
    %486 = vector.broadcast %485 : vector<16x1xf32> to vector<16x16xf32>
    %487 = arith.subf %483, %486 : vector<16x16xf32>
    %488 = math.exp %487 : vector<16x16xf32>
    %cst_179 = arith.constant dense<0.000000e+00> : vector<16xf32>
    %489 = vector.multi_reduction <add>, %488, %cst_179 [1] : vector<16x16xf32> to vector<16xf32>
    %490 = vector.shape_cast %489 : vector<16xf32> to vector<16x1xf32>
    %491 = tpu.reciprocal %490 {approx = true} : vector<16x1xf32> -> vector<16x1xf32>
    %492 = vector.broadcast %491 : vector<16x1xf32> to vector<16x16xf32>
    %493 = arith.mulf %488, %492 : vector<16x16xf32>
    %cst_180 = arith.constant dense<0.000000e+00> : vector<16x32xf32>
    %494 = tpu.matmul %493, %74, %cst_180 {dimension_numbers = #tpu.dot_dimension_numbers<[1], [0], [0], [1], [0, 0, 1, 1], [], []>} : vector<16x16xf32>, vector<16x32xf32>, vector<16x32xf32> -> vector<16x32xf32>
    %495 = arith.addf %479, %494 : vector<16x32xf32>
    %496 = vector.extract_strided_slice %446 {offsets = [0, 24], sizes = [16, 8], strides = [1, 1]} : vector<16x32xf32> to vector<16x8xf32>
    %497 = vector.extract_strided_slice %59 {offsets = [0, 24], sizes = [16, 8], strides = [1, 1]} : vector<16x32xf32> to vector<16x8xf32>
    %cst_181 = arith.constant dense<0.000000e+00> : vector<16x16xf32>
    %498 = tpu.matmul %496, %497, %cst_181 {dimension_numbers = #tpu.dot_dimension_numbers<[1], [1], [0], [0], [0, 0, 1, 0], [], []>} : vector<16x8xf32>, vector<16x8xf32>, vector<16x16xf32> -> vector<16x16xf32>
    %499 = arith.addf %498, %9 : vector<16x16xf32>
    %cst_182 = arith.constant dense<0xFF800000> : vector<16xf32>
    %500 = vector.multi_reduction <maximumf>, %499, %cst_182 [1] : vector<16x16xf32> to vector<16xf32>
    %501 = vector.shape_cast %500 : vector<16xf32> to vector<16x1xf32>
    %502 = vector.broadcast %501 : vector<16x1xf32> to vector<16x16xf32>
    %503 = arith.subf %499, %502 : vector<16x16xf32>
    %504 = math.exp %503 : vector<16x16xf32>
    %cst_183 = arith.constant dense<0.000000e+00> : vector<16xf32>
    %505 = vector.multi_reduction <add>, %504, %cst_183 [1] : vector<16x16xf32> to vector<16xf32>
    %506 = vector.shape_cast %505 : vector<16xf32> to vector<16x1xf32>
    %507 = tpu.reciprocal %506 {approx = true} : vector<16x1xf32> -> vector<16x1xf32>
    %508 = vector.broadcast %507 : vector<16x1xf32> to vector<16x16xf32>
    %509 = arith.mulf %504, %508 : vector<16x16xf32>
    %cst_184 = arith.constant dense<0.000000e+00> : vector<16x32xf32>
    %510 = tpu.matmul %509, %78, %cst_184 {dimension_numbers = #tpu.dot_dimension_numbers<[1], [0], [0], [1], [0, 0, 1, 1], [], []>} : vector<16x16xf32>, vector<16x32xf32>, vector<16x32xf32> -> vector<16x32xf32>
    %511 = arith.addf %495, %510 : vector<16x32xf32>
    %cst_185 = arith.constant dense<0.000000e+00> : vector<16x32xf32>
    %512 = tpu.matmul %511, %24, %cst_185 {dimension_numbers = #tpu.dot_dimension_numbers<[1], [0], [0], [1], [0, 0, 1, 1], [], []>} : vector<16x32xf32>, vector<32x32xf32>, vector<16x32xf32> -> vector<16x32xf32>
    %513 = vector.broadcast %25 : vector<1x32xf32> to vector<16x32xf32>
    %514 = arith.addf %512, %513 : vector<16x32xf32>
    %515 = arith.addf %441, %514 : vector<16x32xf32>
    %cst_186 = arith.constant dense<0.000000e+00> : vector<16xf32>
    %516 = vector.multi_reduction <add>, %515, %cst_186 [1] : vector<16x32xf32> to vector<16xf32>
    %517 = vector.shape_cast %516 : vector<16xf32> to vector<16x1xf32>
    %cst_187 = arith.constant 3.200000e+01 : f32
    %518 = vector.broadcast %cst_187 : f32 to vector<16x1xf32>
    %519 = arith.divf %517, %518 : vector<16x1xf32>
    %520 = vector.broadcast %519 : vector<16x1xf32> to vector<16x32xf32>
    %521 = arith.subf %515, %520 : vector<16x32xf32>
    %522 = arith.mulf %521, %521 : vector<16x32xf32>
    %cst_188 = arith.constant dense<0.000000e+00> : vector<16xf32>
    %523 = vector.multi_reduction <add>, %522, %cst_188 [1] : vector<16x32xf32> to vector<16xf32>
    %524 = vector.shape_cast %523 : vector<16xf32> to vector<16x1xf32>
    %cst_189 = arith.constant 3.200000e+01 : f32
    %525 = vector.broadcast %cst_189 : f32 to vector<16x1xf32>
    %526 = arith.divf %524, %525 : vector<16x1xf32>
    %527 = vector.broadcast %519 : vector<16x1xf32> to vector<16x32xf32>
    %528 = arith.subf %515, %527 : vector<16x32xf32>
    %cst_190 = arith.constant 9.99999974E-6 : f32
    %529 = vector.broadcast %cst_190 : f32 to vector<16x1xf32>
    %530 = arith.addf %526, %529 : vector<16x1xf32>
    %531 = math.rsqrt %530 : vector<16x1xf32>
    %532 = vector.broadcast %531 : vector<16x1xf32> to vector<16x32xf32>
    %533 = arith.mulf %528, %532 : vector<16x32xf32>
    %534 = vector.broadcast %28 : vector<1x32xf32> to vector<16x32xf32>
    %535 = arith.mulf %533, %534 : vector<16x32xf32>
    %536 = vector.broadcast %29 : vector<1x32xf32> to vector<16x32xf32>
    %537 = arith.addf %535, %536 : vector<16x32xf32>
    %cst_191 = arith.constant dense<0.000000e+00> : vector<16x64xf32>
    %538 = tpu.matmul %537, %32, %cst_191 {dimension_numbers = #tpu.dot_dimension_numbers<[1], [0], [0], [1], [0, 0, 1, 1], [], []>} : vector<16x32xf32>, vector<32x64xf32>, vector<16x64xf32> -> vector<16x64xf32>
    %539 = vector.broadcast %33 : vector<1x64xf32> to vector<16x64xf32>
    %540 = arith.addf %538, %539 : vector<16x64xf32>
    %cst_192 = arith.constant 0.000000e+00 : f32
    %541 = vector.broadcast %cst_192 : f32 to vector<16x64xf32>
    %542 = arith.maximumf %540, %541 : vector<16x64xf32>
    %cst_193 = arith.constant dense<0.000000e+00> : vector<16x32xf32>
    %543 = tpu.matmul %542, %34, %cst_193 {dimension_numbers = #tpu.dot_dimension_numbers<[1], [0], [0], [1], [0, 0, 1, 1], [], []>} : vector<16x64xf32>, vector<64x32xf32>, vector<16x32xf32> -> vector<16x32xf32>
    %544 = vector.broadcast %35 : vector<1x32xf32> to vector<16x32xf32>
    %545 = arith.addf %543, %544 : vector<16x32xf32>
    %546 = arith.addf %537, %545 : vector<16x32xf32>
    %cst_194 = arith.constant dense<0.000000e+00> : vector<16xf32>
    %547 = vector.multi_reduction <add>, %546, %cst_194 [1] : vector<16x32xf32> to vector<16xf32>
    %548 = vector.shape_cast %547 : vector<16xf32> to vector<16x1xf32>
    %cst_195 = arith.constant 3.200000e+01 : f32
    %549 = vector.broadcast %cst_195 : f32 to vector<16x1xf32>
    %550 = arith.divf %548, %549 : vector<16x1xf32>
    %551 = vector.broadcast %550 : vector<16x1xf32> to vector<16x32xf32>
    %552 = arith.subf %546, %551 : vector<16x32xf32>
    %553 = arith.mulf %552, %552 : vector<16x32xf32>
    %cst_196 = arith.constant dense<0.000000e+00> : vector<16xf32>
    %554 = vector.multi_reduction <add>, %553, %cst_196 [1] : vector<16x32xf32> to vector<16xf32>
    %555 = vector.shape_cast %554 : vector<16xf32> to vector<16x1xf32>
    %cst_197 = arith.constant 3.200000e+01 : f32
    %556 = vector.broadcast %cst_197 : f32 to vector<16x1xf32>
    %557 = arith.divf %555, %556 : vector<16x1xf32>
    %558 = vector.broadcast %550 : vector<16x1xf32> to vector<16x32xf32>
    %559 = arith.subf %546, %558 : vector<16x32xf32>
    %cst_198 = arith.constant 9.99999974E-6 : f32
    %560 = vector.broadcast %cst_198 : f32 to vector<16x1xf32>
    %561 = arith.addf %557, %560 : vector<16x1xf32>
    %562 = math.rsqrt %561 : vector<16x1xf32>
    %563 = vector.broadcast %562 : vector<16x1xf32> to vector<16x32xf32>
    %564 = arith.mulf %559, %563 : vector<16x32xf32>
    %565 = vector.broadcast %30 : vector<1x32xf32> to vector<16x32xf32>
    %566 = arith.mulf %564, %565 : vector<16x32xf32>
    %567 = vector.broadcast %31 : vector<1x32xf32> to vector<16x32xf32>
    %568 = arith.addf %566, %567 : vector<16x32xf32>
    %c0_199 = arith.constant 0 : index
    %c0_200 = arith.constant 0 : index
    %569 = vector.load %arg31[%c0_199, %c0_200] : memref<16x32xf32, #tpu.memory_space<vmem>>, vector<16x32xf32>
    tpu.vector_store %arg31[%c0_199, %c0_200], %568 {strides = array<i32>} : memref<16x32xf32, #tpu.memory_space<vmem>>, vector<16x32xf32>,
    return
  }
}

</mosaic_0001>

<bundles_post_ra>
// kernel: tpu_custom_call.1
= control target key start
LH: loop header
LB: loop body
LE: loop exit
PB: predicated region body
PF: predicated region fallthrough
CT: control target
= control target key end

     0   :  { %s6836_s6 = smov 1   ;;  %s6837_s10 = smov 2   ;;  %s7949_s0 = inlined_call_operand.smem [shape: u32[32], index: -1, kind: input, shape index: {}] }
   0x1   :  { %s6898_s5 = sld [smem:[%s7949_s0]]   ;;  %s6838_s14 = smov 3  }
   0x2   :  { %s6903_s9 = sld [smem:[%s7949_s0 + %s6836_s6]]   ;;  %s6839_s18 = smov 4  }
   0x3   :  { %s6908_s13 = sld [smem:[%s7949_s0 + %s6837_s10]]   ;;  %s6840_s22 = smov 5  }
   0x4   :  { %s6913_s17 = sld [smem:[%s7949_s0 + %s6838_s14]]   ;;  %s6841_s26 = smov 6  }
   0x5   :  { %s6918_s21 = sld [smem:[%s7949_s0 + %s6839_s18]]   ;;  %s6842_s30 = smov 7  }
   0x6   :  { %s6923_s25 = sld [smem:[%s7949_s0 + %s6840_s22]]   ;;  %s6843_s4 = smov 8  }
   0x7   :  { %s6928_s29 = sld [smem:[%s7949_s0 + %s6841_s26]]   ;;  %s6844_s10 = smov 9  }
   0x8   :  { %s6933_s3 = sld [smem:[%s7949_s0 + %s6842_s30]]   ;;  %s6845_s15 = smov 10  }
   0x9   :  { %s6938_s8 = sld [smem:[%s7949_s0 + %s6843_s4]]   ;;  %s6846_s20 = smov 11  }
   0xa   :  { %s6943_s14 = sld [smem:[%s7949_s0 + %s6844_s10]]   ;;  %s6847_s26 = smov 12  }
   0xb   :  { %s6948_s19 = sld [smem:[%s7949_s0 + %s6845_s15]]   ;;  %s6848_s1 = smov 13  }
   0xc   :  { %7961 = sst [smem:[#allocation40_spill]] %s6923_s25  ;;  %s6849_s7 = smov 14  }
   0xd   :  { %s6953_s24 = sld [smem:[%s7949_s0 + %s6846_s20]]   ;;  %s6850_s15 = smov 15  }
   0xe   :  { %7962 = sst [smem:[#allocation41_spill]] %s6933_s3  ;;  %s6851_s22 = smov 16  }
   0xf   :  { %s6958_s30 = sld [smem:[%s7949_s0 + %s6847_s26]]   ;;  %s6852_s28 = smov 17  }
  0x10   :  { %7963 = sst [smem:[#allocation42_spill]] %s6943_s14 }
  0x11   :  { %s6963_s6 = sld [smem:[%s7949_s0 + %s6848_s1]]  }
  0x12   :  { %s6968_s12 = sld [smem:[%s7949_s0 + %s6849_s7]]   ;;  %s6853_s7 = smov 18  }
  0x13   :  { %s6973_s20 = sld [smem:[%s7949_s0 + %s6850_s15]]   ;;  %s6854_s15 = smov 19  }
  0x14   :  { %s6978_s27 = sld [smem:[%s7949_s0 + %s6851_s22]]   ;;  %s6855_s22 = smov 20  }
  0x15   :  { %s6983_s4 = sld [smem:[%s7949_s0 + %s6852_s28]]   ;;  %s6856_s28 = smov 21  }
  0x16   :  { %s6988_s14 = sld [smem:[%s7949_s0 + %s6853_s7]]   ;;  %s6857_s7 = smov 22  }
  0x17   :  { %s6993_s3 = sld [smem:[%s7949_s0 + %s6854_s15]]   ;;  %s6858_s15 = smov 23  }
  0x18   :  { %s6998_s25 = sld [smem:[%s7949_s0 + %s6855_s22]]   ;;  %s6859_s22 = smov 24  }
  0x19   :  { %7964 = sst [smem:[#allocation43_spill]] %s6973_s20 }
  0x1a   :  { %s7008_s20 = sld [smem:[%s7949_s0 + %s6857_s7]]   ;;  %s6861_s7 = smov 26  }
  0x1b   :  { %7965 = sst [smem:[#allocation44_spill]] %s6983_s4 }
  0x1c   :  { %s7003_s4 = sld [smem:[%s7949_s0 + %s6856_s28]]   ;;  %s6860_s28 = smov 25  }
  0x1d   :  { %7966 = sst [smem:[#allocation45_spill]] %s6993_s3 }
  0x1e   :  { %7967 = sst [smem:[#allocation46_spill]] %s6998_s25 }
  0x1f   :  { %s7013_s3 = sld [smem:[%s7949_s0 + %s6858_s15]]   ;;  %s6862_s15 = smov 27  }
  0x20   :  { %7969 = sst [smem:[#allocation48_spill]] %s7008_s20 }
  0x21   :  { %s7018_s25 = sld [smem:[%s7949_s0 + %s6859_s22]]   ;;  %s6863_s22 = smov 28  }
  0x22   :  { %7968 = sst [smem:[#allocation47_spill]] %s7003_s4 }
  0x23   :  { %s7023_s4 = sld [smem:[%s7949_s0 + %s6860_s28]]   ;;  %s6864_s28 = smov 29  }
  0x24   :  { %s7028_s20 = sld [smem:[%s7949_s0 + %s6861_s7]]   ;;  %s6865_s7 = smov 30  }
  0x25   :  { %7970 = sst [smem:[#allocation49_spill]] %s7013_s3 }
  0x26   :  { %s7033_s3 = sld [smem:[%s7949_s0 + %s6862_s15]]   ;;  %s6866_s15 = smov 31  }
  0x27   :  { %7971 = sst [smem:[#allocation50_spill]] %s7018_s25 }
  0x28   :  { %s7038_s25 = sld [smem:[%s7949_s0 + %s6863_s22]]  }
  0x29   :  { %7972 = sst [smem:[#allocation51_spill]] %s7023_s4 }
  0x2a   :  { %7973 = sst [smem:[#allocation52_spill]] %s7028_s20 }
  0x2b   :  { %s7043_s4 = sld [smem:[%s7949_s0 + %s6864_s28]]  }
  0x2c   :  { %7974 = sst [smem:[#allocation53_spill]] %s7033_s3 }
  0x2d   :  { %s7048_s20 = sld [smem:[%s7949_s0 + %s6865_s7]]  }
  0x2e   :  { %s7053_s3 = sld [smem:[%s7949_s0 + %s6866_s15]]  }
  0x2f   :  { %68 = vsyncpa [#allocation3], 0 }
  0x30   :  { %69 = vsyncpa [#allocation6], 0 }
  0x31   :  { %70 = vsyncpa [#allocation9], 0 }
  0x32   :  { %71 = vsyncpa [#allocation12], 0 }
  0x33   :  { %72 = vsyncpa [#allocation15], 0 }
  0x34   :  { %73 = vsyncpa [#allocation18], 0 }
  0x35   :  { %74 = vsyncpa [#allocation21], 0 }
  0x36   :  { %75 = vsyncpa [#allocation24], 0 }
  0x37   :  { %76 = vsyncpa [#allocation27], 0 }
  0x38   :  { %77 = vsyncpa [#allocation4], 0  ;;  %s6867_s22 = smov [#allocation5]   ;;  %s6868_s26 = smov [#allocation8]  }
  0x39   :  { %s95_s23 = sshll.u32 %s6867_s22, 4  ;;  %s119_s28 = sshll.u32 %s6868_s26, 4  ;;  %s96_s23 = int_to_ptr.vmem [resolvable:$true] %s95_s23  ;;  %s120_s28 = int_to_ptr.vmem [resolvable:$true] %s119_s28 }
  0x3a   :  { %s6464_s1 = scalar_lea.vmem %s96_s23, 256  ;;  %p6469_p1 = scmp.lt.s32.totalorder %s96_s23, %s96_s23 }
  0x3b   :  { %p6465_p0 = scmp.ne.s32.totalorder %s96_s23, %s6464_s1  ;;  %p6470_p2 = scmp.lt.s32.totalorder %s6464_s1, %s6464_s1 }
  0x3d   :  { %p6471_p3 = por %p6470_p2, %p6469_p1 }
  0x3f   :  { %p6472_p4 = pnand %p6471_p3, %p6465_p0 }
  0x41   :  { %6475 = shalt.err (!%p6472_p4)
}
  0x42   :  { %s6869_s0 = smov 128   ;;  %s6870_s2 = smov 8  }
  0x43   :  { %101 = dma.hbm_to_vmem [thread:$0]  %s6903_s9, 256, %s96_s23, [#allocation6], %s6869_s0, %s6869_s0, %s6870_s2  }
  0x44   :  { %s6484_s7 = scalar_lea.vmem %s120_s28, 256  ;;  %p6489_p6 = scmp.lt.s32.totalorder %s120_s28, %s120_s28 }
  0x45   :  { %p6485_p5 = scmp.ne.s32.totalorder %s120_s28, %s6484_s7  ;;  %p6490_p7 = scmp.lt.s32.totalorder %s6484_s7, %s6484_s7 }
  0x47   :  { %p6491_p8 = por %p6490_p7, %p6489_p6 }
  0x49   :  { %p6492_p9 = pnand %p6491_p8, %p6485_p5 }
  0x4b   :  { %6495 = shalt.err (!%p6492_p9)
}
  0x4c   :  { %125 = dma.hbm_to_vmem [thread:$0]  %s6913_s17, 256, %s120_s28, [#allocation9], %s6869_s0, %s6869_s0, %s6870_s2  }
  0x4d   :  { %s6871_s10 = smov [#allocation11]   ;;  %s6872_s15 = smov [#allocation14]  }
  0x4e   :  { %s146_s11 = sshll.u32 %s6871_s10, 4  ;;  %s170_s16 = sshll.u32 %s6872_s15, 4  ;;  %s147_s11 = int_to_ptr.vmem [resolvable:$true] %s146_s11  ;;  %s171_s16 = int_to_ptr.vmem [resolvable:$true] %s170_s16 }
  0x4f   :  { %s6504_s18 = scalar_lea.vmem %s147_s11, 16  ;;  %s6508_s9 = scalar_lea.vmem %s147_s11, 32 }
  0x50   :  { %p6505_p10 = scmp.ne.s32.totalorder %s147_s11, %s6504_s18  ;;  %p6509_p11 = scmp.lt.s32.totalorder %s147_s11, %s147_s11 }
  0x51   :  { %p6510_p12 = scmp.lt.s32.totalorder %s6508_s9, %s6504_s18 }
  0x53   :  { %p6511_p13 = por %p6510_p12, %p6509_p11 }
  0x55   :  { %p6512_p0 = pnand %p6511_p13, %p6505_p10 }
  0x57   :  { %6515 = shalt.err (!%p6512_p0)
}
  0x58   :  { %149 = dma.hbm_to_vmem [thread:$0]  %s6928_s29, 16, %s147_s11, [#allocation12]  }
  0x59   :  { %s6524_s22 = scalar_lea.vmem %s171_s16, 16  ;;  %s6528_s23 = scalar_lea.vmem %s171_s16, 32 }
  0x5a   :  { %p6525_p1 = scmp.ne.s32.totalorder %s171_s16, %s6524_s22  ;;  %p6529_p2 = scmp.lt.s32.totalorder %s171_s16, %s171_s16 }
  0x5b   :  { %p6530_p3 = scmp.lt.s32.totalorder %s6528_s23, %s6524_s22 }
  0x5d   :  { %p6531_p4 = por %p6530_p3, %p6529_p2 }
  0x5f   :  { %p6532_p5 = pnand %p6531_p4, %p6525_p1 }
  0x61   :  { %6535 = shalt.err (!%p6532_p5)
}
  0x62   :  { %173 = dma.hbm_to_vmem [thread:$0]  %s6948_s19, 16, %s171_s16, [#allocation15]  }
  0x63   :  { %s6873_s17 = smov [#allocation17]   ;;  %s6874_s28 = smov [#allocation20]  }
  0x64   :  { %s192_s26 = sshll.u32 %s6873_s17, 4  ;;  %s214_s1 = sshll.u32 %s6874_s28, 4  ;;  %s193_s26 = int_to_ptr.vmem [resolvable:$true] %s192_s26  ;;  %s215_s1 = int_to_ptr.vmem [resolvable:$true] %s214_s1 }
  0x65   :  { %s6544_s7 = scalar_lea.vmem %s193_s26, 16  ;;  %s6548_s10 = scalar_lea.vmem %s193_s26, 32 }
  0x66   :  { %p6545_p6 = scmp.ne.s32.totalorder %s193_s26, %s6544_s7  ;;  %p6549_p7 = scmp.lt.s32.totalorder %s193_s26, %s193_s26 }
  0x67   :  { %p6550_p8 = scmp.lt.s32.totalorder %s6548_s10, %s6544_s7 }
  0x69   :  { %p6551_p9 = por %p6550_p8, %p6549_p7 }
  0x6b   :  { %p6552_p10 = pnand %p6551_p9, %p6545_p6 }
  0x6d   :  { %6555 = shalt.err (!%p6552_p10)
}
  0x6e   :  { %195 = dma.hbm_to_vmem [thread:$0]  %s6958_s30, 16, %s193_s26, [#allocation18]  }
  0x6f   :  { %s6564_s29 = scalar_lea.vmem %s215_s1, 16  ;;  %s6568_s11 = scalar_lea.vmem %s215_s1, 32 }
  0x70   :  { %p6565_p11 = scmp.ne.s32.totalorder %s215_s1, %s6564_s29  ;;  %p6569_p12 = scmp.lt.s32.totalorder %s215_s1, %s215_s1 }
  0x71   :  { %p6570_p13 = scmp.lt.s32.totalorder %s6568_s11, %s6564_s29 }
  0x73   :  { %p6571_p0 = por %p6570_p13, %p6569_p12 }
  0x75   :  { %p6572_p1 = pnand %p6571_p0, %p6565_p11 }
  0x77   :  { %6575 = shalt.err (!%p6572_p1)
}
  0x78   :  { %217 = dma.hbm_to_vmem [thread:$0]  %s6968_s12, 16, %s215_s1, [#allocation21]  }
  0x79   :  { %s6875_s19 = smov [#allocation23]   ;;  %s6876_s16 = smov [#allocation26]  }
  0x7a   :  { %s236_s15 = sshll.u32 %s6875_s19, 4  ;;  %s258_s18 = sshll.u32 %s6876_s16, 4  ;;  %s237_s15 = int_to_ptr.vmem [resolvable:$true] %s236_s15  ;;  %s259_s18 = int_to_ptr.vmem [resolvable:$true] %s258_s18 }
  0x7b   :  { %s6584_s9 = scalar_lea.vmem %s237_s15, 16  ;;  %s6588_s22 = scalar_lea.vmem %s237_s15, 32 }
  0x7c   :  { %p6585_p2 = scmp.ne.s32.totalorder %s237_s15, %s6584_s9  ;;  %p6589_p3 = scmp.lt.s32.totalorder %s237_s15, %s237_s15 }
  0x7d   :  { %p6590_p4 = scmp.lt.s32.totalorder %s6588_s22, %s6584_s9 }
  0x7f   :  { %p6591_p5 = por %p6590_p4, %p6589_p3 }
  0x81   :  { %p6592_p6 = pnand %p6591_p5, %p6585_p2 }
  0x83   :  { %6595 = shalt.err (!%p6592_p6)
}
  0x84   :  { %239 = dma.hbm_to_vmem [thread:$0]  %s6978_s27, 16, %s237_s15, [#allocation24]  }
  0x85   :  { %s6604_s30 = scalar_lea.vmem %s259_s18, 16  ;;  %s6608_s23 = scalar_lea.vmem %s259_s18, 32 }
  0x86   :  { %p6605_p7 = scmp.ne.s32.totalorder %s259_s18, %s6604_s30  ;;  %p6609_p8 = scmp.lt.s32.totalorder %s259_s18, %s259_s18 }
  0x87   :  { %p6610_p9 = scmp.lt.s32.totalorder %s6608_s23, %s6604_s30 }
  0x89   :  { %p6611_p10 = por %p6610_p9, %p6609_p8 }
  0x8b   :  { %p6612_p11 = pnand %p6611_p10, %p6605_p7 }
  0x8d   :  { %6615 = shalt.err (!%p6612_p11)
}
  0x8e   :  { %261 = dma.hbm_to_vmem [thread:$0]  %s6988_s14, 16, %s259_s18, [#allocation27]  }
  0x8f   :  { %s6877_s12 = smov [#allocation2]   ;;  %s6878_s26 = smov [#allocation7]  }
  0x90   :  { %s83_s17 = sshll.u32 %s6877_s12, 4  ;;  %s107_s28 = sshll.u32 %s6878_s26, 4  ;;  %s84_s17 = int_to_ptr.vmem [resolvable:$true] %s83_s17  ;;  %s108_s28 = int_to_ptr.vmem [resolvable:$true] %s107_s28 }
  0x91   :  { %s6624_s1 = scalar_lea.vmem %s84_s17, 256  ;;  %p6629_p13 = scmp.lt.s32.totalorder %s84_s17, %s84_s17 }
  0x92   :  { %p6625_p12 = scmp.ne.s32.totalorder %s84_s17, %s6624_s1  ;;  %p6630_p0 = scmp.lt.s32.totalorder %s6624_s1, %s6624_s1 }
  0x94   :  { %p6631_p1 = por %p6630_p0, %p6629_p13 }
  0x96   :  { %p6632_p2 = pnand %p6631_p1, %p6625_p12 }
  0x98   :  { %6635 = shalt.err (!%p6632_p2)
}
  0x99   :  { %89 = dma.hbm_to_vmem [thread:$0]  %s6898_s5, 256, %s84_s17, [#allocation3], %s6869_s0, %s6869_s0, %s6870_s2  }
  0x9a   :  { %s6644_s27 = scalar_lea.vmem %s108_s28, 256  ;;  %p6649_p4 = scmp.lt.s32.totalorder %s108_s28, %s108_s28 }
  0x9b   :  { %p6645_p3 = scmp.ne.s32.totalorder %s108_s28, %s6644_s27  ;;  %p6650_p5 = scmp.lt.s32.totalorder %s6644_s27, %s6644_s27 }
  0x9d   :  { %p6651_p6 = por %p6650_p5, %p6649_p4 }
  0x9f   :  { %p6652_p7 = pnand %p6651_p6, %p6645_p3 }
  0xa1   :  { %6655 = shalt.err (!%p6652_p7)
}
  0xa2   :  { %113 = dma.hbm_to_vmem [thread:$0]  %s6908_s13, 256, %s108_s28, [#allocation6], %s6869_s0, %s6869_s0, %s6870_s2  }
  0xa3   :  { %s6879_s14 = smov [#allocation10]   ;;  %s6880_s10 = smov [#allocation13]  }
  0xa4   :  { %s131_s7 = sshll.u32 %s6879_s14, 4  ;;  %s158_s29 = sshll.u32 %s6880_s10, 4  ;;  %s132_s7 = int_to_ptr.vmem [resolvable:$true] %s131_s7  ;;  %s159_s29 = int_to_ptr.vmem [resolvable:$true] %s158_s29 }
  0xa5   :  { %s6664_s11 = scalar_lea.vmem %s132_s7, 256  ;;  %p6669_p9 = scmp.lt.s32.totalorder %s132_s7, %s132_s7 }
  0xa6   :  { %p6665_p8 = scmp.ne.s32.totalorder %s132_s7, %s6664_s11  ;;  %p6670_p10 = scmp.lt.s32.totalorder %s6664_s11, %s6664_s11 }
  0xa8   :  { %p6671_p11 = por %p6670_p10, %p6669_p9 }
  0xaa   :  { %p6672_p12 = pnand %p6671_p11, %p6665_p8 }
  0xac   :  { %6675 = shalt.err (!%p6672_p12)
}
  0xad   :  { %137 = dma.hbm_to_vmem [thread:$0]  %s6918_s21, 256, %s132_s7, [#allocation9], %s6869_s0, %s6869_s0, %s6870_s2  }
  0xae   :  { %s6684_s5 = scalar_lea.vmem %s159_s29, 16  ;;  %s6688_s13 = scalar_lea.vmem %s159_s29, 32 }
  0xaf   :  { %p6685_p13 = scmp.ne.s32.totalorder %s159_s29, %s6684_s5  ;;  %p6689_p0 = scmp.lt.s32.totalorder %s159_s29, %s159_s29 }
  0xb0   :  { %p6690_p1 = scmp.lt.s32.totalorder %s6688_s13, %s6684_s5 }
  0xb2   :  { %p6691_p2 = por %p6690_p1, %p6689_p0 }
  0xb4   :  { %p6692_p3 = pnand %p6691_p2, %p6685_p13 }
  0xb6   :  { %6695 = shalt.err (!%p6692_p3)
}
  0xb7   :  { %161 = dma.hbm_to_vmem [thread:$0]  %s6938_s8, 16, %s159_s29, [#allocation12]  }
  0xb8   :  { %s6881_s19 = smov [#allocation16]   ;;  %s6882_s16 = smov [#allocation19]  }
  0xb9   :  { %s179_s15 = sshll.u32 %s6881_s19, 4  ;;  %s201_s18 = sshll.u32 %s6882_s16, 4  ;;  %s180_s15 = int_to_ptr.vmem [resolvable:$true] %s179_s15  ;;  %s202_s18 = int_to_ptr.vmem [resolvable:$true] %s201_s18 }
  0xba   :  { %s6704_s9 = scalar_lea.vmem %s180_s15, 512  ;;  %p6709_p5 = scmp.lt.s32.totalorder %s180_s15, %s180_s15 }
  0xbb   :  { %p6705_p4 = scmp.ne.s32.totalorder %s180_s15, %s6704_s9  ;;  %p6710_p6 = scmp.lt.s32.totalorder %s6704_s9, %s6704_s9 }
  0xbd   :  { %p6711_p7 = por %p6710_p6, %p6709_p5 }
  0xbf   :  { %p6712_p8 = pnand %p6711_p7, %p6705_p4 }
  0xc1   :  { %6715 = shalt.err (!%p6712_p8)
}
  0xc2   :  { %185 = dma.hbm_to_vmem [thread:$0]  %s6953_s24, 512, %s180_s15, [#allocation15], %s6869_s0, %s6869_s0, %s6870_s2  }
  0xc3   :  { %s6724_s21 = scalar_lea.vmem %s202_s18, 512  ;;  %p6729_p10 = scmp.lt.s32.totalorder %s202_s18, %s202_s18 }
  0xc4   :  { %p6725_p9 = scmp.ne.s32.totalorder %s202_s18, %s6724_s21  ;;  %p6730_p11 = scmp.lt.s32.totalorder %s6724_s21, %s6724_s21 }
  0xc6   :  { %p6731_p12 = por %p6730_p11, %p6729_p10 }
  0xc8   :  { %p6732_p13 = pnand %p6731_p12, %p6725_p9 }
  0xca   :  { %6735 = shalt.err (!%p6732_p13)
}
  0xcb   :  { %207 = dma.hbm_to_vmem [thread:$0]  %s6963_s6, 512, %s202_s18, [#allocation18], %s6869_s0, %s6869_s0, %s6870_s2  }
  0xcc   :  { %s6883_s8 = smov [#allocation22]   ;;  %s6884_s30 = smov [#allocation25]  }
  0xcd   :  { %s223_s22 = sshll.u32 %s6883_s8, 4  ;;  %s245_s23 = sshll.u32 %s6884_s30, 4  ;;  %s224_s22 = int_to_ptr.vmem [resolvable:$true] %s223_s22  ;;  %s246_s23 = int_to_ptr.vmem [resolvable:$true] %s245_s23 }
  0xce   :  { %s6744_s12 = scalar_lea.vmem %s224_s22, 512  ;;  %p6749_p1 = scmp.lt.s32.totalorder %s224_s22, %s224_s22 }
  0xcf   :  { %p6745_p0 = scmp.ne.s32.totalorder %s224_s22, %s6744_s12  ;;  %p6750_p2 = scmp.lt.s32.totalorder %s6744_s12, %s6744_s12 }
  0xd1   :  { %p6751_p3 = por %p6750_p2, %p6749_p1 }
  0xd3   :  { %p6752_p4 = pnand %p6751_p3, %p6745_p0 }
  0xd5   :  { %6755 = shalt.err (!%p6752_p4)
}
  0xd6   :  { %s7975_s24 = sld [smem:[#allocation43_spill]]  ;;  %s6764_s17 = scalar_lea.vmem %s246_s23, 512 }
  0xd7   :  { %p6765_p5 = scmp.ne.s32.totalorder %s246_s23, %s6764_s17  ;;  %p6769_p6 = scmp.lt.s32.totalorder %s246_s23, %s246_s23 }
  0xd8   :  { %p6770_p7 = scmp.lt.s32.totalorder %s6764_s17, %s6764_s17 }
  0xda   :  { %p6771_p8 = por %p6770_p7, %p6769_p6 }
  0xdc   :  { %229 = dma.hbm_to_vmem [thread:$0]  %s7975_s24, 512, %s224_s22, [#allocation21], %s6869_s0, %s6869_s0, %s6870_s2  }
  0xdd   :  { %p6772_p9 = pnand %p6771_p8, %p6765_p5 }
  0xdf   :  { %6775 = shalt.err (!%p6772_p9)
}
  0xe0   :  { %s7976_s6 = sld [smem:[#allocation44_spill]]  ;;  %s6885_s26 = smov [#allocation28]  }
  0xe1   :  { %s283_s28 = sshll.u32 %s6885_s26, 4  ;;  %s284_s28 = int_to_ptr.vmem [resolvable:$true] %s283_s28 }
  0xe2   :  { %s6784_s1 = scalar_lea.vmem %s284_s28, 512  ;;  %p6789_p11 = scmp.lt.s32.totalorder %s284_s28, %s284_s28 }
  0xe3   :  { %p6785_p10 = scmp.ne.s32.totalorder %s284_s28, %s6784_s1  ;;  %p6790_p12 = scmp.lt.s32.totalorder %s6784_s1, %s6784_s1 }
  0xe5   :  { %p6791_p13 = por %p6790_p12, %p6789_p11 }
  0xe6   :  { %251 = dma.hbm_to_vmem [thread:$0]  %s7976_s6, 512, %s246_s23, [#allocation24], %s6869_s0, %s6869_s0, %s6870_s2  }
  0xe7   :  { %p6792_p0 = pnand %p6791_p13, %p6785_p10 }
  0xe9   :  { %6795 = shalt.err (!%p6792_p0)
}
  0xea   :  { %s7977_s27 = sld [smem:[#allocation53_spill]] }
  0xf0   :  { %289 = dma.hbm_to_vmem [thread:$0]  %s7977_s27, 512, %s284_s28, [#allocation27], %s6869_s0, %s6869_s0, %s6870_s2  }
  0xf1   :  { %6816 = dma.done.wait [#allocation3], 256  }
  0xf2   :  { %6817 = vsyncadd [#allocation3], 4294967040 }
  0xf3   :  { %6818 = dma.done.wait [#allocation6], 512  }
  0xf4   :  { %6819 = vsyncadd [#allocation6], 4294966784 }
  0xf5   :  { %6820 = dma.done.wait [#allocation9], 512  }
  0xf6   :  { %6821 = vsyncadd [#allocation9], 4294966784 }
  0xf7   :  { %6822 = dma.done.wait [#allocation12], 32  }
  0xf8   :  { %6823 = vsyncadd [#allocation12], 4294967264 }
  0xf9   :  { %6824 = dma.done.wait [#allocation15], 528  }
  0xfa   :  { %6825 = vsyncadd [#allocation15], 4294966768 }
  0xfb   :  { %6826 = dma.done.wait [#allocation18], 528  }
  0xfc   :  { %6827 = vsyncadd [#allocation18], 4294966768 }
  0xfd   :  { %6828 = dma.done.wait [#allocation21], 528  }
  0xfe   :  { %6829 = vsyncadd [#allocation21], 4294966768 }
  0xff   :  { %6830 = dma.done.wait [#allocation24], 528  }
 0x100   :  { %6831 = vsyncadd [#allocation24], 4294966768 }
 0x101   :  { %6832 = dma.done.wait [#allocation27], 528  }
 0x102   :  { %6833 = vsyncadd [#allocation27], 4294966768  ;;  %s7978_s14 = sld [smem:[#allocation40_spill]]  ;;  %v391_v0 = vld [vmem:[#allocation22 + $0x18] sm:$0xff]  ;;  %v390_v1 = vld [vmem:[#allocation22 + $0x10] sm:$0xff]  ;;  %vm443_vm0 = vcmask 261120   ;;  %v423_v60 = vlaneseq }
 0x103   :  { %5758 = vmatprep.subr.mxu1 %v391_v0  ;;  %v357_v3 = vld [vmem:[#allocation7] sm:$0xff]  ;;  %v348_v10 = vld [vmem:[#allocation2 + $0x8] sm:$0xff]  ;;  %v396_v12 = vld [vmem:[#allocation25 + $0x18] sm:$0xff]  ;;  %s7979_s7 = sld [smem:[#allocation41_spill]]  ;;  %vm881_vm1 = vcmask 64512   ;;  %s6886_s29 = smov 120  }
 0x104   :  { %5759 = vmatpush3.msra.mxu1 %v391_v0  ;;  %v389_v4 = vld [vmem:[#allocation22 + $0x8] sm:$0xff]  ;;  %5766 = vmatprep.mubr.msk.f32.mxu1 %vm443_vm0, %v357_v3  ;;  %v388_v6 = vld [vmem:[#allocation22] sm:$0xff]  ;;  %v353_v13 = vld [vmem:[#allocation5] sm:$0xff]  ;;  %v350_v14 = vmul.f32 5.656854, %v348_v10  ;;  %s7980_s10 = sld [smem:[#allocation42_spill]] }
 0x105   :  { %5760 = vmatprep.subr.mxu1 %v390_v1  ;;  %v347_v8 = vld [vmem:[#allocation2] sm:$0xff]  ;;  %v358_v11 = vld [vmem:[#allocation7 + $0x8] sm:$0xff]  ;;  %v354_v17 = vld [vmem:[#allocation5 + $0x8] sm:$0xff]  ;;  %s6887_s11 = smov 112   ;;  %v7196_v61 = vand.u32 127, %v423_v60  ;;  %vm969_vm9 = vcmask 130048  }
 0x106   :  { %5761 = vmatpush3.msra.mxu1 %v390_v1  ;;  %v349_v9 = vmul.f32 5.656854, %v347_v8  ;;  %v395_v18 = vld [vmem:[#allocation25 + $0x10] sm:$0xff]  ;;  %v352_v19 = vmul.f32 5.656854, %v350_v14  ;;  %v394_v21 = vld [vmem:[#allocation25 + $0x8] sm:$0xff] }
 0x107   :  { %5762 = vmatprep.subr.mxu1 %v389_v4  ;;  %v393_v23 = vld [vmem:[#allocation25] sm:$0xff]  ;;  %v7134_v33 = vld [vmem:[#allocation23] ss:$0 sm:$0xff]  ;;  %v5340_v37 = vld [vmem:[#allocation11] ss:$0 sm:$0xff]  ;;  %vm428_vm2 = vcmp.ge.s32.totalorder %v7196_v61, 8 }
 0x108   :  { %v366_v2 = vld [vmem:[%s7978_s14 + $0x18] sm:$0xff]  ;;  %v365_v5 = vld [vmem:[%s7978_s14 + $0x10] sm:$0xff]  ;;  %v364_v7 = vld [vmem:[%s7978_s14 + $0x8] sm:$0xff]  ;;  %5763 = vmatpush3.msra.mxu1 %v389_v4  ;;  %v351_v16 = vmul.f32 5.656854, %v349_v9  ;;  %v7110_v22 = vadd.f32 %v354_v17, %v352_v19  ;;  %vm429_vm3 = vcmp.lt.s32.totalorder %v7196_v61, 16 }
 0x109   :  { %5780 = vmatprep.subr.mxu0 %v366_v2  ;;  %5764 = vmatprep.subr.mxu1 %v388_v6  ;;  %v363_v15 = vld [vmem:[%s7978_s14] sm:$0xff]  ;;  %v371_v24 = vld [vmem:[%s7979_s7 + $0x18] sm:$0xff]  ;;  %v370_v25 = vld [vmem:[%s7979_s7 + $0x10] sm:$0xff]  ;;  %vm434_vm4 = vcmp.ge.s32.totalorder %v7196_v61, 24  ;;  %vm435_vm5 = vcmp.lt.s32.totalorder %v7196_v61, 32  ;;  %vm426_vm8 = vcmp.lt.s32.totalorder %v7196_v61, 8 }
 0x10a   :  { %5781 = vmatpush3.msra.mxu0 %v366_v2  ;;  %5765 = vmatpush3.msra.mxu1 %v388_v6  ;;  %v7108_v20 = vadd.f32 %v353_v13, %v351_v16  ;;  %v369_v26 = vld [vmem:[%s7979_s7 + $0x8] sm:$0xff]  ;;  %v368_v27 = vld [vmem:[%s7979_s7] sm:$0xff]  ;;  %v376_v28 = vld [vmem:[%s7980_s10 + $0x18] sm:$0xff]  ;;  %s6888_s5 = smov 104   ;;  %vm431_vm10 = vcmp.ge.s32.totalorder %v7196_v61, 16  ;;  %vm432_vm11 = vcmp.lt.s32.totalorder %v7196_v61, 24 }
 0x10b   :  { %5782 = vmatprep.subr.mxu0 %v365_v5  ;;  %5767 = vmatmul.mubr.msk.f32.vlgmr.msra.gmra.mxu1 %vm443_vm0, %v358_v11  ;;  %v375_v29 = vld [vmem:[%s7980_s10 + $0x10] sm:$0xff]  ;;  %v374_v30 = vld [vmem:[%s7980_s10 + $0x8] sm:$0xff]  ;;  %v373_v31 = vld [vmem:[%s7980_s10] sm:$0xff]  ;;  %s7987_s13 = sld [smem:[#allocation47_spill]]  ;;  %vm2882_vm13 = vcmask 523264  }
 0x10c   :  { %5783 = vmatpush3.msra.mxu0 %v365_v5  ;;  %5769 = vmatprep.subr.mxu1 %v396_v12  ;;  %v7143_v42 = vld [vmem:[#allocation26] ss:$0 sm:$0xff]  ;;  %v5343_v47 = vld [vmem:[#allocation13] ss:$0 sm:$0xff]  ;;  %v5346_v62 = vld [vmem:[#allocation14] ss:$0 sm:$0xff] }
 0x10d   :  { %5784 = vmatprep.subr.mxu0 %v364_v7  ;;  %5770 = vmatpush3.msra.mxu1 %v396_v12  ;;  %vm7202_vm6 = vmand %vm428_vm2, %vm429_vm3  ;;  %v7242_v6 = vld [vmem:[#allocation8 + $0x8] sm:$0xff]  ;;  %v7245_v10 = vld [vmem:[#allocation8] sm:$0xff]  ;;  %s7988_s19 = sld [smem:[#allocation48_spill]] }
 0x10e   :  { %5785 = vmatpush3.msra.mxu0 %v364_v7  ;;  %5771 = vmatprep.subr.mxu1 %v395_v18  ;;  %vm7206_vm7 = vmand %vm434_vm4, %vm435_vm5  ;;  %s7989_s15 = sld [smem:[#allocation45_spill]] }
 0x10f   :  { %5786 = vmatprep.subr.mxu0 %v363_v15  ;;  %5772 = vmatpush3.msra.mxu1 %v395_v18  ;;  %vm7280_vm12 = vmand %vm431_vm10, %vm432_vm11  ;;  %s7990_s16 = sld [smem:[#allocation46_spill]] }
 0x110   :  { %5787 = vmatpush3.msra.mxu0 %v363_v15  ;;  %5788 = vmatprep.mubr.msk.f32.mxu0 %vm443_vm0, %v7108_v20  ;;  %s7991_s18 = sld [smem:[#allocation49_spill]] }
 0x111   :  { %5773 = vmatprep.subr.mxu1 %v394_v21  ;;  %5789 = vmatmul.mubr.msk.f32.vlgmr.msra.gmra.mxu0 %vm443_vm0, %v7110_v22  ;;  %s7992_s9 = sld [smem:[#allocation50_spill]] }
 0x112   :  { %5774 = vmatpush3.msra.mxu1 %v394_v21  ;;  %5777 = vmatprep.mubr.msk.f32.mxu1 %vm443_vm0, %v357_v3  ;;  %s7993_s21 = sld [smem:[#allocation51_spill]] }
 0x113   :  { %5775 = vmatprep.subr.mxu1 %v393_v23  ;;  %5810 = vmatprep.mubr.msk.f32.mxu0 %vm443_vm0, %v7108_v20  ;;  %s7994_s8 = sld [smem:[#allocation52_spill]] }
 0x114   :  { %5776 = vmatpush3.msra.mxu1 %v393_v23  ;;  %5802 = vmatprep.subr.mxu0 %v376_v28 }
 0x115   :  { %5778 = vmatmul.mubr.msk.f32.vlgmr.msra.gmra.mxu1 %vm443_vm0, %v358_v11  ;;  %5791 = vmatprep.subr.mxu1 %v371_v24 }
 0x116   :  { %5792 = vmatpush3.msra.mxu1 %v371_v24  ;;  %5799 = vmatprep.mubr.msk.f32.mxu1 %vm443_vm0, %v7108_v20 }
 0x117   :  { %5793 = vmatprep.subr.mxu1 %v370_v25  ;;  %5803 = vmatpush3.msra.mxu0 %v376_v28 }
 0x118   :  { %5794 = vmatpush3.msra.mxu1 %v370_v25  ;;  %5804 = vmatprep.subr.mxu0 %v375_v29 }
 0x119   :  { %5795 = vmatprep.subr.mxu1 %v369_v26  ;;  %5805 = vmatpush3.msra.mxu0 %v375_v29 }
 0x11a   :  { %5796 = vmatpush3.msra.mxu1 %v369_v26  ;;  %5806 = vmatprep.subr.mxu0 %v374_v30 }
 0x11b   :  { %5797 = vmatprep.subr.mxu1 %v368_v27  ;;  %5807 = vmatpush3.msra.mxu0 %v374_v30 }
 0x11c   :  { %5798 = vmatpush3.msra.mxu1 %v368_v27  ;;  %5808 = vmatprep.subr.mxu0 %v373_v31 }
 0x11d   :  { %5800 = vmatmul.mubr.msk.f32.vlgmr.msra.gmra.mxu1 %vm443_vm0, %v7110_v22  ;;  %5809 = vmatpush3.msra.mxu0 %v373_v31 }
 0x11e   :  { %5811 = vmatmul.mubr.msk.f32.vlgmr.msra.gmra.mxu0 %vm443_vm0, %v7110_v22 }
 0x1cb   :  { %v7132_v32 = vpop.f32.mrf.mxu1 }
 0x1cd   :  { %v516_v34 = vpop.f32.mrf.mxu1 }
 0x1ce   :  { %v7139_v35 = vadd.f32 %v7134_v33, %v516_v34 }
 0x1d1   :  { %v5790_v36 = vpop.f32.mrf.mxu0 }
 0x1d2   :  { %v706_v39 = vadd.f32 %v5790_v36, %v5340_v37 }
 0x1d3   :  { %v700_v38 = vpop.f32.mrf.mxu0 }
 0x1d4   :  { %v701_v40 = vadd.f32 %v5340_v37, %v700_v38  ;;  %v7147_v45 = vmul.f32 0.35355338, %v706_v39 }
 0x1d5   :  { %v7141_v41 = vpop.f32.mrf.mxu1 }
 0x1d6   :  { %v7145_v43 = vmul.f32 0.35355338, %v701_v40 }
 0x1d7   :  { %v597_v44 = vpop.f32.mrf.mxu1 }
 0x1d8   :  { %v7150_v46 = vadd.f32 %v7143_v42, %v597_v44  ;;  %992 = vrot.lane.b32.xlu1 %v7145_v43, %s6886_s29  ;;  %5817 = vmatprep.mubr.msk.f32.mxu1 %vm881_vm1, %v7145_v43 }
 0x1dc   :  { %994 = vrot.lane.b32.xlu1 %v7147_v45, %s6886_s29 }
 0x1dd   :  { %v5801_v48 = vpop.f32.mrf.mxu1 }
 0x1de   :  { %v7158_v49 = vadd.f32 %v5801_v48, %v5343_v47  ;;  %v5812_v0 = vpop.f32.mrf.mxu0 }
 0x1df   :  { %v783_v50 = vpop.f32.mrf.mxu1  ;;  %v7210_v2 = vadd.f32 %v5812_v0, %v5346_v62 }
 0x1e0   :  { %v7160_v51 = vadd.f32 %v5343_v47, %v783_v50  ;;  %998 = vrot.lane.b32.xlu0 %v7158_v49, %s6886_s29  ;;  %5813 = vmatprep.subr.msk.mxu1 %vm881_vm1, %v7158_v49  ;;  %v864_v3 = vpop.f32.mrf.mxu0 }
 0x1e1   :  { %5814 = vmatpush3.xpose.msk.msra.mxu1 %vm881_vm1, %v7158_v49  ;;  %v7212_v4 = vadd.f32 %v5346_v62, %v864_v3 }
 0x1e2   :  { %5815 = vmatprep.subr.msk.mxu1 %vm881_vm1, %v7160_v51  ;;  %1271 = vrot.lane.b32.xlu1 %v7160_v51, %s6887_s11 }
 0x1e4   :  { %996 = vrot.lane.b32.xlu0 %v7160_v51, %s6886_s29 }
 0x1e5   :  { %5816 = vmatpush3.xpose.msk.msra.mxu1 %vm881_vm1, %v7160_v51 }
 0x1e6   :  { %1269 = vrot.lane.b32.xlu1 %v7147_v45, %s6887_s11  ;;  %5827 = vmatprep.subr.msk.mxu1 %vm7202_vm6, %v7210_v2 }
 0x1e8   :  { %1273 = vrot.lane.b32.xlu0 %v7158_v49, %s6887_s11  ;;  %5818 = vmatmul.mubr.msk.f32.vlgmr.msra.gmra.mxu1 %vm881_vm1, %v7147_v45 }
 0x1e9   :  { %5828 = vmatpush3.msk.msra.mxu1 %vm7202_vm6, %v7210_v2 }
 0x1ea   :  { %5829 = vmatprep.subr.msk.mxu1 %vm7202_vm6, %v7212_v4 }
 0x1eb   :  { %5830 = vmatpush3.msk.msra.mxu1 %vm7202_vm6, %v7212_v4 }
 0x1ec   :  { %1267 = vrot.lane.b32.xlu0 %v7145_v43, %s6887_s11  ;;  %5834 = vmatprep.subr.msk.mxu1 %vm426_vm8, %v7210_v2 }
 0x24a   :  { %v993_v52 = vpop.permute.xlu1 %992 }
 0x24b   :  { %5824 = vmatprep.mubr.msk.f32.mxu0 %vm881_vm1, %v993_v52 }
 0x24e   :  { %v995_v54 = vpop.permute.xlu1 %994 }
 0x252   :  { %v999_v53 = vpop.permute.xlu0 %998 }
 0x253   :  { %5820 = vmatprep.subr.msk.mxu0 %vm881_vm1, %v999_v53 }
 0x254   :  { %5821 = vmatpush3.xpose.msk.msra.mxu0 %vm881_vm1, %v999_v53  ;;  %v1272_v57 = vpop.permute.xlu1 %1271 }
 0x256   :  { %v997_v55 = vpop.permute.xlu0 %996 }
 0x257   :  { %5822 = vmatprep.subr.msk.mxu0 %vm881_vm1, %v997_v55 }
 0x258   :  { %5823 = vmatpush3.xpose.msk.msra.mxu0 %vm881_vm1, %v997_v55  ;;  %v1270_v59 = vpop.permute.xlu1 %1269 }
 0x25a   :  { %v1274_v56 = vpop.permute.xlu0 %1273 }
 0x25b   :  { %5825 = vmatmul.mubr.msk.f32.vlgmr.msra.gmra.mxu0 %vm881_vm1, %v995_v54  ;;  %5841 = vmatprep.subr.msk.mxu0 %vm881_vm1, %v1274_v56 }
 0x25c   :  { %5842 = vmatpush3.xpose.msk.msra.mxu0 %vm881_vm1, %v1274_v56 }
 0x25d   :  { %5843 = vmatprep.subr.msk.mxu0 %vm881_vm1, %v1272_v57 }
 0x25e   :  { %v1268_v58 = vpop.permute.xlu0 %1267 }
 0x25f   :  { %5845 = vmatprep.mubr.msk.f32.mxu0 %vm881_vm1, %v1268_v58 }
 0x260   :  { %5844 = vmatpush3.xpose.msk.msra.mxu0 %vm881_vm1, %v1272_v57 }
 0x261   :  { %5862 = vmatprep.subr.msk.mxu0 %vm7206_vm7, %v7210_v2 }
 0x263   :  { %5846 = vmatmul.mubr.msk.f32.vlgmr.msra.gmra.mxu0 %vm881_vm1, %v1270_v59 }
 0x264   :  { %5863 = vmatpush3.msk.msra.mxu0 %vm7206_vm7, %v7210_v2 }
 0x265   :  { %5864 = vmatprep.subr.msk.mxu0 %vm7206_vm7, %v7212_v4 }
 0x266   :  { %5865 = vmatpush3.msk.msra.mxu0 %vm7206_vm7, %v7212_v4 }
 0x2a8   :  { %v5819_v5 = vpop.f32.mrf.mxu1 }
 0x2a9   :  { %v966_v17 = vadd.f32 %v5819_v5, %v7242_v6 }
 0x2aa   :  { %v960_v9 = vpop.f32.mrf.mxu1 }
 0x2ab   :  { %v961_v14 = vadd.f32 %v960_v9, %v7245_v10  ;;  %v973_v25 = vsel %vm969_vm9, %v966_v17, -inf }
 0x2ad   :  { %v970_v18 = vsel %vm969_vm9, %v961_v14, -inf }
 0x31b   :  { %v5826_v7 = vpop.f32.mrf.mxu0 }
 0x31c   :  { %v1080_v8 = vadd.f32 %v5826_v7, %v7242_v6 }
 0x31d   :  { %v1074_v11 = vpop.f32.mrf.mxu0 }
 0x31e   :  { %v1075_v12 = vadd.f32 %v1074_v11, %v7245_v10  ;;  %v1086_v13 = vsel %vm969_vm9, %v1080_v8, -inf }
 0x31f   :  { %1087 = vmax.xlane.f32.xlu1 %v1086_v13 }
 0x320   :  { %v1083_v15 = vsel %vm969_vm9, %v1075_v12, -inf }
 0x321   :  { %1084 = vmax.xlane.f32.xlu0 %v1083_v15 }
 0x323   :  { %v5847_v16 = vpop.f32.mrf.mxu0 }
 0x324   :  { %v1355_v23 = vadd.f32 %v5847_v16, %v7242_v6 }
 0x325   :  { %v1349_v19 = vpop.f32.mrf.mxu0  ;;  %971 = vmax.xlane.f32.xlu0 %v970_v18  ;;  %v6434_v18 = vld [vmem:[#allocation28 + $0x18] sm:$0xff] }
 0x326   :  { %v1350_v21 = vadd.f32 %v1349_v19, %v7245_v10  ;;  %v1361_v26 = vsel %vm969_vm9, %v1355_v23, -inf }
 0x328   :  { %v1358_v24 = vsel %vm969_vm9, %v1350_v21, -inf }
 0x329   :  { %1359 = vmax.xlane.f32.xlu1 %v1358_v24  ;;  %974 = vmax.xlane.f32.xlu0 %v973_v25 }
 0x32d   :  { %1362 = vmax.xlane.f32.xlu0 %v1361_v26 }
 0x3a8   :  { %v1088_v27 = vpop.xlane.xlu1 %1087 }
 0x3a9   :  { %v1090_v28 = vsub.f32 %v1080_v8, %v1088_v27 }
 0x3aa   :  { %v1085_v29 = vpop.xlane.xlu0 %1084 }
 0x3ab   :  { %v1093_v30 = vmul.f32 1.442695, %v1090_v28  ;;  %v1089_v58 = vsub.f32 %v1075_v12, %v1085_v29 }
 0x3ad   :  { %6250 = vpow2.f32 %v1093_v30  ;;  %v1091_v59 = vmul.f32 1.442695, %v1089_v58 }
 0x3ae   :  { %v972_v31 = vpop.xlane.xlu0 %971 }
 0x3af   :  { %v976_v34 = vsub.f32 %v961_v14, %v972_v31 }
 0x3b1   :  { %v978_v36 = vmul.f32 1.442695, %v976_v34 }
 0x3b2   :  { %v975_v37 = vpop.xlane.xlu0 %974  ;;  %v1360_v0 = vpop.xlane.xlu1 %1359 }
 0x3b3   :  { %6252 = vpow2.f32 %v978_v36  ;;  %v977_v38 = vsub.f32 %v966_v17, %v975_v37  ;;  %v1364_v3 = vsub.f32 %v1350_v21, %v1360_v0 }
 0x3b5   :  { %v980_v39 = vmul.f32 1.442695, %v977_v38  ;;  %v1366_v5 = vmul.f32 1.442695, %v1364_v3  ;;  %v381_v3 = vld [vmem:[#allocation16 + $0x18] sm:$0xff] }
 0x3b6   :  { %v1363_v40 = vpop.xlane.xlu0 %1362  ;;  %5869 = vmatprep.subr.mxu0 %v381_v3 }
 0x3b7   :  { %v1365_v44 = vsub.f32 %v1355_v23, %v1363_v40  ;;  %6254 = vpow2.f32 %v980_v39 }
 0x3b9   :  { %v1368_v47 = vmul.f32 1.442695, %v1365_v44 }
 0x3ba   :  { %v6251_v48 = vpop.eup %6250 }
 0x3bb   :  { %6256 = vpow2.f32 %v1368_v47  ;;  %v1098_v50 = vsel %vm969_vm9, %v6251_v48, 0.0 }
 0x3bc   :  { %1099 = vadd.xlane.f32.xlu0 %v1098_v50  ;;  %6258 = vpow2.f32 %v1091_v59 }
 0x3bd   :  { %6260 = vpow2.f32 %v1366_v5 }
 0x3c0   :  { %v6253_v52 = vpop.eup %6252 }
 0x3c1   :  { %v982_v53 = vsel %vm969_vm9, %v6253_v52, 0.0 }
 0x3c2   :  { %983 = vadd.xlane.f32.xlu1 %v982_v53 }
 0x3c4   :  { %v6255_v54 = vpop.eup %6254 }
 0x3c5   :  { %v985_v55 = vsel %vm969_vm9, %v6255_v54, 0.0 }
 0x3c6   :  { %986 = vadd.xlane.f32.xlu0 %v985_v55 }
 0x3c8   :  { %v6257_v56 = vpop.eup %6256 }
 0x3c9   :  { %v1373_v57 = vsel %vm969_vm9, %v6257_v56, 0.0  ;;  %v6259_v60 = vpop.eup %6258 }
 0x3ca   :  { %1374 = vadd.xlane.f32.xlu0 %v1373_v57  ;;  %v1095_v62 = vsel %vm969_vm9, %v6259_v60, 0.0  ;;  %v6261_v7 = vpop.eup %6260 }
 0x3d3   :  { %1469 = vrot.lane.b32.xlu1 %v7158_v49, %s6888_s5  ;;  %v1370_v49 = vsel %vm969_vm9, %v6261_v7, 0.0 }
 0x3e0   :  { %1467 = vrot.lane.b32.xlu0 %v7160_v51, %s6888_s5 }
 0x3f7   :  { %1096 = vadd.xlane.f32.xlu1 %v1095_v62 }
 0x408   :  { %1463 = vrot.lane.b32.xlu1 %v7145_v43, %s6888_s5 }
 0x42c   :  { %1371 = vadd.xlane.f32.xlu1 %v1370_v49 }
 0x43d   :  { %1465 = vrot.lane.b32.xlu1 %v7147_v45, %s6888_s5 }
 0x445   :  { %v1100_v8 = vpop.xlane.xlu0 %1099 }
 0x446   :  { %6262 = vrcp.f32 %v1100_v8 }
 0x44b   :  { %v984_v51 = vpop.xlane.xlu1 %983 }
 0x44c   :  { %6264 = vrcp.f32 %v984_v51 }
 0x44f   :  { %v1470_v9 = vpop.permute.xlu1 %1469  ;;  %v987_v12 = vpop.xlane.xlu0 %986 }
 0x453   :  { %v6263_v43 = vpop.eup %6262  ;;  %v1375_v23 = vpop.xlane.xlu0 %1374 }
 0x454   :  { %v1104_v16 = vmul.f32 %v6263_v43, %v6251_v48  ;;  %v378_v43 = vld [vmem:[#allocation16] sm:$0xff] }
 0x459   :  { %v6265_v13 = vpop.eup %6264 }
 0x45a   :  { %v990_v45 = vmul.f32 %v6265_v13, %v6253_v52  ;;  %v7321_v13 = vadd.f32 %v7132_v32, %v7134_v33  ;;  %v7333_v32 = vadd.f32 %v7141_v41, %v7143_v42  ;;  %v5381_v33 = vld [vmem:[#allocation17] ss:$0 sm:$0xff] }
 0x45b   :  { %v386_v42 = vld [vmem:[#allocation19 + $0x18] sm:$0xff] }
 0x480   :  { %v1097_v11 = vpop.xlane.xlu1 %1096 }
 0x481   :  { %6266 = vrcp.f32 %v1097_v11  ;;  %v380_v11 = vld [vmem:[#allocation16 + $0x10] sm:$0xff] }
 0x482   :  { %6268 = vrcp.f32 %v987_v12  ;;  %v379_v12 = vld [vmem:[#allocation16 + $0x8] sm:$0xff] }
 0x483   :  { %6270 = vrcp.f32 %v1375_v23 }
 0x484   :  { %v1464_v21 = vpop.permute.xlu1 %1463 }
 0x48e   :  { %v6267_v14 = vpop.eup %6266 }
 0x48f   :  { %v1103_v15 = vmul.f32 %v6267_v14, %v6259_v60  ;;  %v6269_v17 = vpop.eup %6268 }
 0x490   :  { %v991_v19 = vmul.f32 %v6269_v17, %v6255_v54  ;;  %v6271_v25 = vpop.eup %6270 }
 0x491   :  { %5831 = vmatprep.mubr.msk.f32.mxu1 %vm969_vm9, %v1103_v15  ;;  %v1379_v28 = vmul.f32 %v6271_v25, %v6257_v56 }
 0x492   :  { %5832 = vmatmul.mubr.msk.f32.vlgmr.msra.gmra.mxu1 %vm969_vm9, %v1104_v16 }
 0x493   :  { %5835 = vmatpush3.msk.msra.mxu1 %vm426_vm8, %v7210_v2  ;;  %5838 = vmatprep.mubr.msk.f32.mxu1 %vm969_vm9, %v990_v45 }
 0x494   :  { %5836 = vmatprep.subr.msk.mxu1 %vm426_vm8, %v7212_v4 }
 0x495   :  { %5837 = vmatpush3.msk.msra.mxu1 %vm426_vm8, %v7212_v4 }
 0x496   :  { %5848 = vmatprep.subr.msk.mxu1 %vm7280_vm12, %v7210_v2  ;;  %5839 = vmatmul.mubr.msk.f32.vlgmr.msra.gmra.mxu1 %vm969_vm9, %v991_v19 }
 0x497   :  { %5849 = vmatpush3.msk.msra.mxu1 %vm7280_vm12, %v7210_v2  ;;  %v1468_v2 = vpop.permute.xlu0 %1467 }
 0x498   :  { %5850 = vmatprep.subr.msk.mxu1 %vm7280_vm12, %v7212_v4 }
 0x499   :  { %5851 = vmatpush3.msk.msra.mxu1 %vm7280_vm12, %v7212_v4 }
 0x49a   :  { %5855 = vmatprep.subr.msk.mxu1 %vm881_vm1, %v1470_v9 }
 0x4b5   :  { %v1372_v24 = vpop.xlane.xlu1 %1371 }
 0x4b6   :  { %6272 = vrcp.f32 %v1372_v24 }
 0x4b9   :  { %v1466_v4 = vpop.permute.xlu1 %1465 }
 0x4c3   :  { %v6273_v26 = vpop.eup %6272 }
 0x4c4   :  { %v1378_v27 = vmul.f32 %v6273_v26, %v6261_v7 }
 0x4c6   :  { %5852 = vmatprep.mubr.msk.f32.mxu1 %vm969_vm9, %v1378_v27 }
 0x4c7   :  { %5853 = vmatmul.mubr.msk.f32.vlgmr.msra.gmra.mxu1 %vm969_vm9, %v1379_v28 }
 0x4c8   :  { %5856 = vmatpush3.xpose.msk.msra.mxu1 %vm881_vm1, %v1470_v9  ;;  %5859 = vmatprep.mubr.msk.f32.mxu1 %vm881_vm1, %v1464_v21 }
 0x4c9   :  { %5857 = vmatprep.subr.msk.mxu1 %vm881_vm1, %v1468_v2 }
 0x4cc   :  { %5858 = vmatpush3.xpose.msk.msra.mxu1 %vm881_vm1, %v1468_v2 }
 0x4cd   :  { %5880 = vmatprep.subr.mxu1 %v386_v42 }
 0x4cf   :  { %5860 = vmatmul.mubr.msk.f32.vlgmr.msra.gmra.mxu1 %vm881_vm1, %v1466_v4 }
 0x4d0   :  { %5881 = vmatpush3.msra.mxu1 %v386_v42 }
 0x552   :  { %v5833_v29 = vpop.f32.mrf.mxu1 }
 0x554   :  { %v1177_v30 = vpop.f32.mrf.mxu1 }
 0x556   :  { %v5840_v31 = vpop.f32.mrf.mxu1 }
 0x557   :  { %v1264_v34 = vadd.f32 %v5840_v31, %v5833_v29 }
 0x558   :  { %v1258_v36 = vpop.f32.mrf.mxu1 }
 0x559   :  { %v1259_v37 = vadd.f32 %v1258_v36, %v1177_v30  ;;  %v385_v36 = vld [vmem:[#allocation19 + $0x10] sm:$0xff] }
 0x55a   :  { %5882 = vmatprep.subr.mxu1 %v385_v36 }
 0x55b   :  { %5883 = vmatpush3.msra.mxu1 %v385_v36 }
 0x587   :  { %v5854_v38 = vpop.f32.mrf.mxu1 }
 0x588   :  { %v1462_v39 = vadd.f32 %v5854_v38, %v1264_v34  ;;  %v383_v38 = vld [vmem:[#allocation19] sm:$0xff] }
 0x589   :  { %v1452_v40 = vpop.f32.mrf.mxu1 }
 0x58a   :  { %v1461_v44 = vadd.f32 %v1452_v40, %v1259_v37  ;;  %v384_v37 = vld [vmem:[#allocation19 + $0x8] sm:$0xff] }
 0x58b   :  { %5884 = vmatprep.subr.mxu1 %v384_v37 }
 0x58c   :  { %5885 = vmatpush3.msra.mxu1 %v384_v37 }
 0x58d   :  { %5886 = vmatprep.subr.mxu1 %v383_v38 }
 0x58e   :  { %5887 = vmatpush3.msra.mxu1 %v383_v38 }
 0x58f   :  { %v5861_v47 = vpop.f32.mrf.mxu1 }
 0x590   :  { %v1551_v48 = vadd.f32 %v5861_v47, %v7242_v6 }
 0x591   :  { %v1545_v50 = vpop.f32.mrf.mxu1 }
 0x592   :  { %v1546_v52 = vadd.f32 %v1545_v50, %v7245_v10  ;;  %v1557_v53 = vsel %vm969_vm9, %v1551_v48, -inf }
 0x593   :  { %1558 = vmax.xlane.f32.xlu1 %v1557_v53 }
 0x594   :  { %v1554_v54 = vsel %vm969_vm9, %v1546_v52, -inf }
 0x595   :  { %1555 = vmax.xlane.f32.xlu0 %v1554_v54  ;;  %v5384_v54 = vld [vmem:[%s7987_s13] ss:$0 sm:$0xff] }
 0x61c   :  { %v1559_v55 = vpop.xlane.xlu1 %1558 }
 0x61d   :  { %v1561_v56 = vsub.f32 %v1551_v48, %v1559_v55 }
 0x61e   :  { %v1556_v57 = vpop.xlane.xlu0 %1555 }
 0x61f   :  { %v1560_v58 = vsub.f32 %v1546_v52, %v1556_v57  ;;  %v1564_v59 = vmul.f32 1.442695, %v1561_v56 }
 0x621   :  { %v1562_v60 = vmul.f32 1.442695, %v1560_v58 }
 0x623   :  { %6274 = vpow2.f32 %v1562_v60 }
 0x624   :  { %6276 = vpow2.f32 %v1564_v59  ;;  %v5385_v59 = vld [vmem:[%s7988_s19] ss:$0 sm:$0xff] }
 0x630   :  { %v6275_v62 = vpop.eup %6274 }
 0x631   :  { %v1566_v6 = vsel %vm969_vm9, %v6275_v62, 0.0  ;;  %v6277_v0 = vpop.eup %6276 }
 0x632   :  { %1567 = vadd.xlane.f32.xlu0 %v1566_v6  ;;  %v1569_v10 = vsel %vm969_vm9, %v6277_v0, 0.0 }
 0x636   :  { %1570 = vadd.xlane.f32.xlu0 %v1569_v10  ;;  %v5386_v10 = vld [vmem:[#allocation20] ss:$0 sm:$0xff] }
 0x6bb   :  { %v1568_v5 = vpop.xlane.xlu0 %1567 }
 0x6bc   :  { %6278 = vrcp.f32 %v1568_v5 }
 0x6bf   :  { %v1571_v7 = vpop.xlane.xlu0 %1570 }
 0x6c0   :  { %6280 = vrcp.f32 %v1571_v7 }
 0x6c9   :  { %v6279_v49 = vpop.eup %6278 }
 0x6ca   :  { %v1574_v51 = vmul.f32 %v6279_v49, %v6275_v62 }
 0x6cc   :  { %5866 = vmatprep.mubr.msk.f32.mxu0 %vm969_vm9, %v1574_v51 }
 0x6cd   :  { %v6281_v8 = vpop.eup %6280 }
 0x6ce   :  { %v1575_v9 = vmul.f32 %v6281_v8, %v6277_v0 }
 0x6d0   :  { %5867 = vmatmul.mubr.msk.f32.vlgmr.msra.gmra.mxu0 %vm969_vm9, %v1575_v9 }
 0x6d1   :  { %5870 = vmatpush3.msra.mxu0 %v381_v3 }
 0x6d2   :  { %5871 = vmatprep.subr.mxu0 %v380_v11 }
 0x6d3   :  { %5872 = vmatpush3.msra.mxu0 %v380_v11 }
 0x6d4   :  { %5873 = vmatprep.subr.mxu0 %v379_v12 }
 0x6d5   :  { %5874 = vmatpush3.msra.mxu0 %v379_v12  ;;  %v7410_v12 = vld [vmem:[#allocation10 + $0x8] sm:$0xff] }
 0x6d6   :  { %5875 = vmatprep.subr.mxu0 %v378_v43 }
 0x6d7   :  { %5876 = vmatpush3.msra.mxu0 %v378_v43 }
 0x6d8   :  { %5891 = vmatprep.subr.msk.mxu0 %vm881_vm1, %v7321_v13 }
 0x790   :  { %v5868_v14 = vpop.f32.mrf.mxu0 }
 0x791   :  { %v1658_v17 = vadd.f32 %v5868_v14, %v1462_v39 }
 0x792   :  { %v1648_v15 = vpop.f32.mrf.mxu0 }
 0x793   :  { %v1657_v16 = vadd.f32 %v1648_v15, %v1461_v44  ;;  %v7413_v15 = vld [vmem:[#allocation10] sm:$0xff] }
 0x795   :  { %5877 = vmatprep.mubr.msk.f32.mxu0 %vm443_vm0, %v1657_v16 }
 0x796   :  { %5878 = vmatmul.mubr.msk.f32.vlgmr.msra.gmra.mxu0 %vm443_vm0, %v1658_v17 }
 0x797   :  { %5892 = vmatpush3.xpose.msk.msra.mxu0 %vm881_vm1, %v7321_v13 }
 0x798   :  { %5893 = vmatprep.subr.msk.mxu0 %vm881_vm1, %v7139_v35 }
 0x79b   :  { %5894 = vmatpush3.xpose.msk.msra.mxu0 %vm881_vm1, %v7139_v35 }
 0x79c   :  { %5905 = vmatprep.subr.msk.mxu0 %vm7202_vm6, %v7333_v32 }
 0x856   :  { %v5879_v45 = vpop.f32.mrf.mxu0 }
 0x857   :  { %v1743_v19 = vadd.f32 %v5879_v45, %v5381_v33 }
 0x858   :  { %v1737_v21 = vpop.f32.mrf.mxu0 }
 0x859   :  { %v1738_v23 = vadd.f32 %v5381_v33, %v1737_v21  ;;  %v1747_v24 = vadd.f32 %v1743_v19, %v7110_v22 }
 0x85b   :  { %v1751_v25 = vsel %vm443_vm0, %v1747_v24, 0.0  ;;  %v1746_v26 = vadd.f32 %v1738_v23, %v7108_v20 }
 0x85c   :  { %1752 = vadd.xlane.f32.xlu0 %v1751_v25 }
 0x85d   :  { %v1748_v41 = vsel %vm443_vm0, %v1746_v26, 0.0 }
 0x85e   :  { %1749 = vadd.xlane.f32.xlu1 %v1748_v41 }
 0x8e5   :  { %v1753_v27 = vpop.xlane.xlu0 %1752 }
 0x8e6   :  { %v1756_v28 = vmul.f32 0.03125, %v1753_v27 }
 0x8e7   :  { %v1750_v2 = vpop.xlane.xlu1 %1749 }
 0x8e8   :  { %v1758_v4 = vsub.f32 %v1747_v24, %v1756_v28  ;;  %v1755_v29 = vmul.f32 0.03125, %v1750_v2 }
 0x8ea   :  { %v1757_v30 = vsub.f32 %v1746_v26, %v1755_v29  ;;  %v1760_v31 = vmul.f32 %v1758_v4, %v1758_v4 }
 0x8ec   :  { %v1764_v22 = vsel %vm443_vm0, %v1760_v31, 0.0  ;;  %v1759_v34 = vmul.f32 %v1757_v30, %v1757_v30 }
 0x8ed   :  { %1765 = vadd.xlane.f32.xlu0 %v1764_v22 }
 0x8ee   :  { %v1761_v20 = vsel %vm443_vm0, %v1759_v34, 0.0 }
 0x8ef   :  { %1762 = vadd.xlane.f32.xlu1 %v1761_v20 }
 0x900   :  { %1995 = vrot.lane.b32.xlu1 %v7321_v13, %s6886_s29 }
 0x903   :  { %1993 = vrot.lane.b32.xlu0 %v7139_v35, %s6886_s29 }
 0x976   :  { %v1766_v39 = vpop.xlane.xlu0 %1765 }
 0x977   :  { %v1768_v40 = vmul.f32 0.03125, %v1766_v39 }
 0x978   :  { %v1763_v44 = vpop.xlane.xlu1 %1762 }
 0x979   :  { %v1770_v47 = vadd.f32 1e-05, %v1768_v40  ;;  %v1767_v48 = vmul.f32 0.03125, %v1763_v44 }
 0x97a   :  { %v7364_v0 = vpop.permute.xlu0 %1993 }
 0x97b   :  { %6282 = vrsqrt.f32 %v1770_v47  ;;  %v1769_v50 = vadd.f32 1e-05, %v1767_v48 }
 0x97c   :  { %v7350_v52 = vpop.permute.xlu1 %1995 }
 0x97d   :  { %6284 = vrsqrt.f32 %v1769_v50  ;;  %5898 = vmatprep.subr.msk.mxu1 %vm881_vm1, %v7350_v52 }
 0x988   :  { %v6283_v53 = vpop.eup %6282 }
 0x989   :  { %v1774_v55 = vmul.f32 %v6283_v53, %v1758_v4 }
 0x98a   :  { %v6285_v56 = vpop.eup %6284 }
 0x98b   :  { %v1773_v57 = vmul.f32 %v6285_v56, %v1757_v30  ;;  %v1782_v58 = vmul.f32 %v5384_v54, %v1774_v55 }
 0x98d   :  { %v1781_v60 = vmul.f32 %v5384_v54, %v1773_v57  ;;  %v7358_v6 = vadd.f32 %v5385_v59, %v1782_v58 }
 0x98f   :  { %v7356_v62 = vadd.f32 %v5385_v59, %v1781_v60 }
 0x991   :  { %5888 = vmatprep.mubr.msk.f32.mxu1 %vm443_vm0, %v7356_v62 }
 0x992   :  { %5889 = vmatmul.mubr.msk.f32.vlgmr.msra.gmra.mxu1 %vm443_vm0, %v7358_v6 }
 0x993   :  { %5899 = vmatpush3.xpose.msk.msra.mxu1 %vm881_vm1, %v7350_v52 }
 0x994   :  { %5900 = vmatprep.subr.msk.mxu1 %vm881_vm1, %v7364_v0 }
 0x997   :  { %5901 = vmatpush3.xpose.msk.msra.mxu1 %vm881_vm1, %v7364_v0 }
 0x998   :  { %5912 = vmatprep.subr.msk.mxu1 %vm426_vm8, %v7333_v32 }
 0xa52   :  { %v5890_v3 = vpop.f32.mrf.mxu1 }
 0xa53   :  { %v1875_v5 = vadd.f32 %v5890_v3, %v5386_v10 }
 0xa54   :  { %v1869_v7 = vpop.f32.mrf.mxu1 }
 0xa55   :  { %v1870_v49 = vadd.f32 %v5386_v10, %v1869_v7  ;;  %v7377_v8 = vmul.f32 0.35355338, %v1875_v5 }
 0xa57   :  { %v7375_v51 = vmul.f32 0.35355338, %v1870_v49 }
 0xa59   :  { %1989 = vrot.lane.b32.xlu1 %v7375_v51, %s6886_s29  ;;  %5895 = vmatprep.mubr.msk.f32.mxu0 %vm881_vm1, %v7375_v51 }
 0xa5a   :  { %5896 = vmatmul.mubr.msk.f32.vlgmr.msra.gmra.mxu0 %vm881_vm1, %v7377_v8 }
 0xa5b   :  { %5906 = vmatpush3.msk.msra.mxu0 %vm7202_vm6, %v7333_v32 }
 0xa5c   :  { %5907 = vmatprep.subr.msk.mxu0 %vm7202_vm6, %v7150_v46 }
 0xa5d   :  { %5908 = vmatpush3.msk.msra.mxu0 %vm7202_vm6, %v7150_v46  ;;  %1991 = vrot.lane.b32.xlu1 %v7377_v8, %s6886_s29 }
 0xacb   :  { %v1990_v9 = vpop.permute.xlu1 %1989 }
 0xacc   :  { %5902 = vmatprep.mubr.msk.f32.mxu1 %vm881_vm1, %v1990_v9 }
 0xacf   :  { %v1992_v11 = vpop.permute.xlu1 %1991 }
 0xad0   :  { %5903 = vmatmul.mubr.msk.f32.vlgmr.msra.gmra.mxu1 %vm881_vm1, %v1992_v11 }
 0xad1   :  { %5913 = vmatpush3.msk.msra.mxu1 %vm426_vm8, %v7333_v32 }
 0xad2   :  { %5914 = vmatprep.subr.msk.mxu1 %vm426_vm8, %v7150_v46 }
 0xad3   :  { %5915 = vmatpush3.msk.msra.mxu1 %vm426_vm8, %v7150_v46 }
 0xad4   :  { %5926 = vmatprep.subr.msk.mxu1 %vm7280_vm12, %v7333_v32 }
 0xb1a   :  { %v5897_v19 = vpop.f32.mrf.mxu0 }
 0xb1b   :  { %v1964_v21 = vadd.f32 %v5897_v19, %v7410_v12 }
 0xb1c   :  { %v1958_v31 = vpop.f32.mrf.mxu0 }
 0xb1d   :  { %v1970_v23 = vsel %vm969_vm9, %v1964_v21, -inf  ;;  %v1959_v22 = vadd.f32 %v1958_v31, %v7413_v15 }
 0xb1f   :  { %v1967_v34 = vsel %vm969_vm9, %v1959_v22, -inf }
 0xb90   :  { %v5904_v43 = vpop.f32.mrf.mxu1 }
 0xb91   :  { %v2077_v14 = vadd.f32 %v5904_v43, %v7410_v12 }
 0xb92   :  { %v2071_v16 = vpop.f32.mrf.mxu1 }
 0xb93   :  { %v2072_v17 = vadd.f32 %v2071_v16, %v7413_v15  ;;  %v2083_v33 = vsel %vm969_vm9, %v2077_v14, -inf }
 0xb94   :  { %2084 = vmax.xlane.f32.xlu1 %v2083_v33 }
 0xb95   :  { %v2080_v45 = vsel %vm969_vm9, %v2072_v17, -inf }
 0xb96   :  { %2081 = vmax.xlane.f32.xlu0 %v2080_v45 }
 0xba5   :  { %2270 = vrot.lane.b32.xlu1 %v7321_v13, %s6887_s11 }
 0xba9   :  { %2264 = vrot.lane.b32.xlu1 %v7375_v51, %s6887_s11 }
 0xbad   :  { %2266 = vrot.lane.b32.xlu1 %v7377_v8, %s6887_s11 }
 0xbd1   :  { %1971 = vmax.xlane.f32.xlu1 %v1970_v23 }
 0xc1d   :  { %v2085_v24 = vpop.xlane.xlu1 %2084 }
 0xc1e   :  { %v2087_v25 = vsub.f32 %v2077_v14, %v2085_v24 }
 0xc1f   :  { %v2082_v26 = vpop.xlane.xlu0 %2081 }
 0xc20   :  { %v2086_v41 = vsub.f32 %v2072_v17, %v2082_v26  ;;  %v2090_v27 = vmul.f32 1.442695, %v2087_v25 }
 0xc21   :  { %v7426_v42 = vpop.permute.xlu1 %2270 }
 0xc22   :  { %v2088_v28 = vmul.f32 1.442695, %v2086_v41  ;;  %5919 = vmatprep.subr.msk.mxu0 %vm881_vm1, %v7426_v42 }
 0xc24   :  { %6286 = vpow2.f32 %v2088_v28 }
 0xc25   :  { %6288 = vpow2.f32 %v2090_v27  ;;  %v2265_v44 = vpop.permute.xlu1 %2264 }
 0xc29   :  { %v2267_v48 = vpop.permute.xlu1 %2266 }
 0xc31   :  { %v6287_v2 = vpop.eup %6286 }
 0xc32   :  { %v2092_v4 = vsel %vm969_vm9, %v6287_v2, 0.0  ;;  %v6289_v29 = vpop.eup %6288 }
 0xc33   :  { %2093 = vadd.xlane.f32.xlu0 %v2092_v4  ;;  %v2095_v30 = vsel %vm969_vm9, %v6289_v29, 0.0 }
 0xc37   :  { %2096 = vadd.xlane.f32.xlu0 %v2095_v30 }
 0xc4d   :  { %2268 = vrot.lane.b32.xlu0 %v7139_v35, %s6887_s11 }
 0xc5a   :  { %v1972_v57 = vpop.xlane.xlu1 %1971 }
 0xc5b   :  { %v1974_v58 = vsub.f32 %v1964_v21, %v1972_v57 }
 0xc5d   :  { %v1977_v59 = vmul.f32 1.442695, %v1974_v58 }
 0xc6c   :  { %1968 = vmax.xlane.f32.xlu0 %v1967_v34 }
 0xcbc   :  { %v2094_v20 = vpop.xlane.xlu0 %2093 }
 0xcbd   :  { %6290 = vrcp.f32 %v2094_v20 }
 0xcc0   :  { %v2097_v36 = vpop.xlane.xlu0 %2096 }
 0xcc1   :  { %6292 = vrcp.f32 %v2097_v36 }
 0xcc4   :  { %v7438_v47 = vpop.permute.xlu0 %2268 }
 0xcca   :  { %v6291_v37 = vpop.eup %6290 }
 0xccb   :  { %v2100_v38 = vmul.f32 %v6291_v37, %v6287_v2 }
 0xccd   :  { %5909 = vmatprep.mubr.msk.f32.mxu0 %vm969_vm9, %v2100_v38 }
 0xcce   :  { %v6293_v39 = vpop.eup %6292 }
 0xccf   :  { %v2101_v40 = vmul.f32 %v6293_v39, %v6289_v29 }
 0xcd1   :  { %5910 = vmatmul.mubr.msk.f32.vlgmr.msra.gmra.mxu0 %vm969_vm9, %v2101_v40 }
 0xcd2   :  { %5920 = vmatpush3.xpose.msk.msra.mxu0 %vm881_vm1, %v7426_v42  ;;  %5923 = vmatprep.mubr.msk.f32.mxu0 %vm881_vm1, %v2265_v44 }
 0xcd3   :  { %5921 = vmatprep.subr.msk.mxu0 %vm881_vm1, %v7438_v47 }
 0xcd6   :  { %5922 = vmatpush3.xpose.msk.msra.mxu0 %vm881_vm1, %v7438_v47 }
 0xcd7   :  { %5940 = vmatprep.subr.msk.mxu0 %vm7206_vm7, %v7333_v32 }
 0xcd9   :  { %5924 = vmatmul.mubr.msk.f32.vlgmr.msra.gmra.mxu0 %vm881_vm1, %v2267_v48 }
 0xcda   :  { %5941 = vmatpush3.msk.msra.mxu0 %vm7206_vm7, %v7333_v32 }
 0xcdb   :  { %5942 = vmatprep.subr.msk.mxu0 %vm7206_vm7, %v7150_v46 }
 0xcdc   :  { %5943 = vmatpush3.msk.msra.mxu0 %vm7206_vm7, %v7150_v46 }
 0xcf5   :  { %v1969_v50 = vpop.xlane.xlu0 %1968 }
 0xcf6   :  { %v1973_v53 = vsub.f32 %v1959_v22, %v1969_v50 }
 0xcf8   :  { %v1975_v54 = vmul.f32 1.442695, %v1973_v53 }
 0xcfa   :  { %6294 = vpow2.f32 %v1975_v54 }
 0xd07   :  { %v6295_v55 = vpop.eup %6294 }
 0xd08   :  { %v1979_v56 = vsel %vm969_vm9, %v6295_v55, 0.0 }
 0xd09   :  { %1980 = vadd.xlane.f32.xlu1 %v1979_v56 }
 0xd1a   :  { %2466 = vrot.lane.b32.xlu1 %v7321_v13, %s6888_s5 }
 0xd1e   :  { %2460 = vrot.lane.b32.xlu1 %v7375_v51, %s6888_s5 }
 0xd91   :  { %v7465_v10 = vpop.f32.mrf.mxu0 }
 0xd92   :  { %v1981_v60 = vpop.xlane.xlu1 %1980 }
 0xd93   :  { %6296 = vrcp.f32 %v1981_v60  ;;  %v7467_v3 = vpop.f32.mrf.mxu0 }
 0xd94   :  { %6298 = vpow2.f32 %v1977_v59 }
 0xd96   :  { %v7484_v29 = vpop.permute.xlu1 %2466 }
 0xd99   :  { %v5925_v5 = vpop.f32.mrf.mxu0 }
 0xd9a   :  { %v2352_v9 = vadd.f32 %v5925_v5, %v7410_v12  ;;  %v2461_v30 = vpop.permute.xlu1 %2460 }
 0xd9b   :  { %v2346_v7 = vpop.f32.mrf.mxu0 }
 0xd9c   :  { %v2347_v49 = vadd.f32 %v2346_v7, %v7413_v15  ;;  %v2358_v14 = vsel %vm969_vm9, %v2352_v9, -inf }
 0xd9e   :  { %v2355_v11 = vsel %vm969_vm9, %v2347_v49, -inf }
 0xd9f   :  { %2356 = vmax.xlane.f32.xlu0 %v2355_v11 }
 0xda0   :  { %v6297_v51 = vpop.eup %6296 }
 0xda1   :  { %v1987_v43 = vmul.f32 %v6297_v51, %v6295_v55  ;;  %v6299_v16 = vpop.eup %6298 }
 0xda2   :  { %v1982_v17 = vsel %vm969_vm9, %v6299_v16, 0.0 }
 0xda3   :  { %2359 = vmax.xlane.f32.xlu0 %v2358_v14  ;;  %5916 = vmatprep.mubr.msk.f32.mxu1 %vm969_vm9, %v1987_v43  ;;  %v401_v43 = vld [vmem:[%s7989_s15 + $0x18] sm:$0xff] }
 0xda4   :  { %5947 = vmatprep.subr.mxu0 %v401_v43 }
 0xda7   :  { %1983 = vadd.xlane.f32.xlu0 %v1982_v17 }
 0xe28   :  { %v2357_v33 = vpop.xlane.xlu0 %2356 }
 0xe29   :  { %v2361_v45 = vsub.f32 %v2347_v49, %v2357_v33 }
 0xe2b   :  { %v2363_v19 = vmul.f32 1.442695, %v2361_v45 }
 0xe2c   :  { %v2360_v21 = vpop.xlane.xlu0 %2359 }
 0xe2d   :  { %6300 = vpow2.f32 %v2363_v19  ;;  %v2362_v23 = vsub.f32 %v2352_v9, %v2360_v21  ;;  %v400_v21 = vld [vmem:[%s7989_s15 + $0x10] sm:$0xff] }
 0xe2f   :  { %v2365_v24 = vmul.f32 1.442695, %v2362_v23  ;;  %v399_v23 = vld [vmem:[%s7989_s15 + $0x8] sm:$0xff] }
 0xe30   :  { %v1984_v25 = vpop.xlane.xlu0 %1983 }
 0xe31   :  { %6302 = vpow2.f32 %v2365_v24  ;;  %v398_v24 = vld [vmem:[%s7989_s15] sm:$0xff] }
 0xe32   :  { %6304 = vrcp.f32 %v1984_v25 }
 0xe3a   :  { %v6301_v26 = vpop.eup %6300 }
 0xe3b   :  { %v2367_v41 = vsel %vm969_vm9, %v6301_v26, 0.0 }
 0xe3c   :  { %2368 = vadd.xlane.f32.xlu1 %v2367_v41 }
 0xe3e   :  { %v6303_v27 = vpop.eup %6302 }
 0xe3f   :  { %v6305_v28 = vpop.eup %6304  ;;  %v2370_v2 = vsel %vm969_vm9, %v6303_v27, 0.0 }
 0xe40   :  { %2371 = vadd.xlane.f32.xlu0 %v2370_v2  ;;  %v1988_v4 = vmul.f32 %v6305_v28, %v6299_v16 }
 0xe42   :  { %5917 = vmatmul.mubr.msk.f32.vlgmr.msra.gmra.mxu1 %vm969_vm9, %v1988_v4  ;;  %v5421_v4 = vld [vmem:[%s7990_s16] ss:$0 sm:$0xff] }
 0xe43   :  { %5927 = vmatpush3.msk.msra.mxu1 %vm7280_vm12, %v7333_v32 }
 0xe44   :  { %5928 = vmatprep.subr.msk.mxu1 %vm7280_vm12, %v7150_v46 }
 0xe45   :  { %5929 = vmatpush3.msk.msra.mxu1 %vm7280_vm12, %v7150_v46 }
 0xe46   :  { %5933 = vmatprep.subr.msk.mxu1 %vm881_vm1, %v7484_v29 }
 0xe4d   :  { %2462 = vrot.lane.b32.xlu1 %v7377_v8, %s6888_s5 }
 0xe56   :  { %2464 = vrot.lane.b32.xlu0 %v7139_v35, %s6888_s5 }
 0xec5   :  { %v2369_v31 = vpop.xlane.xlu1 %2368 }
 0xec6   :  { %6306 = vrcp.f32 %v2369_v31 }
 0xec9   :  { %v2372_v22 = vpop.xlane.xlu0 %2371  ;;  %v2463_v8 = vpop.permute.xlu1 %2462 }
 0xeca   :  { %6308 = vrcp.f32 %v2372_v22 }
 0xecd   :  { %v7497_v38 = vpop.permute.xlu0 %2464 }
 0xed3   :  { %v6307_v34 = vpop.eup %6306 }
 0xed4   :  { %v2375_v20 = vmul.f32 %v6307_v34, %v6301_v26 }
 0xed6   :  { %5930 = vmatprep.mubr.msk.f32.mxu1 %vm969_vm9, %v2375_v20 }
 0xed7   :  { %v6309_v36 = vpop.eup %6308 }
 0xed8   :  { %v2376_v37 = vmul.f32 %v6309_v36, %v6303_v27 }
 0xeda   :  { %5931 = vmatmul.mubr.msk.f32.vlgmr.msra.gmra.mxu1 %vm969_vm9, %v2376_v37 }
 0xedb   :  { %5934 = vmatpush3.xpose.msk.msra.mxu1 %vm881_vm1, %v7484_v29  ;;  %5937 = vmatprep.mubr.msk.f32.mxu1 %vm881_vm1, %v2461_v30 }
 0xedc   :  { %5935 = vmatprep.subr.msk.mxu1 %vm881_vm1, %v7497_v38 }
 0xedf   :  { %5936 = vmatpush3.xpose.msk.msra.mxu1 %vm881_vm1, %v7497_v38 }
 0xee2   :  { %5938 = vmatmul.mubr.msk.f32.vlgmr.msra.gmra.mxu1 %vm881_vm1, %v2463_v8 }
 0xf02   :  { %v5918_v39 = vpop.f32.mrf.mxu1 }
 0xf03   :  { %v2261_v44 = vadd.f32 %v5918_v39, %v7465_v10 }
 0xf04   :  { %v2255_v40 = vpop.f32.mrf.mxu1 }
 0xf05   :  { %v2256_v25 = vadd.f32 %v2255_v40, %v7467_v3 }
 0xf9a   :  { %v5932_v48 = vpop.f32.mrf.mxu1 }
 0xf9b   :  { %v2459_v50 = vadd.f32 %v5932_v48, %v2261_v44 }
 0xf9c   :  { %v2449_v53 = vpop.f32.mrf.mxu1 }
 0xf9d   :  { %v2458_v41 = vadd.f32 %v2449_v53, %v2256_v25  ;;  %v6403_v25 = vld [vmem:[%s7978_s14 + $0x10] sm:$0xff] }
 0xfa2   :  { %v5939_v54 = vpop.f32.mrf.mxu1 }
 0xfa3   :  { %v2548_v55 = vadd.f32 %v5939_v54, %v7410_v12 }
 0xfa4   :  { %v2542_v56 = vpop.f32.mrf.mxu1 }
 0xfa5   :  { %v2543_v57 = vadd.f32 %v2542_v56, %v7413_v15  ;;  %v2554_v58 = vsel %vm969_vm9, %v2548_v55, -inf  ;;  %v411_v56 = vld [vmem:[#allocation28 + $0x10] sm:$0xff] }
 0xfa6   :  { %2555 = vmax.xlane.f32.xlu1 %v2554_v58  ;;  %v409_v58 = vld [vmem:[#allocation28] sm:$0xff] }
 0xfa7   :  { %v2551_v59 = vsel %vm969_vm9, %v2543_v57, -inf }
 0xfa8   :  { %2552 = vmax.xlane.f32.xlu0 %v2551_v59  ;;  %v421_v59 = vld [vmem:[%s7043_s4 + $0x38] sm:$0xff] }
0x102f   :  { %v2556_v60 = vpop.xlane.xlu1 %2555 }
0x1030   :  { %v2558_v5 = vsub.f32 %v2548_v55, %v2556_v60  ;;  %v420_v60 = vld [vmem:[%s7043_s4 + $0x30] sm:$0xff] }
0x1031   :  { %v2553_v7 = vpop.xlane.xlu0 %2552 }
0x1032   :  { %v2557_v10 = vsub.f32 %v2543_v57, %v2553_v7  ;;  %v2561_v49 = vmul.f32 1.442695, %v2558_v5  ;;  %v410_v57 = vld [vmem:[#allocation28 + $0x8] sm:$0xff]  ;;  %v6402_v5 = vld [vmem:[%s7978_s14 + $0x18] sm:$0xff] }
0x1033   :  { %v419_v7 = vld [vmem:[%s7043_s4 + $0x28] sm:$0xff] }
0x1034   :  { %v2559_v9 = vmul.f32 1.442695, %v2557_v10  ;;  %v418_v10 = vld [vmem:[%s7043_s4 + $0x20] sm:$0xff] }
0x1036   :  { %6310 = vpow2.f32 %v2559_v9 }
0x1037   :  { %6312 = vpow2.f32 %v2561_v49 }
0x1043   :  { %v6311_v11 = vpop.eup %6310 }
0x1044   :  { %v2563_v12 = vsel %vm969_vm9, %v6311_v11, 0.0  ;;  %v6313_v51 = vpop.eup %6312 }
0x1045   :  { %2564 = vadd.xlane.f32.xlu0 %v2563_v12  ;;  %v2566_v15 = vsel %vm969_vm9, %v6313_v51, 0.0 }
0x1049   :  { %2567 = vadd.xlane.f32.xlu0 %v2566_v15 }
0x10ce   :  { %v2565_v14 = vpop.xlane.xlu0 %2564 }
0x10cf   :  { %6314 = vrcp.f32 %v2565_v14 }
0x10d2   :  { %v2568_v16 = vpop.xlane.xlu0 %2567 }
0x10d3   :  { %6316 = vrcp.f32 %v2568_v16  ;;  %v5424_v16 = vld [vmem:[%s7991_s18] ss:$0 sm:$0xff] }
0x10dc   :  { %v6315_v17 = vpop.eup %6314 }
0x10dd   :  { %v2571_v33 = vmul.f32 %v6315_v17, %v6311_v11 }
0x10df   :  { %5944 = vmatprep.mubr.msk.f32.mxu0 %vm969_vm9, %v2571_v33 }
0x10e0   :  { %v6317_v45 = vpop.eup %6316 }
0x10e1   :  { %v2572_v19 = vmul.f32 %v6317_v45, %v6313_v51 }
0x10e3   :  { %5945 = vmatmul.mubr.msk.f32.vlgmr.msra.gmra.mxu0 %vm969_vm9, %v2572_v19  ;;  %v5425_v19 = vld [vmem:[%s7992_s9] ss:$0 sm:$0xff] }
0x10e4   :  { %5948 = vmatpush3.msra.mxu0 %v401_v43 }
0x10e5   :  { %5949 = vmatprep.subr.mxu0 %v400_v21 }
0x10e6   :  { %5950 = vmatpush3.msra.mxu0 %v400_v21 }
0x10e7   :  { %5951 = vmatprep.subr.mxu0 %v399_v23 }
0x10e8   :  { %5952 = vmatpush3.msra.mxu0 %v399_v23 }
0x10e9   :  { %5953 = vmatprep.subr.mxu0 %v398_v24 }
0x10ea   :  { %5954 = vmatpush3.msra.mxu0 %v398_v24 }
0x10eb   :  { %5969 = vmatprep.subr.mxu0 %v421_v59 }
0x11a3   :  { %v5946_v26 = vpop.f32.mrf.mxu0 }
0x11a4   :  { %v2655_v2 = vadd.f32 %v5946_v26, %v2459_v50  ;;  %v6404_v26 = vld [vmem:[%s7978_s14 + $0x8] sm:$0xff] }
0x11a5   :  { %v2645_v27 = vpop.f32.mrf.mxu0 }
0x11a6   :  { %v2654_v28 = vadd.f32 %v2645_v27, %v2458_v41  ;;  %v6405_v41 = vld [vmem:[%s7978_s14] sm:$0xff]  ;;  %v7543_v27 = vld [vmem:[%s7979_s7 + $0x18] sm:$0xff] }
0x11a8   :  { %5955 = vmatprep.mubr.msk.f32.mxu0 %vm443_vm0, %v2654_v28  ;;  %v417_v28 = vld [vmem:[%s7043_s4 + $0x18] sm:$0xff] }
0x11a9   :  { %5956 = vmatmul.mubr.msk.f32.vlgmr.msra.gmra.mxu0 %vm443_vm0, %v2655_v2  ;;  %v416_v2 = vld [vmem:[%s7043_s4 + $0x10] sm:$0xff] }
0x11aa   :  { %5970 = vmatpush3.msra.mxu0 %v421_v59 }
0x11ab   :  { %5971 = vmatprep.subr.mxu0 %v420_v60 }
0x11ac   :  { %5972 = vmatpush3.msra.mxu0 %v420_v60 }
0x11ad   :  { %5973 = vmatprep.subr.mxu0 %v419_v7 }
0x11ae   :  { %5974 = vmatpush3.msra.mxu0 %v419_v7 }
0x11af   :  { %5975 = vmatprep.subr.mxu0 %v418_v10 }
0x11b0   :  { %5976 = vmatpush3.msra.mxu0 %v418_v10 }
0x11b1   :  { %5977 = vmatprep.subr.mxu0 %v417_v28 }
0x11b2   :  { %5978 = vmatpush3.msra.mxu0 %v417_v28 }
0x11b3   :  { %5979 = vmatprep.subr.mxu0 %v416_v2 }
0x11b4   :  { %5980 = vmatpush3.msra.mxu0 %v416_v2  ;;  %v6411_v2 = vld [vmem:[%s7979_s7 + $0x10] sm:$0xff] }
0x1269   :  { %v5957_v30 = vpop.f32.mrf.mxu0 }
0x126a   :  { %v2740_v31 = vadd.f32 %v5957_v30, %v5421_v4  ;;  %v414_v30 = vld [vmem:[%s7043_s4] sm:$0xff] }
0x126b   :  { %v2734_v22 = vpop.f32.mrf.mxu0 }
0x126c   :  { %v2735_v34 = vadd.f32 %v5421_v4, %v2734_v22  ;;  %v2744_v20 = vadd.f32 %v2740_v31, %v7358_v6  ;;  %v415_v4 = vld [vmem:[%s7043_s4 + $0x8] sm:$0xff]  ;;  %v6407_v31 = vld [vmem:[%s7980_s10 + $0x18] sm:$0xff]  ;;  %v5426_v22 = vld [vmem:[%s7038_s25] ss:$0 sm:$0xff] }
0x126d   :  { %5981 = vmatprep.subr.mxu0 %v415_v4 }
0x126e   :  { %v2748_v36 = vsel %vm443_vm0, %v2744_v20, 0.0  ;;  %v2743_v3 = vadd.f32 %v2735_v34, %v7356_v62  ;;  %v412_v62 = vld [vmem:[#allocation28 + $0x18] sm:$0xff]  ;;  %5982 = vmatpush3.msra.mxu0 %v415_v4  ;;  %v6412_v4 = vld [vmem:[%s7979_s7 + $0x8] sm:$0xff] }
0x126f   :  { %2749 = vadd.xlane.f32.xlu0 %v2748_v36  ;;  %5958 = vmatprep.subr.mxu1 %v412_v62 }
0x1270   :  { %v2745_v37 = vsel %vm443_vm0, %v2743_v3, 0.0  ;;  %5959 = vmatpush3.msra.mxu1 %v412_v62  ;;  %5983 = vmatprep.subr.mxu0 %v414_v30 }
0x1271   :  { %2746 = vadd.xlane.f32.xlu1 %v2745_v37  ;;  %5960 = vmatprep.subr.mxu1 %v411_v56 }
0x1272   :  { %5961 = vmatpush3.msra.mxu1 %v411_v56  ;;  %5984 = vmatpush3.msra.mxu0 %v414_v30  ;;  %v6413_v30 = vld [vmem:[%s7979_s7] sm:$0xff] }
0x1273   :  { %5962 = vmatprep.subr.mxu1 %v410_v57  ;;  %6010 = vmatprep.subr.mxu0 %v6407_v31 }
0x1274   :  { %5963 = vmatpush3.msra.mxu1 %v410_v57 }
0x1275   :  { %5964 = vmatprep.subr.mxu1 %v409_v58 }
0x1276   :  { %5965 = vmatpush3.msra.mxu1 %v409_v58 }
0x1277   :  { %5988 = vmatprep.subr.mxu1 %v6402_v5 }
0x12f8   :  { %v2750_v8 = vpop.xlane.xlu0 %2749 }
0x12f9   :  { %v2752_v39 = vmul.f32 0.03125, %v2750_v8 }
0x12fa   :  { %v2747_v40 = vpop.xlane.xlu1 %2746 }
0x12fb   :  { %v2754_v44 = vsub.f32 %v2744_v20, %v2752_v39  ;;  %v2751_v48 = vmul.f32 0.03125, %v2747_v40  ;;  %v6408_v39 = vld [vmem:[%s7980_s10 + $0x10] sm:$0xff]  ;;  %v6409_v40 = vld [vmem:[%s7980_s10 + $0x8] sm:$0xff] }
0x12fd   :  { %v2753_v50 = vsub.f32 %v2743_v3, %v2751_v48  ;;  %v2756_v53 = vmul.f32 %v2754_v44, %v2754_v44  ;;  %v5429_v48 = vld [vmem:[%s7048_s20] ss:$0 sm:$0xff] }
0x12ff   :  { %v2760_v54 = vsel %vm443_vm0, %v2756_v53, 0.0  ;;  %v2755_v55 = vmul.f32 %v2753_v50, %v2753_v50 }
0x1300   :  { %2761 = vadd.xlane.f32.xlu0 %v2760_v54 }
0x1301   :  { %v2757_v6 = vsel %vm443_vm0, %v2755_v55, 0.0 }
0x1302   :  { %2758 = vadd.xlane.f32.xlu1 %v2757_v6 }
0x1389   :  { %v2762_v49 = vpop.xlane.xlu0 %2761 }
0x138a   :  { %v2764_v9 = vmul.f32 0.03125, %v2762_v49 }
0x138b   :  { %v2759_v11 = vpop.xlane.xlu1 %2758 }
0x138c   :  { %v2766_v12 = vadd.f32 1e-05, %v2764_v9  ;;  %v2763_v51 = vmul.f32 0.03125, %v2759_v11 }
0x138e   :  { %6318 = vrsqrt.f32 %v2766_v12  ;;  %v2765_v15 = vadd.f32 1e-05, %v2763_v51 }
0x1390   :  { %6320 = vrsqrt.f32 %v2765_v15 }
0x139b   :  { %v6319_v43 = vpop.eup %6318 }
0x139c   :  { %v2770_v14 = vmul.f32 %v6319_v43, %v2754_v44  ;;  %v6410_v44 = vld [vmem:[%s7980_s10] sm:$0xff] }
0x139d   :  { %v6321_v17 = vpop.eup %6320 }
0x139e   :  { %v2769_v33 = vmul.f32 %v6321_v17, %v2753_v50  ;;  %v2778_v45 = vmul.f32 %v5424_v16, %v2770_v14 }
0x13a0   :  { %v2777_v21 = vmul.f32 %v5424_v16, %v2769_v33  ;;  %v2786_v24 = vadd.f32 %v5425_v19, %v2778_v45 }
0x13a2   :  { %v2785_v23 = vadd.f32 %v5425_v19, %v2777_v21  ;;  %v5432_v19 = vld [vmem:[%s7993_s21] ss:$0 sm:$0xff] }
0x13a4   :  { %5966 = vmatprep.mubr.msk.f32.mxu1 %vm443_vm0, %v2785_v23 }
0x13a5   :  { %5967 = vmatmul.mubr.msk.f32.vlgmr.msra.gmra.mxu1 %vm443_vm0, %v2786_v24 }
0x13a6   :  { %5989 = vmatpush3.msra.mxu1 %v6402_v5 }
0x13a7   :  { %5990 = vmatprep.subr.mxu1 %v6403_v25 }
0x13a8   :  { %5991 = vmatpush3.msra.mxu1 %v6403_v25  ;;  %v5433_v25 = vld [vmem:[%s7994_s8] ss:$0 sm:$0xff] }
0x13a9   :  { %5992 = vmatprep.subr.mxu1 %v6404_v26 }
0x13aa   :  { %5993 = vmatpush3.msra.mxu1 %v6404_v26 }
0x13ab   :  { %5994 = vmatprep.subr.mxu1 %v6405_v41 }
0x13ac   :  { %5995 = vmatpush3.msra.mxu1 %v6405_v41 }
0x13ad   :  { %5999 = vmatprep.subr.mxu1 %v7543_v27 }
0x1465   :  { %v5968_v34 = vpop.f32.mrf.mxu1 }
0x1466   :  { %v2871_v20 = vadd.f32 %v5968_v34, %v5426_v22  ;;  %v6414_v34 = vld [vmem:[#allocation11] ss:$0 sm:$0xff] }
0x1467   :  { %v2865_v36 = vpop.f32.mrf.mxu1 }
0x1468   :  { %v2866_v3 = vadd.f32 %v5426_v22, %v2865_v36  ;;  %v2875_v8 = vmax.f32 %v2871_v20, 0.0 }
0x146a   :  { %v2874_v37 = vmax.f32 %v2866_v3, 0.0  ;;  %v6415_v3 = vld [vmem:[#allocation13] ss:$0 sm:$0xff] }
0x146c   :  { %5985 = vmatprep.mubr.msk.f32.mxu0 %vm2882_vm13, %v2874_v37 }
0x146d   :  { %5986 = vmatmul.mubr.msk.f32.vlgmr.msra.gmra.mxu0 %vm2882_vm13, %v2875_v8 }
0x146e   :  { %6011 = vmatpush3.msra.mxu0 %v6407_v31 }
0x146f   :  { %6012 = vmatprep.subr.mxu0 %v6408_v39 }
0x1470   :  { %6013 = vmatpush3.msra.mxu0 %v6408_v39 }
0x1471   :  { %6014 = vmatprep.subr.mxu0 %v6409_v40 }
0x1472   :  { %6015 = vmatpush3.msra.mxu0 %v6409_v40 }
0x1473   :  { %6016 = vmatprep.subr.mxu0 %v6410_v44 }
0x1474   :  { %6017 = vmatpush3.msra.mxu0 %v6410_v44 }
0x152d   :  { %v5987_v50 = vpop.f32.mrf.mxu0 }
0x152e   :  { %v2961_v53 = vadd.f32 %v5987_v50, %v5429_v48 }
0x152f   :  { %v2955_v54 = vpop.f32.mrf.mxu0 }
0x1530   :  { %v2956_v55 = vadd.f32 %v5429_v48, %v2955_v54  ;;  %v2965_v6 = vadd.f32 %v2961_v53, %v2786_v24  ;;  %v6416_v48 = vld [vmem:[#allocation14] ss:$0 sm:$0xff] }
0x1532   :  { %v2969_v62 = vsel %vm443_vm0, %v2965_v6, 0.0  ;;  %v2964_v56 = vadd.f32 %v2956_v55, %v2785_v23 }
0x1533   :  { %2970 = vadd.xlane.f32.xlu0 %v2969_v62 }
0x1534   :  { %v2966_v57 = vsel %vm443_vm0, %v2964_v56, 0.0 }
0x1535   :  { %2967 = vadd.xlane.f32.xlu1 %v2966_v57 }
0x15bc   :  { %v2971_v58 = vpop.xlane.xlu0 %2970 }
0x15bd   :  { %v2973_v59 = vmul.f32 0.03125, %v2971_v58 }
0x15be   :  { %v2968_v60 = vpop.xlane.xlu1 %2967 }
0x15bf   :  { %v2975_v5 = vsub.f32 %v2965_v6, %v2973_v59  ;;  %v2972_v7 = vmul.f32 0.03125, %v2968_v60 }
0x15c1   :  { %v2974_v10 = vsub.f32 %v2964_v56, %v2972_v7  ;;  %v2977_v49 = vmul.f32 %v2975_v5, %v2975_v5  ;;  %v7663_v7 = vld [vmem:[#allocation16 + $0x18] sm:$0xff] }
0x15c3   :  { %v2981_v9 = vsel %vm443_vm0, %v2977_v49, 0.0  ;;  %v2976_v11 = vmul.f32 %v2974_v10, %v2974_v10 }
0x15c4   :  { %2982 = vadd.xlane.f32.xlu0 %v2981_v9  ;;  %v7666_v9 = vld [vmem:[#allocation8 + $0x8] sm:$0xff] }
0x15c5   :  { %v2978_v12 = vsel %vm443_vm0, %v2976_v11, 0.0 }
0x15c6   :  { %2979 = vadd.xlane.f32.xlu1 %v2978_v12 }
0x164d   :  { %v2983_v51 = vpop.xlane.xlu0 %2982 }
0x164e   :  { %v2985_v15 = vmul.f32 0.03125, %v2983_v51 }
0x164f   :  { %v2980_v43 = vpop.xlane.xlu1 %2979 }
0x1650   :  { %v2987_v14 = vadd.f32 1e-05, %v2985_v15  ;;  %v2984_v16 = vmul.f32 0.03125, %v2980_v43  ;;  %v7669_v15 = vld [vmem:[#allocation8] sm:$0xff] }
0x1652   :  { %6322 = vrsqrt.f32 %v2987_v14  ;;  %v2986_v17 = vadd.f32 1e-05, %v2984_v16 }
0x1654   :  { %6324 = vrsqrt.f32 %v2986_v17 }
0x165f   :  { %v6323_v33 = vpop.eup %6322 }
0x1660   :  { %v2991_v45 = vmul.f32 %v6323_v33, %v2975_v5 }
0x1661   :  { %v6325_v21 = vpop.eup %6324 }
0x1662   :  { %v2990_v23 = vmul.f32 %v6325_v21, %v2974_v10  ;;  %v2999_v24 = vmul.f32 %v5432_v19, %v2991_v45 }
0x1664   :  { %v2998_v26 = vmul.f32 %v5432_v19, %v2990_v23  ;;  %v7566_v28 = vadd.f32 %v5433_v25, %v2999_v24 }
0x1666   :  { %v7564_v41 = vadd.f32 %v5433_v25, %v2998_v26 }
0x1668   :  { %5996 = vmatprep.mubr.msk.f32.mxu1 %vm443_vm0, %v7564_v41  ;;  %6018 = vmatprep.mubr.msk.f32.mxu0 %vm443_vm0, %v7564_v41 }
0x1669   :  { %5997 = vmatmul.mubr.msk.f32.vlgmr.msra.gmra.mxu1 %vm443_vm0, %v7566_v28  ;;  %6019 = vmatmul.mubr.msk.f32.vlgmr.msra.gmra.mxu0 %vm443_vm0, %v7566_v28 }
0x166a   :  { %6000 = vmatpush3.msra.mxu1 %v7543_v27  ;;  %6007 = vmatprep.mubr.msk.f32.mxu1 %vm443_vm0, %v7564_v41 }
0x166b   :  { %6001 = vmatprep.subr.mxu1 %v6411_v2 }
0x166c   :  { %6002 = vmatpush3.msra.mxu1 %v6411_v2 }
0x166d   :  { %6003 = vmatprep.subr.mxu1 %v6412_v4 }
0x166e   :  { %6004 = vmatpush3.msra.mxu1 %v6412_v4 }
0x166f   :  { %6005 = vmatprep.subr.mxu1 %v6413_v30 }
0x1670   :  { %6006 = vmatpush3.msra.mxu1 %v6413_v30 }
0x1671   :  { %6008 = vmatmul.mubr.msk.f32.vlgmr.msra.gmra.mxu1 %vm443_vm0, %v7566_v28 }
0x1729   :  { %v5998_v31 = vpop.f32.mrf.mxu1  ;;  %v6020_v40 = vpop.f32.mrf.mxu0 }
0x172a   :  { %v3086_v44 = vadd.f32 %v6414_v34, %v5998_v31  ;;  %v7602_v50 = vadd.f32 %v6416_v48, %v6020_v40 }
0x172b   :  { %v3080_v22 = vpop.f32.mrf.mxu1  ;;  %v3232_v53 = vpop.f32.mrf.mxu0 }
0x172c   :  { %v3081_v20 = vadd.f32 %v6414_v34, %v3080_v22  ;;  %v7608_v54 = vmul.f32 0.35355338, %v3086_v44  ;;  %v7615_v55 = vadd.f32 %v6416_v48, %v3232_v53 }
0x172e   :  { %v7584_v27 = vmul.f32 0.35355338, %v3081_v20 }
0x1730   :  { %6025 = vmatprep.mubr.msk.f32.mxu1 %vm881_vm1, %v7584_v27 }
0x1731   :  { %v6009_v36 = vpop.f32.mrf.mxu1 }
0x1732   :  { %v7588_v37 = vadd.f32 %v6415_v3, %v6009_v36 }
0x1733   :  { %v3157_v8 = vpop.f32.mrf.mxu1 }
0x1734   :  { %v7590_v39 = vadd.f32 %v6415_v3, %v3157_v8  ;;  %3364 = vrot.lane.b32.xlu1 %v7588_v37, %s6886_s29  ;;  %6021 = vmatprep.subr.msk.mxu1 %vm881_vm1, %v7588_v37 }
0x1735   :  { %6022 = vmatpush3.xpose.msk.msra.mxu1 %vm881_vm1, %v7588_v37 }
0x1736   :  { %3362 = vrot.lane.b32.xlu0 %v7590_v39, %s6886_s29  ;;  %6023 = vmatprep.subr.msk.mxu1 %vm881_vm1, %v7590_v39 }
0x1738   :  { %3358 = vrot.lane.b32.xlu1 %v7584_v27, %s6886_s29 }
0x1739   :  { %6024 = vmatpush3.xpose.msk.msra.mxu1 %vm881_vm1, %v7590_v39 }
0x173a   :  { %3639 = vrot.lane.b32.xlu0 %v7588_v37, %s6887_s11  ;;  %6035 = vmatprep.subr.msk.mxu1 %vm7202_vm6, %v7602_v50 }
0x173c   :  { %3360 = vrot.lane.b32.xlu1 %v7608_v54, %s6886_s29  ;;  %6026 = vmatmul.mubr.msk.f32.vlgmr.msra.gmra.mxu1 %vm881_vm1, %v7608_v54 }
0x173d   :  { %6036 = vmatpush3.msk.msra.mxu1 %vm7202_vm6, %v7602_v50 }
0x173e   :  { %3633 = vrot.lane.b32.xlu0 %v7584_v27, %s6887_s11  ;;  %6037 = vmatprep.subr.msk.mxu1 %vm7202_vm6, %v7615_v55 }
0x173f   :  { %6038 = vmatpush3.msk.msra.mxu1 %vm7202_vm6, %v7615_v55 }
0x1740   :  { %3637 = vrot.lane.b32.xlu1 %v7590_v39, %s6887_s11  ;;  %6042 = vmatprep.subr.msk.mxu1 %vm426_vm8, %v7602_v50 }
0x1744   :  { %3635 = vrot.lane.b32.xlu1 %v7608_v54, %s6887_s11 }
0x17a6   :  { %v3365_v6 = vpop.permute.xlu1 %3364 }
0x17a7   :  { %6028 = vmatprep.subr.msk.mxu0 %vm881_vm1, %v3365_v6 }
0x17a8   :  { %6029 = vmatpush3.xpose.msk.msra.mxu0 %vm881_vm1, %v3365_v6  ;;  %v3363_v62 = vpop.permute.xlu0 %3362 }
0x17a9   :  { %6030 = vmatprep.subr.msk.mxu0 %vm881_vm1, %v3363_v62 }
0x17aa   :  { %v3359_v56 = vpop.permute.xlu1 %3358 }
0x17ab   :  { %6032 = vmatprep.mubr.msk.f32.mxu0 %vm881_vm1, %v3359_v56 }
0x17ac   :  { %6031 = vmatpush3.xpose.msk.msra.mxu0 %vm881_vm1, %v3363_v62  ;;  %v3640_v57 = vpop.permute.xlu0 %3639 }
0x17ad   :  { %6049 = vmatprep.subr.msk.mxu0 %vm881_vm1, %v3640_v57 }
0x17ae   :  { %v3361_v58 = vpop.permute.xlu1 %3360 }
0x17af   :  { %6033 = vmatmul.mubr.msk.f32.vlgmr.msra.gmra.mxu0 %vm881_vm1, %v3361_v58 }
0x17b0   :  { %v3634_v59 = vpop.permute.xlu0 %3633  ;;  %6050 = vmatpush3.xpose.msk.msra.mxu0 %vm881_vm1, %v3640_v57 }
0x17b1   :  { %6053 = vmatprep.mubr.msk.f32.mxu0 %vm881_vm1, %v3634_v59 }
0x17b2   :  { %v3638_v60 = vpop.permute.xlu1 %3637 }
0x17b3   :  { %6051 = vmatprep.subr.msk.mxu0 %vm881_vm1, %v3638_v60 }
0x17b4   :  { %6052 = vmatpush3.xpose.msk.msra.mxu0 %vm881_vm1, %v3638_v60 }
0x17b5   :  { %6070 = vmatprep.subr.msk.mxu0 %vm7206_vm7, %v7602_v50 }
0x17b6   :  { %v3636_v5 = vpop.permute.xlu1 %3635 }
0x17b7   :  { %6054 = vmatmul.mubr.msk.f32.vlgmr.msra.gmra.mxu0 %vm881_vm1, %v3636_v5 }
0x17b8   :  { %6071 = vmatpush3.msk.msra.mxu0 %vm7206_vm7, %v7602_v50 }
0x17b9   :  { %6072 = vmatprep.subr.msk.mxu0 %vm7206_vm7, %v7615_v55 }
0x17ba   :  { %6073 = vmatpush3.msk.msra.mxu0 %vm7206_vm7, %v7615_v55 }
0x17bb   :  { %6077 = vmatprep.subr.mxu0 %v7663_v7 }
0x17fc   :  { %v6027_v10 = vpop.f32.mrf.mxu1 }
0x17fd   :  { %v3333_v45 = vadd.f32 %v7666_v9, %v6027_v10 }
0x17fe   :  { %v3327_v12 = vpop.f32.mrf.mxu1 }
0x17ff   :  { %v3328_v16 = vadd.f32 %v7669_v15, %v3327_v12  ;;  %v3339_v26 = vsel %vm969_vm9, %v3333_v45, -inf }
0x1801   :  { %v3336_v19 = vsel %vm969_vm9, %v3328_v16, -inf }
0x186f   :  { %v6034_v49 = vpop.f32.mrf.mxu0 }
0x1870   :  { %v3446_v11 = vadd.f32 %v7666_v9, %v6034_v49 }
0x1871   :  { %v3440_v51 = vpop.f32.mrf.mxu0 }
0x1872   :  { %v3441_v43 = vadd.f32 %v7669_v15, %v3440_v51  ;;  %v3452_v14 = vsel %vm969_vm9, %v3446_v11, -inf }
0x1873   :  { %3453 = vmax.xlane.f32.xlu1 %v3452_v14 }
0x1874   :  { %v3449_v17 = vsel %vm969_vm9, %v3441_v43, -inf }
0x1875   :  { %3450 = vmax.xlane.f32.xlu0 %v3449_v17 }
0x1877   :  { %v6055_v33 = vpop.f32.mrf.mxu0 }
0x1878   :  { %v3721_v24 = vadd.f32 %v7666_v9, %v6055_v33 }
0x1879   :  { %v3715_v21 = vpop.f32.mrf.mxu0  ;;  %3337 = vmax.xlane.f32.xlu0 %v3336_v19 }
0x187a   :  { %v3716_v23 = vadd.f32 %v7669_v15, %v3715_v21  ;;  %v3727_v2 = vsel %vm969_vm9, %v3721_v24, -inf }
0x187c   :  { %v3724_v25 = vsel %vm969_vm9, %v3716_v23, -inf }
0x187d   :  { %3725 = vmax.xlane.f32.xlu1 %v3724_v25  ;;  %3340 = vmax.xlane.f32.xlu0 %v3339_v26 }
0x1881   :  { %3728 = vmax.xlane.f32.xlu0 %v3727_v2 }
0x18fc   :  { %v3454_v4 = vpop.xlane.xlu1 %3453 }
0x18fd   :  { %v3456_v30 = vsub.f32 %v3446_v11, %v3454_v4 }
0x18fe   :  { %v3451_v31 = vpop.xlane.xlu0 %3450 }
0x18ff   :  { %v3459_v22 = vmul.f32 1.442695, %v3456_v30  ;;  %v3455_v10 = vsub.f32 %v3441_v43, %v3451_v31 }
0x1901   :  { %6326 = vpow2.f32 %v3459_v22  ;;  %v3457_v49 = vmul.f32 1.442695, %v3455_v10 }
0x1902   :  { %v3338_v34 = vpop.xlane.xlu0 %3337 }
0x1903   :  { %v3342_v20 = vsub.f32 %v3328_v16, %v3338_v34 }
0x1905   :  { %v3344_v36 = vmul.f32 1.442695, %v3342_v20 }
0x1906   :  { %v3341_v3 = vpop.xlane.xlu0 %3340  ;;  %v3726_v51 = vpop.xlane.xlu1 %3725 }
0x1907   :  { %6328 = vpow2.f32 %v3344_v36  ;;  %v3343_v8 = vsub.f32 %v3333_v45, %v3341_v3  ;;  %v3730_v14 = vsub.f32 %v3716_v23, %v3726_v51 }
0x1909   :  { %v3346_v40 = vmul.f32 1.442695, %v3343_v8  ;;  %v3732_v16 = vmul.f32 1.442695, %v3730_v14  ;;  %v6421_v8 = vld [vmem:[#allocation19 + $0x10] sm:$0xff] }
0x190a   :  { %v3729_v44 = vpop.xlane.xlu0 %3728 }
0x190b   :  { %v3731_v48 = vsub.f32 %v3721_v24, %v3729_v44  ;;  %6330 = vpow2.f32 %v3346_v40  ;;  %v6422_v40 = vld [vmem:[#allocation19 + $0x8] sm:$0xff]  ;;  %v6423_v44 = vld [vmem:[#allocation19] sm:$0xff] }
0x190d   :  { %v3734_v53 = vmul.f32 1.442695, %v3731_v48 }
0x190e   :  { %v6327_v6 = vpop.eup %6326 }
0x190f   :  { %6332 = vpow2.f32 %v3734_v53  ;;  %v3464_v62 = vsel %vm969_vm9, %v6327_v6, 0.0 }
0x1910   :  { %3465 = vadd.xlane.f32.xlu0 %v3464_v62  ;;  %6334 = vpow2.f32 %v3457_v49 }
0x1911   :  { %6336 = vpow2.f32 %v3732_v16 }
0x1914   :  { %v6329_v56 = vpop.eup %6328 }
0x1915   :  { %v3348_v57 = vsel %vm969_vm9, %v6329_v56, 0.0 }
0x1916   :  { %3349 = vadd.xlane.f32.xlu1 %v3348_v57 }
0x1918   :  { %v6331_v58 = vpop.eup %6330 }
0x1919   :  { %v3351_v59 = vsel %vm969_vm9, %v6331_v58, 0.0 }
0x191a   :  { %3352 = vadd.xlane.f32.xlu0 %v3351_v59 }
0x191c   :  { %v6333_v60 = vpop.eup %6332 }
0x191d   :  { %v3739_v5 = vsel %vm969_vm9, %v6333_v60, 0.0  ;;  %v6335_v11 = vpop.eup %6334 }
0x191e   :  { %3740 = vadd.xlane.f32.xlu0 %v3739_v5  ;;  %v3461_v12 = vsel %vm969_vm9, %v6335_v11, 0.0  ;;  %v6337_v17 = vpop.eup %6336 }
0x1927   :  { %3835 = vrot.lane.b32.xlu1 %v7588_v37, %s6888_s5  ;;  %v3736_v37 = vsel %vm969_vm9, %v6337_v17, 0.0 }
0x1934   :  { %3833 = vrot.lane.b32.xlu0 %v7590_v39, %s6888_s5 }
0x194b   :  { %3462 = vadd.xlane.f32.xlu1 %v3461_v12 }
0x195c   :  { %3829 = vrot.lane.b32.xlu1 %v7584_v27, %s6888_s5 }
0x1980   :  { %3737 = vadd.xlane.f32.xlu1 %v3736_v37 }
0x1991   :  { %3831 = vrot.lane.b32.xlu1 %v7608_v54, %s6888_s5 }
0x1999   :  { %v3466_v43 = vpop.xlane.xlu0 %3465 }
0x199a   :  { %6338 = vrcp.f32 %v3466_v43 }
0x199f   :  { %v3350_v39 = vpop.xlane.xlu1 %3349 }
0x19a0   :  { %6340 = vrcp.f32 %v3350_v39 }
0x19a3   :  { %v3836_v33 = vpop.permute.xlu1 %3835  ;;  %v3353_v19 = vpop.xlane.xlu0 %3352 }
0x19a7   :  { %v6339_v27 = vpop.eup %6338  ;;  %v3741_v30 = vpop.xlane.xlu0 %3740 }
0x19a8   :  { %v3470_v25 = vmul.f32 %v6339_v27, %v6327_v6 }
0x19ad   :  { %v6341_v21 = vpop.eup %6340 }
0x19ae   :  { %v3356_v2 = vmul.f32 %v6341_v21, %v6329_v56 }
0x19d4   :  { %v3463_v45 = vpop.xlane.xlu1 %3462 }
0x19d5   :  { %6342 = vrcp.f32 %v3463_v45 }
0x19d6   :  { %6344 = vrcp.f32 %v3353_v19 }
0x19d7   :  { %6346 = vrcp.f32 %v3741_v30 }
0x19d8   :  { %v3830_v4 = vpop.permute.xlu1 %3829 }
0x19e2   :  { %v6343_v23 = vpop.eup %6342 }
0x19e3   :  { %v3469_v24 = vmul.f32 %v6343_v23, %v6335_v11  ;;  %v6345_v26 = vpop.eup %6344 }
0x19e4   :  { %v3357_v54 = vmul.f32 %v6345_v26, %v6331_v58  ;;  %v6347_v22 = vpop.eup %6346 }
0x19e5   :  { %6039 = vmatprep.mubr.msk.f32.mxu1 %vm969_vm9, %v3469_v24  ;;  %v3745_v36 = vmul.f32 %v6347_v22, %v6333_v60 }
0x19e6   :  { %6040 = vmatmul.mubr.msk.f32.vlgmr.msra.gmra.mxu1 %vm969_vm9, %v3470_v25 }
0x19e7   :  { %6043 = vmatpush3.msk.msra.mxu1 %vm426_vm8, %v7602_v50  ;;  %6046 = vmatprep.mubr.msk.f32.mxu1 %vm969_vm9, %v3356_v2  ;;  %v6424_v2 = vld [vmem:[#allocation16 + $0x10] sm:$0xff] }
0x19e8   :  { %6044 = vmatprep.subr.msk.mxu1 %vm426_vm8, %v7615_v55 }
0x19e9   :  { %6045 = vmatpush3.msk.msra.mxu1 %vm426_vm8, %v7615_v55 }
0x19ea   :  { %6056 = vmatprep.subr.msk.mxu1 %vm7280_vm12, %v7602_v50  ;;  %6047 = vmatmul.mubr.msk.f32.vlgmr.msra.gmra.mxu1 %vm969_vm9, %v3357_v54  ;;  %v6425_v54 = vld [vmem:[#allocation16 + $0x8] sm:$0xff] }
0x19eb   :  { %6057 = vmatpush3.msk.msra.mxu1 %vm7280_vm12, %v7602_v50  ;;  %v3834_v50 = vpop.permute.xlu0 %3833 }
0x19ec   :  { %6058 = vmatprep.subr.msk.mxu1 %vm7280_vm12, %v7615_v55 }
0x19ed   :  { %6059 = vmatpush3.msk.msra.mxu1 %vm7280_vm12, %v7615_v55  ;;  %v6420_v55 = vld [vmem:[#allocation19 + $0x18] sm:$0xff] }
0x19ee   :  { %6063 = vmatprep.subr.msk.mxu1 %vm881_vm1, %v3836_v33 }
0x1a09   :  { %v3738_v31 = vpop.xlane.xlu1 %3737 }
0x1a0a   :  { %6348 = vrcp.f32 %v3738_v31 }
0x1a0d   :  { %v3832_v3 = vpop.permute.xlu1 %3831 }
0x1a17   :  { %v6349_v34 = vpop.eup %6348 }
0x1a18   :  { %v3744_v20 = vmul.f32 %v6349_v34, %v6337_v17 }
0x1a1a   :  { %6060 = vmatprep.mubr.msk.f32.mxu1 %vm969_vm9, %v3744_v20  ;;  %v6427_v20 = vld [vmem:[#allocation17] ss:$0 sm:$0xff] }
0x1a1b   :  { %6061 = vmatmul.mubr.msk.f32.vlgmr.msra.gmra.mxu1 %vm969_vm9, %v3745_v36 }
0x1a1c   :  { %6064 = vmatpush3.xpose.msk.msra.mxu1 %vm881_vm1, %v3836_v33  ;;  %6067 = vmatprep.mubr.msk.f32.mxu1 %vm881_vm1, %v3830_v4  ;;  %v6426_v4 = vld [vmem:[#allocation16] sm:$0xff] }
0x1a1d   :  { %6065 = vmatprep.subr.msk.mxu1 %vm881_vm1, %v3834_v50 }
0x1a20   :  { %6066 = vmatpush3.xpose.msk.msra.mxu1 %vm881_vm1, %v3834_v50 }
0x1a21   :  { %6088 = vmatprep.subr.mxu1 %v6420_v55 }
0x1a23   :  { %6068 = vmatmul.mubr.msk.f32.vlgmr.msra.gmra.mxu1 %vm881_vm1, %v3832_v3 }
0x1a24   :  { %6089 = vmatpush3.msra.mxu1 %v6420_v55 }
0x1a25   :  { %6090 = vmatprep.subr.mxu1 %v6421_v8 }
0x1a26   :  { %6091 = vmatpush3.msra.mxu1 %v6421_v8 }
0x1a27   :  { %6092 = vmatprep.subr.mxu1 %v6422_v40 }
0x1a28   :  { %6093 = vmatpush3.msra.mxu1 %v6422_v40 }
0x1a29   :  { %6094 = vmatprep.subr.mxu1 %v6423_v44 }
0x1a2a   :  { %6095 = vmatpush3.msra.mxu1 %v6423_v44 }
0x1a2b   :  { %6106 = vmatprep.subr.msk.mxu1 %vm881_vm1, %v7350_v52 }
0x1aa6   :  { %v6041_v48 = vpop.f32.mrf.mxu1 }
0x1aa8   :  { %v3543_v53 = vpop.f32.mrf.mxu1 }
0x1aaa   :  { %v6048_v6 = vpop.f32.mrf.mxu1 }
0x1aab   :  { %v3630_v62 = vadd.f32 %v6048_v6, %v6041_v48 }
0x1aac   :  { %v3624_v56 = vpop.f32.mrf.mxu1 }
0x1aad   :  { %v3625_v57 = vadd.f32 %v3624_v56, %v3543_v53 }
0x1adb   :  { %v6062_v58 = vpop.f32.mrf.mxu1 }
0x1adc   :  { %v3828_v59 = vadd.f32 %v6062_v58, %v3630_v62 }
0x1add   :  { %v3818_v60 = vpop.f32.mrf.mxu1 }
0x1ade   :  { %v3827_v5 = vadd.f32 %v3818_v60, %v3625_v57 }
0x1ae3   :  { %v6069_v10 = vpop.f32.mrf.mxu1 }
0x1ae4   :  { %v3917_v49 = vadd.f32 %v7666_v9, %v6069_v10 }
0x1ae5   :  { %v3911_v11 = vpop.f32.mrf.mxu1 }
0x1ae6   :  { %v3912_v12 = vadd.f32 %v7669_v15, %v3911_v11  ;;  %v3923_v51 = vsel %vm969_vm9, %v3917_v49, -inf }
0x1ae7   :  { %3924 = vmax.xlane.f32.xlu1 %v3923_v51 }
0x1ae8   :  { %v3920_v14 = vsel %vm969_vm9, %v3912_v12, -inf }
0x1ae9   :  { %3921 = vmax.xlane.f32.xlu0 %v3920_v14 }
0x1b70   :  { %v3925_v16 = vpop.xlane.xlu1 %3924 }
0x1b71   :  { %v3927_v17 = vsub.f32 %v3917_v49, %v3925_v16  ;;  %v6428_v16 = vld [vmem:[%s7987_s13] ss:$0 sm:$0xff] }
0x1b72   :  { %v3922_v37 = vpop.xlane.xlu0 %3921 }
0x1b73   :  { %v3926_v39 = vsub.f32 %v3912_v12, %v3922_v37  ;;  %v3930_v43 = vmul.f32 1.442695, %v3927_v17 }
0x1b75   :  { %v3928_v33 = vmul.f32 1.442695, %v3926_v39  ;;  %v6429_v39 = vld [vmem:[%s7988_s19] ss:$0 sm:$0xff] }
0x1b77   :  { %6350 = vpow2.f32 %v3928_v33 }
0x1b78   :  { %6352 = vpow2.f32 %v3930_v43 }
0x1b84   :  { %v6351_v45 = vpop.eup %6350 }
0x1b85   :  { %v3932_v9 = vsel %vm969_vm9, %v6351_v45, 0.0  ;;  %v6353_v19 = vpop.eup %6352 }
0x1b86   :  { %3933 = vadd.xlane.f32.xlu0 %v3932_v9  ;;  %v3935_v15 = vsel %vm969_vm9, %v6353_v19, 0.0  ;;  %v6430_v9 = vld [vmem:[#allocation20] ss:$0 sm:$0xff] }
0x1b8a   :  { %3936 = vadd.xlane.f32.xlu0 %v3935_v15 }
0x1c0f   :  { %v3934_v27 = vpop.xlane.xlu0 %3933 }
0x1c10   :  { %6354 = vrcp.f32 %v3934_v27 }
0x1c13   :  { %v3937_v21 = vpop.xlane.xlu0 %3936 }
0x1c14   :  { %6356 = vrcp.f32 %v3937_v21 }
0x1c1d   :  { %v6355_v23 = vpop.eup %6354 }
0x1c1e   :  { %v3940_v24 = vmul.f32 %v6355_v23, %v6351_v45 }
0x1c20   :  { %6074 = vmatprep.mubr.msk.f32.mxu0 %vm969_vm9, %v3940_v24  ;;  %v7815_v24 = vld [vmem:[#allocation10 + $0x8] sm:$0xff] }
0x1c21   :  { %v6357_v25 = vpop.eup %6356 }
0x1c22   :  { %v3941_v26 = vmul.f32 %v6357_v25, %v6353_v19 }
0x1c24   :  { %6075 = vmatmul.mubr.msk.f32.vlgmr.msra.gmra.mxu0 %vm969_vm9, %v3941_v26 }
0x1c25   :  { %6078 = vmatpush3.msra.mxu0 %v7663_v7 }
0x1c26   :  { %6079 = vmatprep.subr.mxu0 %v6424_v2 }
0x1c27   :  { %6080 = vmatpush3.msra.mxu0 %v6424_v2  ;;  %v7818_v2 = vld [vmem:[#allocation10] sm:$0xff] }
0x1c28   :  { %6081 = vmatprep.subr.mxu0 %v6425_v54 }
0x1c29   :  { %6082 = vmatpush3.msra.mxu0 %v6425_v54 }
0x1c2a   :  { %6083 = vmatprep.subr.mxu0 %v6426_v4 }
0x1c2b   :  { %6084 = vmatpush3.msra.mxu0 %v6426_v4 }
0x1c2c   :  { %6099 = vmatprep.subr.msk.mxu0 %vm881_vm1, %v7321_v13 }
0x1ce4   :  { %v6076_v30 = vpop.f32.mrf.mxu0 }
0x1ce5   :  { %v4024_v34 = vadd.f32 %v6076_v30, %v3828_v59 }
0x1ce6   :  { %v4014_v31 = vpop.f32.mrf.mxu0 }
0x1ce7   :  { %v4023_v22 = vadd.f32 %v4014_v31, %v3827_v5 }
0x1ce9   :  { %6085 = vmatprep.mubr.msk.f32.mxu0 %vm443_vm0, %v4023_v22 }
0x1cea   :  { %6086 = vmatmul.mubr.msk.f32.vlgmr.msra.gmra.mxu0 %vm443_vm0, %v4024_v34 }
0x1ceb   :  { %6100 = vmatpush3.xpose.msk.msra.mxu0 %vm881_vm1, %v7321_v13 }
0x1cec   :  { %6101 = vmatprep.subr.msk.mxu0 %vm881_vm1, %v7139_v35 }
0x1cef   :  { %6102 = vmatpush3.xpose.msk.msra.mxu0 %vm881_vm1, %v7139_v35 }
0x1cf0   :  { %6113 = vmatprep.subr.msk.mxu0 %vm7202_vm6, %v7333_v32 }
0x1daa   :  { %v6087_v7 = vpop.f32.mrf.mxu0 }
0x1dab   :  { %v4103_v36 = vadd.f32 %v6427_v20, %v6087_v7 }
0x1dac   :  { %v4097_v50 = vpop.f32.mrf.mxu0 }
0x1dad   :  { %v4107_v55 = vadd.f32 %v4103_v36, %v7566_v28  ;;  %v4098_v3 = vadd.f32 %v6427_v20, %v4097_v50 }
0x1daf   :  { %v4111_v8 = vsel %vm443_vm0, %v4107_v55, 0.0  ;;  %v4106_v13 = vadd.f32 %v4098_v3, %v7564_v41 }
0x1db0   :  { %4112 = vadd.xlane.f32.xlu0 %v4111_v8 }
0x1db1   :  { %v4108_v40 = vsel %vm443_vm0, %v4106_v13, 0.0 }
0x1db2   :  { %4109 = vadd.xlane.f32.xlu1 %v4108_v40 }
0x1e39   :  { %v4113_v35 = vpop.xlane.xlu0 %4112 }
0x1e3a   :  { %v4115_v44 = vmul.f32 0.03125, %v4113_v35 }
0x1e3b   :  { %v4110_v48 = vpop.xlane.xlu1 %4109 }
0x1e3c   :  { %v4117_v53 = vsub.f32 %v4107_v55, %v4115_v44  ;;  %v4114_v6 = vmul.f32 0.03125, %v4110_v48 }
0x1e3e   :  { %v4116_v62 = vsub.f32 %v4106_v13, %v4114_v6  ;;  %v4119_v56 = vmul.f32 %v4117_v53, %v4117_v53 }
0x1e40   :  { %v4123_v57 = vsel %vm443_vm0, %v4119_v56, 0.0  ;;  %v4118_v58 = vmul.f32 %v4116_v62, %v4116_v62 }
0x1e41   :  { %4124 = vadd.xlane.f32.xlu0 %v4123_v57 }
0x1e42   :  { %v4120_v28 = vsel %vm443_vm0, %v4118_v58, 0.0 }
0x1e43   :  { %4121 = vadd.xlane.f32.xlu1 %v4120_v28 }
0x1eca   :  { %v4125_v41 = vpop.xlane.xlu0 %4124 }
0x1ecb   :  { %v4127_v59 = vmul.f32 0.03125, %v4125_v41 }
0x1ecc   :  { %v4122_v60 = vpop.xlane.xlu1 %4121 }
0x1ecd   :  { %v4129_v5 = vadd.f32 1e-05, %v4127_v59  ;;  %v4126_v10 = vmul.f32 0.03125, %v4122_v60 }
0x1ecf   :  { %6358 = vrsqrt.f32 %v4129_v5  ;;  %v4128_v49 = vadd.f32 1e-05, %v4126_v10 }
0x1ed1   :  { %6360 = vrsqrt.f32 %v4128_v49 }
0x1edc   :  { %v6359_v11 = vpop.eup %6358 }
0x1edd   :  { %v4133_v12 = vmul.f32 %v6359_v11, %v4117_v53 }
0x1ede   :  { %v6361_v51 = vpop.eup %6360 }
0x1edf   :  { %v4132_v14 = vmul.f32 %v6361_v51, %v4116_v62  ;;  %v4135_v17 = vmul.f32 %v6428_v16, %v4133_v12 }
0x1ee1   :  { %v4134_v37 = vmul.f32 %v6428_v16, %v4132_v14  ;;  %v7763_v33 = vadd.f32 %v6429_v39, %v4135_v17 }
0x1ee3   :  { %v7761_v43 = vadd.f32 %v6429_v39, %v4134_v37 }
0x1ee5   :  { %6096 = vmatprep.mubr.msk.f32.mxu1 %vm443_vm0, %v7761_v43 }
0x1ee6   :  { %6097 = vmatmul.mubr.msk.f32.vlgmr.msra.gmra.mxu1 %vm443_vm0, %v7763_v33 }
0x1ee7   :  { %6107 = vmatpush3.xpose.msk.msra.mxu1 %vm881_vm1, %v7350_v52 }
0x1ee8   :  { %6108 = vmatprep.subr.msk.mxu1 %vm881_vm1, %v7364_v0 }
0x1eeb   :  { %6109 = vmatpush3.xpose.msk.msra.mxu1 %vm881_vm1, %v7364_v0 }
0x1eec   :  { %6120 = vmatprep.subr.msk.mxu1 %vm426_vm8, %v7333_v32 }
0x1fa6   :  { %v6098_v45 = vpop.f32.mrf.mxu1 }
0x1fa7   :  { %v4216_v19 = vadd.f32 %v6430_v9, %v6098_v45 }
0x1fa8   :  { %v4210_v15 = vpop.f32.mrf.mxu1 }
0x1fa9   :  { %v7778_v27 = vmul.f32 0.35355338, %v4216_v19  ;;  %v4211_v21 = vadd.f32 %v6430_v9, %v4210_v15 }
0x1fab   :  { %v7780_v23 = vmul.f32 0.35355338, %v4211_v21  ;;  %4326 = vrot.lane.b32.xlu0 %v7778_v27, %s6886_s29 }
0x1fad   :  { %4324 = vrot.lane.b32.xlu1 %v7780_v23, %s6886_s29  ;;  %6103 = vmatprep.mubr.msk.f32.mxu0 %vm881_vm1, %v7780_v23 }
0x1fae   :  { %6104 = vmatmul.mubr.msk.f32.vlgmr.msra.gmra.mxu0 %vm881_vm1, %v7778_v27 }
0x1faf   :  { %6114 = vmatpush3.msk.msra.mxu0 %vm7202_vm6, %v7333_v32 }
0x1fb0   :  { %6115 = vmatprep.subr.msk.mxu0 %vm7202_vm6, %v7150_v46 }
0x1fb1   :  { %6116 = vmatpush3.msk.msra.mxu0 %vm7202_vm6, %v7150_v46 }
0x1fb2   :  { %6127 = vmatprep.subr.msk.mxu0 %vm881_vm1, %v7426_v42 }
0x201d   :  { %v4327_v0 = vpop.permute.xlu0 %4326 }
0x201f   :  { %v4325_v52 = vpop.permute.xlu1 %4324 }
0x2020   :  { %6110 = vmatprep.mubr.msk.f32.mxu1 %vm881_vm1, %v4325_v52 }
0x2021   :  { %6111 = vmatmul.mubr.msk.f32.vlgmr.msra.gmra.mxu1 %vm881_vm1, %v4327_v0 }
0x2022   :  { %6121 = vmatpush3.msk.msra.mxu1 %vm426_vm8, %v7333_v32 }
0x2023   :  { %6122 = vmatprep.subr.msk.mxu1 %vm426_vm8, %v7150_v46 }
0x2024   :  { %6123 = vmatpush3.msk.msra.mxu1 %vm426_vm8, %v7150_v46 }
0x2025   :  { %6134 = vmatprep.subr.msk.mxu1 %vm7280_vm12, %v7333_v32 }
0x206e   :  { %v6105_v8 = vpop.f32.mrf.mxu0 }
0x206f   :  { %v4299_v40 = vadd.f32 %v7815_v24, %v6105_v8 }
0x2070   :  { %v4293_v13 = vpop.f32.mrf.mxu0 }
0x2071   :  { %v4294_v35 = vadd.f32 %v7818_v2, %v4293_v13  ;;  %v4305_v44 = vsel %vm969_vm9, %v4299_v40, -inf  ;;  %v6436_v13 = vld [vmem:[#allocation28 + $0x8] sm:$0xff] }
0x2073   :  { %v4302_v48 = vsel %vm969_vm9, %v4294_v35, -inf }
0x20e1   :  { %v6112_v63 = vpop.f32.mrf.mxu1 }
0x20e2   :  { %v4404_v25 = vadd.f32 %v7815_v24, %v6112_v63 }
0x20e3   :  { %v4398_v26 = vpop.f32.mrf.mxu1 }
0x20e4   :  { %v4399_v54 = vadd.f32 %v7818_v2, %v4398_v26  ;;  %v4410_v4 = vsel %vm969_vm9, %v4404_v25, -inf }
0x20e5   :  { %4411 = vmax.xlane.f32.xlu0 %v4410_v4 }
0x20e6   :  { %v4407_v61 = vsel %vm969_vm9, %v4399_v54, -inf }
0x20e7   :  { %4408 = vmax.xlane.f32.xlu1 %v4407_v61 }
0x216e   :  { %v4412_v30 = vpop.xlane.xlu0 %4411 }
0x216f   :  { %v4414_v31 = vsub.f32 %v4404_v25, %v4412_v30 }
0x2170   :  { %v4409_v22 = vpop.xlane.xlu1 %4408 }
0x2171   :  { %v4417_v34 = vmul.f32 1.442695, %v4414_v31  ;;  %v4413_v7 = vsub.f32 %v4399_v54, %v4409_v22 }
0x2173   :  { %6362 = vpow2.f32 %v4417_v34  ;;  %v4415_v20 = vmul.f32 1.442695, %v4413_v7 }
0x2175   :  { %6364 = vpow2.f32 %v4415_v20 }
0x2180   :  { %v6363_v36 = vpop.eup %6362 }
0x2181   :  { %v4422_v50 = vsel %vm969_vm9, %v6363_v36, 0.0 }
0x2182   :  { %v6365_v55 = vpop.eup %6364  ;;  %4423 = vadd.xlane.f32.xlu0 %v4422_v50 }
0x2183   :  { %v4419_v3 = vsel %vm969_vm9, %v6365_v55, 0.0 }
0x2184   :  { %4420 = vadd.xlane.f32.xlu1 %v4419_v3 }
0x2195   :  { %4591 = vrot.lane.b32.xlu1 %v7780_v23, %s6887_s11 }
0x2198   :  { %4593 = vrot.lane.b32.xlu0 %v7778_v27, %s6887_s11 }
0x21b7   :  { %4306 = vmax.xlane.f32.xlu0 %v4305_v44 }
0x21b9   :  { %4303 = vmax.xlane.f32.xlu1 %v4302_v48 }
0x220b   :  { %v4424_v53 = vpop.xlane.xlu0 %4423 }
0x220c   :  { %6366 = vrcp.f32 %v4424_v53 }
0x220d   :  { %v4421_v6 = vpop.xlane.xlu1 %4420 }
0x220e   :  { %6368 = vrcp.f32 %v4421_v6 }
0x220f   :  { %v4594_v41 = vpop.permute.xlu0 %4593 }
0x2211   :  { %v4592_v28 = vpop.permute.xlu1 %4591 }
0x2219   :  { %v6367_v62 = vpop.eup %6366 }
0x221a   :  { %v4428_v58 = vmul.f32 %v6367_v62, %v6363_v36 }
0x221b   :  { %v6369_v56 = vpop.eup %6368 }
0x221c   :  { %v4427_v57 = vmul.f32 %v6369_v56, %v6365_v55 }
0x221e   :  { %6117 = vmatprep.mubr.msk.f32.mxu0 %vm969_vm9, %v4427_v57 }
0x221f   :  { %6118 = vmatmul.mubr.msk.f32.vlgmr.msra.gmra.mxu0 %vm969_vm9, %v4428_v58 }
0x2220   :  { %6128 = vmatpush3.xpose.msk.msra.mxu0 %vm881_vm1, %v7426_v42  ;;  %6131 = vmatprep.mubr.msk.f32.mxu0 %vm881_vm1, %v4592_v28  ;;  %v7856_v42 = vld [vmem:[%s7989_s15 + $0x18] sm:$0xff] }
0x2221   :  { %6129 = vmatprep.subr.msk.mxu0 %vm881_vm1, %v7438_v47 }
0x2224   :  { %6130 = vmatpush3.xpose.msk.msra.mxu0 %vm881_vm1, %v7438_v47 }
0x2225   :  { %6148 = vmatprep.subr.msk.mxu0 %vm7206_vm7, %v7333_v32 }
0x2227   :  { %6132 = vmatmul.mubr.msk.f32.vlgmr.msra.gmra.mxu0 %vm881_vm1, %v4594_v41 }
0x2228   :  { %6149 = vmatpush3.msk.msra.mxu0 %vm7206_vm7, %v7333_v32 }
0x2229   :  { %6150 = vmatprep.subr.msk.mxu0 %vm7206_vm7, %v7150_v46 }
0x222a   :  { %6151 = vmatpush3.msk.msra.mxu0 %vm7206_vm7, %v7150_v46 }
0x222b   :  { %6155 = vmatprep.subr.mxu0 %v7856_v42 }
0x2240   :  { %v4307_v47 = vpop.xlane.xlu0 %4306 }
0x2241   :  { %v4309_v60 = vsub.f32 %v4299_v40, %v4307_v47 }
0x2242   :  { %v4304_v59 = vpop.xlane.xlu1 %4303 }
0x2243   :  { %v4308_v5 = vsub.f32 %v4294_v35, %v4304_v59  ;;  %v4312_v10 = vmul.f32 1.442695, %v4309_v60 }
0x2245   :  { %v4310_v49 = vmul.f32 1.442695, %v4308_v5  ;;  %6370 = vpow2.f32 %v4312_v10 }
0x2247   :  { %6372 = vpow2.f32 %v4310_v49 }
0x2252   :  { %v6371_v37 = vpop.eup %6370 }
0x2253   :  { %v4317_v9 = vsel %vm969_vm9, %v6371_v37, 0.0 }
0x2254   :  { %v6373_v45 = vpop.eup %6372 }
0x2255   :  { %v4314_v19 = vsel %vm969_vm9, %v6373_v45, 0.0 }
0x22df   :  { %v7859_v11 = vpop.f32.mrf.mxu0 }
0x22e1   :  { %v7861_v12 = vpop.f32.mrf.mxu0 }
0x22e7   :  { %v6133_v51 = vpop.f32.mrf.mxu0 }
0x22e8   :  { %v4671_v1 = vadd.f32 %v7815_v24, %v6133_v51 }
0x22e9   :  { %v4665_v14 = vpop.f32.mrf.mxu0 }
0x22ea   :  { %v4666_v16 = vadd.f32 %v7818_v2, %v4665_v14  ;;  %v4677_v17 = vsel %vm969_vm9, %v4671_v1, -inf }
0x22eb   :  { %4678 = vmax.xlane.f32.xlu0 %v4677_v17 }
0x22ec   :  { %v4674_v39 = vsel %vm969_vm9, %v4666_v16, -inf }
0x22ed   :  { %4675 = vmax.xlane.f32.xlu1 %v4674_v39  ;;  %v6438_v39 = vld [vmem:[%s7989_s15 + $0x10] sm:$0xff] }
0x22ef   :  { %4318 = vadd.xlane.f32.xlu0 %v4317_v9  ;;  %v6440_v9 = vld [vmem:[%s7989_s15] sm:$0xff] }
0x22f1   :  { %4315 = vadd.xlane.f32.xlu1 %v4314_v19  ;;  %v6441_v19 = vld [vmem:[%s7043_s4 + $0x38] sm:$0xff] }
0x2374   :  { %v4679_v15 = vpop.xlane.xlu0 %4678 }
0x2375   :  { %v4681_v21 = vsub.f32 %v4671_v1, %v4679_v15 }
0x2376   :  { %v4676_v52 = vpop.xlane.xlu1 %4675 }
0x2377   :  { %v4684_v0 = vmul.f32 1.442695, %v4681_v21  ;;  %v4680_v63 = vsub.f32 %v4666_v16, %v4676_v52 }
0x2378   :  { %v4319_v25 = vpop.xlane.xlu0 %4318 }
0x2379   :  { %6374 = vpow2.f32 %v4684_v0  ;;  %v4682_v26 = vmul.f32 1.442695, %v4680_v63 }
0x237a   :  { %6376 = vrcp.f32 %v4319_v25  ;;  %v4316_v54 = vpop.xlane.xlu1 %4315  ;;  %v6442_v25 = vld [vmem:[%s7043_s4 + $0x30] sm:$0xff] }
0x237b   :  { %6378 = vpow2.f32 %v4682_v26  ;;  %v6443_v26 = vld [vmem:[%s7043_s4 + $0x28] sm:$0xff] }
0x237c   :  { %6380 = vrcp.f32 %v4316_v54  ;;  %v6445_v54 = vld [vmem:[%s7043_s4 + $0x18] sm:$0xff] }
0x2386   :  { %v6375_v4 = vpop.eup %6374 }
0x2387   :  { %v6377_v61 = vpop.eup %6376  ;;  %v4689_v30 = vsel %vm969_vm9, %v6375_v4, 0.0 }
0x2388   :  { %v6379_v31 = vpop.eup %6378  ;;  %4690 = vadd.xlane.f32.xlu0 %v4689_v30  ;;  %v4323_v20 = vmul.f32 %v6377_v61, %v6371_v37  ;;  %v6447_v61 = vld [vmem:[%s7043_s4 + $0x8] sm:$0xff]  ;;  %v6448_v30 = vld [vmem:[%s7043_s4] sm:$0xff] }
0x2389   :  { %v6381_v22 = vpop.eup %6380  ;;  %v4686_v34 = vsel %vm969_vm9, %v6379_v31, 0.0 }
0x238a   :  { %4687 = vadd.xlane.f32.xlu1 %v4686_v34  ;;  %v4322_v7 = vmul.f32 %v6381_v22, %v6373_v45  ;;  %v6439_v45 = vld [vmem:[%s7989_s15 + $0x8] sm:$0xff]  ;;  %v6449_v22 = vld [vmem:[%s7990_s16] ss:$0 sm:$0xff] }
0x238c   :  { %6124 = vmatprep.mubr.msk.f32.mxu1 %vm969_vm9, %v4322_v7 }
0x238d   :  { %6125 = vmatmul.mubr.msk.f32.vlgmr.msra.gmra.mxu1 %vm969_vm9, %v4323_v20 }
0x238e   :  { %6135 = vmatpush3.msk.msra.mxu1 %vm7280_vm12, %v7333_v32 }
0x238f   :  { %6136 = vmatprep.subr.msk.mxu1 %vm7280_vm12, %v7150_v46 }
0x2390   :  { %6137 = vmatpush3.msk.msra.mxu1 %vm7280_vm12, %v7150_v46 }
0x2391   :  { %6141 = vmatprep.subr.msk.mxu1 %vm881_vm1, %v7484_v29 }
0x239b   :  { %4779 = vrot.lane.b32.xlu1 %v7780_v23, %s6888_s5  ;;  %v6435_v23 = vld [vmem:[#allocation28 + $0x10] sm:$0xff] }
0x239e   :  { %4781 = vrot.lane.b32.xlu0 %v7778_v27, %s6888_s5 }
0x2411   :  { %v4691_v36 = vpop.xlane.xlu0 %4690 }
0x2412   :  { %6382 = vrcp.f32 %v4691_v36 }
0x2413   :  { %v4688_v32 = vpop.xlane.xlu1 %4687 }
0x2414   :  { %6384 = vrcp.f32 %v4688_v32 }
0x2415   :  { %v4782_v27 = vpop.permute.xlu0 %4781 }
0x2417   :  { %v4780_v46 = vpop.permute.xlu1 %4779 }
0x241f   :  { %v6383_v50 = vpop.eup %6382 }
0x2420   :  { %v4695_v8 = vmul.f32 %v6383_v50, %v6375_v4  ;;  %v6446_v4 = vld [vmem:[%s7043_s4 + $0x10] sm:$0xff] }
0x2421   :  { %v6385_v55 = vpop.eup %6384 }
0x2422   :  { %v4694_v3 = vmul.f32 %v6385_v55, %v6379_v31 }
0x2424   :  { %6138 = vmatprep.mubr.msk.f32.mxu1 %vm969_vm9, %v4694_v3 }
0x2425   :  { %6139 = vmatmul.mubr.msk.f32.vlgmr.msra.gmra.mxu1 %vm969_vm9, %v4695_v8 }
0x2426   :  { %6142 = vmatpush3.xpose.msk.msra.mxu1 %vm881_vm1, %v7484_v29  ;;  %6145 = vmatprep.mubr.msk.f32.mxu1 %vm881_vm1, %v4780_v46  ;;  %v6437_v29 = vld [vmem:[#allocation28] sm:$0xff] }
0x2427   :  { %6143 = vmatprep.subr.msk.mxu1 %vm881_vm1, %v7497_v38 }
0x242a   :  { %6144 = vmatpush3.xpose.msk.msra.mxu1 %vm881_vm1, %v7497_v38 }
0x242b   :  { %6166 = vmatprep.subr.mxu1 %v6434_v18 }
0x242d   :  { %6146 = vmatmul.mubr.msk.f32.vlgmr.msra.gmra.mxu1 %vm881_vm1, %v4782_v27 }
0x242e   :  { %6167 = vmatpush3.msra.mxu1 %v6434_v18 }
0x242f   :  { %6168 = vmatprep.subr.mxu1 %v6435_v23 }
0x2430   :  { %6169 = vmatpush3.msra.mxu1 %v6435_v23 }
0x2431   :  { %6170 = vmatprep.subr.mxu1 %v6436_v13 }
0x2432   :  { %6171 = vmatpush3.msra.mxu1 %v6436_v13 }
0x2433   :  { %6172 = vmatprep.subr.mxu1 %v6437_v29 }
0x2434   :  { %6173 = vmatpush3.msra.mxu1 %v6437_v29 }
0x244d   :  { %v6126_v40 = vpop.f32.mrf.mxu1 }
0x244e   :  { %v4588_v44 = vadd.f32 %v6126_v40, %v7859_v11 }
0x244f   :  { %v4582_v35 = vpop.f32.mrf.mxu1 }
0x2450   :  { %v4583_v15 = vadd.f32 %v4582_v35, %v7861_v12  ;;  %v6444_v12 = vld [vmem:[%s7043_s4 + $0x20] sm:$0xff] }
0x24e5   :  { %v6140_v38 = vpop.f32.mrf.mxu1 }
0x24e6   :  { %v4778_v48 = vadd.f32 %v6140_v38, %v4588_v44 }
0x24e7   :  { %v4768_v53 = vpop.f32.mrf.mxu1 }
0x24e8   :  { %v4777_v52 = vadd.f32 %v4768_v53, %v4583_v15 }
0x24ed   :  { %v6147_v6 = vpop.f32.mrf.mxu1 }
0x24ee   :  { %v4859_v62 = vadd.f32 %v7815_v24, %v6147_v6 }
0x24ef   :  { %v4853_v56 = vpop.f32.mrf.mxu1 }
0x24f0   :  { %v4854_v57 = vadd.f32 %v7818_v2, %v4853_v56  ;;  %v4865_v58 = vsel %vm969_vm9, %v4859_v62, -inf }
0x24f1   :  { %4866 = vmax.xlane.f32.xlu0 %v4865_v58  ;;  %v6450_v58 = vld [vmem:[%s7991_s18] ss:$0 sm:$0xff] }
0x24f2   :  { %v4862_v28 = vsel %vm969_vm9, %v4854_v57, -inf }
0x24f3   :  { %4863 = vmax.xlane.f32.xlu1 %v4862_v28 }
0x257a   :  { %v4867_v41 = vpop.xlane.xlu0 %4866 }
0x257b   :  { %v4869_v47 = vsub.f32 %v4859_v62, %v4867_v41 }
0x257c   :  { %v4864_v59 = vpop.xlane.xlu1 %4863 }
0x257d   :  { %v4872_v60 = vmul.f32 1.442695, %v4869_v47  ;;  %v4868_v5 = vsub.f32 %v4854_v57, %v4864_v59  ;;  %v6451_v47 = vld [vmem:[%s7992_s9] ss:$0 sm:$0xff] }
0x257f   :  { %6386 = vpow2.f32 %v4872_v60  ;;  %v4870_v10 = vmul.f32 1.442695, %v4868_v5 }
0x2581   :  { %6388 = vpow2.f32 %v4870_v10  ;;  %v6452_v10 = vld [vmem:[%s7038_s25] ss:$0 sm:$0xff]  ;;  %s6889_s25 = smov [#allocation29]  }
0x258c   :  { %v6387_v49 = vpop.eup %6386 }
0x258d   :  { %v4877_v24 = vsel %vm969_vm9, %v6387_v49, 0.0 }
0x258e   :  { %v6389_v11 = vpop.eup %6388  ;;  %4878 = vadd.xlane.f32.xlu0 %v4877_v24 }
0x258f   :  { %v4874_v2 = vsel %vm969_vm9, %v6389_v11, 0.0 }
0x2590   :  { %4875 = vadd.xlane.f32.xlu1 %v4874_v2 }
0x2617   :  { %v4879_v51 = vpop.xlane.xlu0 %4878 }
0x2618   :  { %6390 = vrcp.f32 %v4879_v51 }
0x2619   :  { %v4876_v1 = vpop.xlane.xlu1 %4875 }
0x261a   :  { %6392 = vrcp.f32 %v4876_v1 }
0x2625   :  { %v6391_v14 = vpop.eup %6390 }
0x2626   :  { %v4883_v37 = vmul.f32 %v6391_v14, %v6387_v49  ;;  %v6453_v14 = vld [vmem:[%s7048_s20] ss:$0 sm:$0xff]  ;;  %s5283_s20 = sshll.u32 %s6889_s25, 4  ;;  %s5284_s20 = int_to_ptr.vmem [resolvable:$true] %s5283_s20 }
0x2627   :  { %v6393_v16 = vpop.eup %6392  ;;  %s6796_s4 = scalar_lea.vmem %s5284_s20, 256  ;;  %p6801_p2 = scmp.lt.s32.totalorder %s5284_s20, %s5284_s20 }
0x2628   :  { %v4882_v17 = vmul.f32 %v6393_v16, %v6389_v11  ;;  %p6797_p1 = scmp.ne.s32.totalorder %s5284_s20, %s6796_s4  ;;  %p6802_p3 = scmp.lt.s32.totalorder %s6796_s4, %s6796_s4 }
0x262a   :  { %6152 = vmatprep.mubr.msk.f32.mxu0 %vm969_vm9, %v4882_v17  ;;  %p6803_p4 = por %p6802_p3, %p6801_p2 }
0x262b   :  { %6153 = vmatmul.mubr.msk.f32.vlgmr.msra.gmra.mxu0 %vm969_vm9, %v4883_v37 }
0x262c   :  { %6156 = vmatpush3.msra.mxu0 %v7856_v42  ;;  %p6804_p5 = pnand %p6803_p4, %p6797_p1 }
0x262d   :  { %6157 = vmatprep.subr.mxu0 %v6438_v39 }
0x262e   :  { %6158 = vmatpush3.msra.mxu0 %v6438_v39 }
0x262f   :  { %6159 = vmatprep.subr.mxu0 %v6439_v45 }
0x2630   :  { %6160 = vmatpush3.msra.mxu0 %v6439_v45 }
0x2631   :  { %6161 = vmatprep.subr.mxu0 %v6440_v9 }
0x2632   :  { %6162 = vmatpush3.msra.mxu0 %v6440_v9 }
0x2633   :  { %6177 = vmatprep.subr.mxu0 %v6441_v19 }
0x26eb   :  { %v6154_v21 = vpop.f32.mrf.mxu0 }
0x26ec   :  { %v4966_v63 = vadd.f32 %v6154_v21, %v4778_v48 }
0x26ed   :  { %v4956_v42 = vpop.f32.mrf.mxu0 }
0x26ee   :  { %v4965_v0 = vadd.f32 %v4956_v42, %v4777_v52 }
0x26f0   :  { %6163 = vmatprep.mubr.msk.f32.mxu0 %vm443_vm0, %v4965_v0 }
0x26f1   :  { %6164 = vmatmul.mubr.msk.f32.vlgmr.msra.gmra.mxu0 %vm443_vm0, %v4966_v63 }
0x26f2   :  { %6178 = vmatpush3.msra.mxu0 %v6441_v19 }
0x26f3   :  { %6179 = vmatprep.subr.mxu0 %v6442_v25 }
0x26f4   :  { %6180 = vmatpush3.msra.mxu0 %v6442_v25 }
0x26f5   :  { %6181 = vmatprep.subr.mxu0 %v6443_v26 }
0x26f6   :  { %6182 = vmatpush3.msra.mxu0 %v6443_v26 }
0x26f7   :  { %6183 = vmatprep.subr.mxu0 %v6444_v12 }
0x26f8   :  { %6184 = vmatpush3.msra.mxu0 %v6444_v12 }
0x26f9   :  { %6185 = vmatprep.subr.mxu0 %v6445_v54 }
0x26fa   :  { %6186 = vmatpush3.msra.mxu0 %v6445_v54 }
0x26fb   :  { %6187 = vmatprep.subr.mxu0 %v6446_v4 }
0x26fc   :  { %6188 = vmatpush3.msra.mxu0 %v6446_v4 }
0x26fd   :  { %6189 = vmatprep.subr.mxu0 %v6447_v61 }
0x26fe   :  { %6190 = vmatpush3.msra.mxu0 %v6447_v61 }
0x26ff   :  { %6191 = vmatprep.subr.mxu0 %v6448_v30 }
0x2700   :  { %6192 = vmatpush3.msra.mxu0 %v6448_v30 }
0x27b1   :  { %v6165_v31 = vpop.f32.mrf.mxu0 }
0x27b2   :  { %v5045_v34 = vadd.f32 %v6449_v22, %v6165_v31 }
0x27b3   :  { %v5039_v7 = vpop.f32.mrf.mxu0 }
0x27b4   :  { %v5049_v20 = vadd.f32 %v5045_v34, %v7763_v33  ;;  %v5040_v36 = vadd.f32 %v6449_v22, %v5039_v7 }
0x27b6   :  { %v5048_v32 = vadd.f32 %v5040_v36, %v7761_v43  ;;  %v5053_v50 = vsel %vm443_vm0, %v5049_v20, 0.0 }
0x27b7   :  { %5054 = vadd.xlane.f32.xlu0 %v5053_v50  ;;  %v6454_v50 = vld [vmem:[%s7993_s21] ss:$0 sm:$0xff] }
0x27b8   :  { %v5050_v55 = vsel %vm443_vm0, %v5048_v32, 0.0 }
0x27b9   :  { %5051 = vadd.xlane.f32.xlu1 %v5050_v55 }
0x2840   :  { %v5055_v3 = vpop.xlane.xlu0 %5054 }
0x2841   :  { %v5057_v8 = vmul.f32 0.03125, %v5055_v3 }
0x2842   :  { %v5052_v46 = vpop.xlane.xlu1 %5051 }
0x2843   :  { %v5059_v18 = vsub.f32 %v5049_v20, %v5057_v8  ;;  %v5056_v27 = vmul.f32 0.03125, %v5052_v46  ;;  %v6455_v8 = vld [vmem:[%s7994_s8] ss:$0 sm:$0xff] }
0x2845   :  { %v5058_v23 = vsub.f32 %v5048_v32, %v5056_v27  ;;  %v5061_v13 = vmul.f32 %v5059_v18, %v5059_v18 }
0x2847   :  { %v5065_v29 = vsel %vm443_vm0, %v5061_v13, 0.0  ;;  %v5060_v40 = vmul.f32 %v5058_v23, %v5058_v23 }
0x2848   :  { %5066 = vadd.xlane.f32.xlu0 %v5065_v29 }
0x2849   :  { %v5062_v43 = vsel %vm443_vm0, %v5060_v40, 0.0 }
0x284a   :  { %5063 = vadd.xlane.f32.xlu1 %v5062_v43 }
0x28d1   :  { %v5067_v33 = vpop.xlane.xlu0 %5066 }
0x28d2   :  { %v5069_v35 = vmul.f32 0.03125, %v5067_v33 }
0x28d3   :  { %v5064_v44 = vpop.xlane.xlu1 %5063 }
0x28d4   :  { %v5071_v38 = vadd.f32 1e-05, %v5069_v35  ;;  %v5068_v48 = vmul.f32 0.03125, %v5064_v44 }
0x28d6   :  { %6394 = vrsqrt.f32 %v5071_v38  ;;  %v5070_v53 = vadd.f32 1e-05, %v5068_v48 }
0x28d8   :  { %6396 = vrsqrt.f32 %v5070_v53 }
0x28e3   :  { %v6395_v6 = vpop.eup %6394 }
0x28e4   :  { %v5075_v62 = vmul.f32 %v6395_v6, %v5059_v18 }
0x28e5   :  { %v6397_v56 = vpop.eup %6396 }
0x28e6   :  { %v5074_v57 = vmul.f32 %v6397_v56, %v5058_v23  ;;  %v5077_v28 = vmul.f32 %v6450_v58, %v5075_v62 }
0x28e8   :  { %v5076_v41 = vmul.f32 %v6450_v58, %v5074_v57  ;;  %v5079_v60 = vadd.f32 %v6451_v47, %v5077_v28 }
0x28ea   :  { %v5078_v59 = vadd.f32 %v6451_v47, %v5076_v41 }
0x28ec   :  { %6174 = vmatprep.mubr.msk.f32.mxu1 %vm443_vm0, %v5078_v59 }
0x28ed   :  { %6175 = vmatmul.mubr.msk.f32.vlgmr.msra.gmra.mxu1 %vm443_vm0, %v5079_v60 }
0x29ad   :  { %v6176_v5 = vpop.f32.mrf.mxu1 }
0x29ae   :  { %v5158_v49 = vadd.f32 %v6452_v10, %v6176_v5 }
0x29af   :  { %v5152_v24 = vpop.f32.mrf.mxu1 }
0x29b0   :  { %v5153_v11 = vadd.f32 %v6452_v10, %v5152_v24  ;;  %v5162_v51 = vmax.f32 %v5158_v49, 0.0 }
0x29b2   :  { %v5161_v2 = vmax.f32 %v5153_v11, 0.0 }
0x29b4   :  { %6193 = vmatprep.mubr.msk.f32.mxu0 %vm2882_vm13, %v5161_v2 }
0x29b5   :  { %6194 = vmatmul.mubr.msk.f32.vlgmr.msra.gmra.mxu0 %vm2882_vm13, %v5162_v51 }
0x2a75   :  { %v6195_v1 = vpop.f32.mrf.mxu0 }
0x2a76   :  { %v5241_v16 = vadd.f32 %v6453_v14, %v6195_v1 }
0x2a77   :  { %v5235_v17 = vpop.f32.mrf.mxu0 }
0x2a78   :  { %v5245_v37 = vadd.f32 %v5241_v16, %v5079_v60  ;;  %v5236_v39 = vadd.f32 %v6453_v14, %v5235_v17 }
0x2a7a   :  { %v5244_v45 = vadd.f32 %v5236_v39, %v5078_v59  ;;  %v5249_v9 = vsel %vm443_vm0, %v5245_v37, 0.0 }
0x2a7b   :  { %5250 = vadd.xlane.f32.xlu0 %v5249_v9 }
0x2a7c   :  { %v5246_v19 = vsel %vm443_vm0, %v5244_v45, 0.0 }
0x2a7d   :  { %5247 = vadd.xlane.f32.xlu1 %v5246_v19 }
0x2b04   :  { %v5251_v15 = vpop.xlane.xlu0 %5250 }
0x2b05   :  { %v5253_v21 = vmul.f32 0.03125, %v5251_v15 }
0x2b06   :  { %v5248_v52 = vpop.xlane.xlu1 %5247 }
0x2b07   :  { %v5255_v42 = vsub.f32 %v5245_v37, %v5253_v21  ;;  %v5252_v0 = vmul.f32 0.03125, %v5248_v52 }
0x2b09   :  { %v5254_v63 = vsub.f32 %v5244_v45, %v5252_v0  ;;  %v5257_v25 = vmul.f32 %v5255_v42, %v5255_v42 }
0x2b0b   :  { %v5261_v26 = vsel %vm443_vm0, %v5257_v25, 0.0  ;;  %v5256_v12 = vmul.f32 %v5254_v63, %v5254_v63 }
0x2b0c   :  { %5262 = vadd.xlane.f32.xlu0 %v5261_v26 }
0x2b0d   :  { %v5258_v54 = vsel %vm443_vm0, %v5256_v12, 0.0 }
0x2b0e   :  { %5259 = vadd.xlane.f32.xlu1 %v5258_v54 }
0x2b95   :  { %v5263_v4 = vpop.xlane.xlu0 %5262 }
0x2b96   :  { %v5265_v61 = vmul.f32 0.03125, %v5263_v4 }
0x2b97   :  { %v5260_v30 = vpop.xlane.xlu1 %5259 }
0x2b98   :  { %v5267_v31 = vadd.f32 1e-05, %v5265_v61  ;;  %v5264_v22 = vmul.f32 0.03125, %v5260_v30 }
0x2b9a   :  { %6398 = vrsqrt.f32 %v5267_v31  ;;  %v5266_v34 = vadd.f32 1e-05, %v5264_v22 }
0x2b9c   :  { %6400 = vrsqrt.f32 %v5266_v34 }
0x2ba7   :  { %v6399_v7 = vpop.eup %6398 }
0x2ba8   :  { %v5271_v20 = vmul.f32 %v6399_v7, %v5255_v42 }
0x2ba9   :  { %v6401_v36 = vpop.eup %6400 }
0x2baa   :  { %v5270_v32 = vmul.f32 %v6401_v36, %v5254_v63  ;;  %v5273_v55 = vmul.f32 %v6454_v50, %v5271_v20 }
0x2bac   :  { %v5272_v3 = vmul.f32 %v6454_v50, %v5270_v32  ;;  %v5275_v46 = vadd.f32 %v6455_v8, %v5273_v55 }
0x2bae   :  { %v5274_v18 = vadd.f32 %v6455_v8, %v5272_v3  ;;  %5277 = vst.msk [vmem:[#allocation29 + $0x8] sm:$0xff] %vm443_vm0, %v5275_v46 }
0x2bb0   :  { %5276 = vst.msk [vmem:[#allocation29] sm:$0xff] %vm443_vm0, %v5274_v18 }
0x2bb1   :  { %6807 = shalt.err (!%p6804_p5)
}
0x2bb2   :  { %5289 = dma.vmem_to_hbm [thread:$0]  %s5284_s20, 256, %s7053_s3, [#allocation4], %s6869_s0, %s6869_s0, %s6870_s2  }
0x2bb3   :  { %6834 = dma.done.wait [#allocation4], 256  }
0x2bb4   :  { %6835 = vsyncadd [#allocation4], 4294967040 }
0x2bb5   :  { %5293 = vsyncpa [#allocation3], 1 }
0x2bb6   :  { %5294 = vsyncpa [#allocation6], 1 }
0x2bb7   :  { %5295 = vsyncpa [#allocation9], 1 }
0x2bb8   :  { %5296 = vsyncpa [#allocation12], 1 }
0x2bb9   :  { %5297 = vsyncpa [#allocation15], 1 }
0x2bba   :  { %5298 = vsyncpa [#allocation18], 1 }
0x2bbb   :  { %5299 = vsyncpa [#allocation21], 1 }
0x2bbc   :  { %5300 = vsyncpa [#allocation24], 1 }
0x2bbd   :  { %5301 = vsyncpa [#allocation27], 1 }
0x2bbe   :  { %5302 = vsyncpa [#allocation4], 1 }

</bundles_post_ra>
